<compile_context>
chip_gen: v6e
topology: v6e:2x2x1
jax: 0.10.0
libtpu: 0.0.40
codegen_flags: <defaults>
</compile_context>

<pallas_src>
import functools
import math

import jax
import jax.numpy as jnp
from jax.experimental import pallas as pl
from jax.experimental.pallas import tpu as pltpu


def encoder_layer_kernel(x_ref, wqkv_ref, bqkv_ref, wp_ref, bp_ref,
                         gamma_ref, beta_ref,
                         out_ref, flags_ref,
                         *, batch, seq, n_heads, d_k, d_v, emit_ro):
    """Whole (B*S, D) batch in one step: fused bf16 QKV projection, per-sequence
    multi-head scaled-dot-product attention (no mask / no dropout), bf16 output
    projection, residual add, LayerNorm, and in-kernel NaN-flag reduction.

    emit_ro (static): False -> write LayerNorm output `no` (hot path);
                      True  -> write residual output `ro` (rare NaN fallback)."""
    bf16 = jnp.bfloat16
    x = x_ref[...]                                   # (B*S, D) f32
    H = n_heads

    # ---- fused Q/K/V projection: one (B*S, D) @ (D, 2*H*dk + H*dv) bf16 matmul, f32 acc ----
    qkv = jnp.dot(x.astype(bf16), wqkv_ref[...],
                  preferred_element_type=jnp.float32) + bqkv_ref[...]
    q = qkv[:, : H * d_k]                            # (B*S, H*dk)
    k = qkv[:, H * d_k: 2 * H * d_k]                 # (B*S, H*dk)
    v = qkv[:, 2 * H * d_k:]                         # (B*S, H*dv)

    scale = 1.0 / math.sqrt(d_k)
    ctx_rows = []
    # Static unroll over the (tiny) batch; each element uses a single head-batched einsum,
    # so attention never mixes tokens across sequences.
    for b in range(batch):
        lo, hi = b * seq, (b + 1) * seq
        q3 = q[lo:hi].reshape(seq, H, d_k).astype(bf16)
        k3 = k[lo:hi].reshape(seq, H, d_k).astype(bf16)
        v3 = v[lo:hi].reshape(seq, H, d_v).astype(bf16)

        # bf16 MXU operands, f32 accumulation.
        scores = jnp.einsum('qhd,khd->hqk', q3, k3,
                            preferred_element_type=jnp.float32) * scale   # (H, S, S) f32
        m = jnp.max(scores, axis=-1, keepdims=True)
        e = jnp.exp(scores - m)                       # f32 exp (v5e-safe EUP path)
        denom = jnp.sum(e, axis=-1, keepdims=True)
        attn = e * pl.reciprocal(denom, approx=False)  # exact softmax (correctness note)

        # ctx produced directly in (q, h, d) order -> flatten to (S, H*dv) is contiguous.
        ctx_b = jnp.einsum('hqk,khd->qhd', attn.astype(bf16), v3,
                           preferred_element_type=jnp.float32)            # (S, H, dv) f32
        ctx_rows.append(ctx_b.reshape(seq, H * d_v))

    ctx = jnp.concatenate(ctx_rows, axis=0)           # (B*S, H*dv) f32
    # torch.where(isnan(context), 0, context)
    ctx = jnp.where(jnp.isnan(ctx), jnp.zeros_like(ctx), ctx)

    # ---- output projection (bf16 MXU, f32 acc) + residual ----
    out = jnp.dot(ctx.astype(bf16), wp_ref[...],
                  preferred_element_type=jnp.float32) + bp_ref[...]
    ro = x + out                                      # residual in f32

    # ---- LayerNorm(d_model), eps=1e-5, biased variance (matches PyTorch) ----
    mean = jnp.mean(ro, axis=-1, keepdims=True)
    var = jnp.mean((ro - mean) ** 2, axis=-1, keepdims=True)
    no = (ro - mean) * jax.lax.rsqrt(var + 1e-5) * gamma_ref[...] + beta_ref[...]

    out_ref[...] = ro if emit_ro else no

    # ---- merged NaN flags in one lane-dense (1, 128) block: lane0 = any_nan(no), lane1 = any_nan(ro)
    nan_no = jnp.max(jnp.isnan(no).astype(jnp.float32), axis=(0, 1), keepdims=True)  # (1,1)
    nan_ro = jnp.max(jnp.isnan(ro).astype(jnp.float32), axis=(0, 1), keepdims=True)  # (1,1)
    lane = jax.lax.broadcasted_iota(jnp.int32, (1, 128), 1)
    flags_ref[...] = jnp.where(lane == 0, nan_no,
                               jnp.where(lane == 1, nan_ro, jnp.float32(0.0)))


def encoder_layer_forward(x, params, *, n_heads, d_k, d_v):
    """params: (wqkv_t[bf16], bqkv[f32], wp_t[bf16], bp[f32], gamma[f32], beta[f32]).
    wqkv_t is the fused, pre-transposed (D, 2*H*dk + H*dv) QKV weight."""
    B, S, D = x.shape
    rows = B * S
    x2d = x.reshape(rows, D)
    W = 2 * n_heads * d_k + n_heads * d_v

    def make_call(emit_ro):
        kernel = functools.partial(encoder_layer_kernel, batch=B, seq=S,
                                   n_heads=n_heads, d_k=d_k, d_v=d_v,
                                   emit_ro=emit_ro)
        in_specs = ([pl.BlockSpec((rows, D), lambda i: (0, 0))] +
                    [pl.BlockSpec(p.shape, lambda i: (0, 0)) for p in params])
        out_specs = (pl.BlockSpec((rows, D), lambda i: (0, 0)),
                     pl.BlockSpec((1, 128), lambda i: (0, 0)))

        flops = (2 * rows * D * W                      # fused QKV projection
                 + 2 * B * n_heads * S * S * d_k       # QK^T
                 + 2 * B * n_heads * S * S * d_v       # attn @ V
                 + 2 * rows * (n_heads * d_v) * D)     # output projection
        transcendentals = B * n_heads * S * S + rows   # exp + rsqrt
        bytes_accessed = (4 * rows * D                 # x (f32 in)
                          + 2 * D * W + 4 * W          # wqkv (bf16) + bqkv
                          + 2 * n_heads * d_v * D      # wp (bf16)
                          + 3 * 4 * D                  # bp, gamma, beta
                          + 4 * rows * D + 4 * 128)    # out + flags

        return pl.pallas_call(
            kernel,
            out_shape=(jax.ShapeDtypeStruct((rows, D), jnp.float32),
                       jax.ShapeDtypeStruct((1, 128), jnp.float32)),
            grid_spec=pltpu.PrefetchScalarGridSpec(
                num_scalar_prefetch=0,
                grid=(1,),
                in_specs=in_specs,
                out_specs=out_specs),
            compiler_params=pltpu.CompilerParams(
                dimension_semantics=("arbitrary",)),
            cost_estimate=pl.CostEstimate(flops=flops,
                                          transcendentals=transcendentals,
                                          bytes_accessed=bytes_accessed),
        )

    # Hot path: LayerNorm output + NaN flags only (no duplicate full-size ro write).
    no2d, flags = make_call(False)(x2d, *params)

    # MultiHeadAttention: if isnan(no).any() and not isnan(ro).any(): return ro else: return no
    # (.any() is over the whole batched tensor, matching PyTorch.)
    any_nan_no = flags[0, 0] > 0.0
    any_nan_ro = flags[0, 1] > 0.0
    use_ro = jnp.logical_and(any_nan_no, jnp.logical_not(any_nan_ro))

    def take_ro():
        # Rare fallback: recompute and emit ro with the same kernel (emit_ro=True).
        ro2d, _ = make_call(True)(x2d, *params)
        return ro2d

    out2d = jax.lax.cond(use_ro, take_ro, lambda: no2d)
    return out2d.reshape(B, S, D)


def init_params(key, d_model, d_k, d_v, n_heads):
    ks = jax.random.split(key, 8)
    s = 0.1
    # nn.Linear stores weight as (out_features, in_features); pre-transpose to (in, out),
    # fuse Wq/Wk/Wv (and biases) into a single projection, and store weights as bf16
    # so the MXU sees bf16 operands (f32 accumulation happens in-kernel).
    wq = jax.random.normal(ks[0], (d_k * n_heads, d_model), jnp.float32) * s
    bq = jax.random.normal(ks[1], (d_k * n_heads,), jnp.float32) * s
    wk = jax.random.normal(ks[2], (d_k * n_heads, d_model), jnp.float32) * s
    bk = jax.random.normal(ks[3], (d_k * n_heads,), jnp.float32) * s
    wv = jax.random.normal(ks[4], (d_v * n_heads, d_model), jnp.float32) * s
    bv = jax.random.normal(ks[5], (d_v * n_heads,), jnp.float32) * s
    wp = jax.random.normal(ks[6], (d_model, d_v * n_heads), jnp.float32) * s
    bp = jax.random.normal(ks[7], (d_model,), jnp.float32) * s
    gamma = jnp.ones((d_model,), jnp.float32)
    beta = jnp.zeros((d_model,), jnp.float32)

    wqkv_t = jnp.concatenate([wq.T, wk.T, wv.T], axis=1).astype(jnp.bfloat16)  # (D, 2*H*dk+H*dv)
    bqkv = jnp.concatenate([bq, bk, bv]).reshape(1, -1)                        # (1, 2*H*dk+H*dv) f32
    return (wqkv_t, bqkv,
            wp.T.astype(jnp.bfloat16), bp.reshape(1, -1),
            gamma.reshape(1, -1), beta.reshape(1, -1))


if __name__ == "__main__":
    # Small shapes consistent with the module's forward:
    #   enc_inputs: (batch=2, seq=8, d_model=32); d_k=d_v=16, n_heads=4.
    #   d_ff is unused in forward; dropout=None in EncoderLayer -> no dropout path.
    B, S, d_model = 2, 8, 32
    d_k = d_v = 16
    n_heads = 4

    key = jax.random.PRNGKey(0)
    kx, kp = jax.random.split(key)
    x = jax.random.normal(kx, (B, S, d_model), jnp.float32)
    params = init_params(kp, d_model, d_k, d_v, n_heads)

    fwd = jax.jit(functools.partial(encoder_layer_forward,
                                    n_heads=n_heads, d_k=d_k, d_v=d_v))
    out = fwd(x, params)
    jax.block_until_ready(out)
    assert out.shape == (B, S, d_model)
    print("KERNEL_OK")
</pallas_src>

<mosaic_0001>
module attributes {stable_mosaic.version = 11 : i64} {
  func.func @encoder_layer_kernel(%arg0: i32, %arg1: memref<16x32xf32, #tpu.memory_space<vmem>>, %arg2: memref<32x192xbf16, #tpu.memory_space<vmem>>, %arg3: memref<1x192xf32, #tpu.memory_space<vmem>>, %arg4: memref<64x32xbf16, #tpu.memory_space<vmem>>, %arg5: memref<1x32xf32, #tpu.memory_space<vmem>>, %arg6: memref<1x32xf32, #tpu.memory_space<vmem>>, %arg7: memref<1x32xf32, #tpu.memory_space<vmem>>, %arg8: memref<16x32xf32, #tpu.memory_space<vmem>>, %arg9: memref<1x128xf32, #tpu.memory_space<vmem>>) attributes {dimension_semantics = [#tpu.dimension_semantics<arbitrary>], iteration_bounds = array<i64: 1>, scalar_prefetch = 0 : i64, scratch_operands = 0 : i64, tpu.core_type = #tpu.core_type<tc>, window_params = [{pipeline_mode = #tpu.pipeline_mode<synchronous>, transform_indices = @transform_0, window_bounds = array<i64: 16, 32>}, {pipeline_mode = #tpu.pipeline_mode<synchronous>, transform_indices = @transform_1, window_bounds = array<i64: 32, 192>}, {pipeline_mode = #tpu.pipeline_mode<synchronous>, transform_indices = @transform_2, window_bounds = array<i64: 1, 192>}, {pipeline_mode = #tpu.pipeline_mode<synchronous>, transform_indices = @transform_3, window_bounds = array<i64: 64, 32>}, {pipeline_mode = #tpu.pipeline_mode<synchronous>, transform_indices = @transform_4, window_bounds = array<i64: 1, 32>}, {pipeline_mode = #tpu.pipeline_mode<synchronous>, transform_indices = @transform_5, window_bounds = array<i64: 1, 32>}, {pipeline_mode = #tpu.pipeline_mode<synchronous>, transform_indices = @transform_6, window_bounds = array<i64: 1, 32>}, {pipeline_mode = #tpu.pipeline_mode<synchronous>, transform_indices = @transform_7, window_bounds = array<i64: 16, 32>}, {pipeline_mode = #tpu.pipeline_mode<synchronous>, transform_indices = @transform_8, window_bounds = array<i64: 1, 128>}]} {
    %c0 = arith.constant 0 : index
    %c0_0 = arith.constant 0 : index
    %0 = vector.load %arg1[%c0, %c0_0] : memref<16x32xf32, #tpu.memory_space<vmem>>, vector<16x32xf32>
    %1 = arith.truncf %0 : vector<16x32xf32> to vector<16x32xbf16>
    %c0_1 = arith.constant 0 : index
    %c0_2 = arith.constant 0 : index
    %2 = vector.load %arg2[%c0_1, %c0_2] : memref<32x192xbf16, #tpu.memory_space<vmem>>, vector<32x192xbf16>
    %cst = arith.constant dense<0.000000e+00> : vector<16x192xf32>
    %3 = tpu.matmul %1, %2, %cst {dimension_numbers = #tpu.dot_dimension_numbers<[1], [0], [0], [1], [0, 0, 1, 1], [], []>} : vector<16x32xbf16>, vector<32x192xbf16>, vector<16x192xf32> -> vector<16x192xf32>
    %c0_3 = arith.constant 0 : index
    %c0_4 = arith.constant 0 : index
    %4 = vector.load %arg3[%c0_3, %c0_4] : memref<1x192xf32, #tpu.memory_space<vmem>>, vector<1x192xf32>
    %5 = vector.broadcast %4 : vector<1x192xf32> to vector<16x192xf32>
    %6 = arith.addf %3, %5 : vector<16x192xf32>
    %7 = vector.extract_strided_slice %6 {offsets = [0, 0], sizes = [16, 64], strides = [1, 1]} : vector<16x192xf32> to vector<16x64xf32>
    %8 = vector.extract_strided_slice %6 {offsets = [0, 64], sizes = [16, 64], strides = [1, 1]} : vector<16x192xf32> to vector<16x64xf32>
    %9 = vector.extract_strided_slice %6 {offsets = [0, 128], sizes = [16, 64], strides = [1, 1]} : vector<16x192xf32> to vector<16x64xf32>
    %10 = vector.extract_strided_slice %7 {offsets = [0, 0], sizes = [8, 64], strides = [1, 1]} : vector<16x64xf32> to vector<8x64xf32>
    %11 = vector.shape_cast %10 : vector<8x64xf32> to vector<8x4x16xf32>
    %12 = arith.truncf %11 : vector<8x4x16xf32> to vector<8x4x16xbf16>
    %13 = vector.extract_strided_slice %8 {offsets = [0, 0], sizes = [8, 64], strides = [1, 1]} : vector<16x64xf32> to vector<8x64xf32>
    %14 = vector.shape_cast %13 : vector<8x64xf32> to vector<8x4x16xf32>
    %15 = arith.truncf %14 : vector<8x4x16xf32> to vector<8x4x16xbf16>
    %16 = vector.extract_strided_slice %9 {offsets = [0, 0], sizes = [8, 64], strides = [1, 1]} : vector<16x64xf32> to vector<8x64xf32>
    %17 = vector.shape_cast %16 : vector<8x64xf32> to vector<8x4x16xf32>
    %18 = arith.truncf %17 : vector<8x4x16xf32> to vector<8x4x16xbf16>
    "tpu.trace_start"() <{level = 10 : i32, message = "qhd,khd->hqk"}> : () -> ()
    %cst_5 = arith.constant dense<0.000000e+00> : vector<4x8x8xf32>
    %19 = tpu.matmul %12, %15, %cst_5 {dimension_numbers = #tpu.dot_dimension_numbers<[2], [2], [0], [0], [0, 1, 0, 0, 1, 0], [1], [1]>} : vector<8x4x16xbf16>, vector<8x4x16xbf16>, vector<4x8x8xf32> -> vector<4x8x8xf32>
    "tpu.trace_stop"() : () -> ()
    %cst_6 = arith.constant 2.500000e-01 : f32
    %20 = vector.broadcast %cst_6 : f32 to vector<4x8x8xf32>
    %21 = arith.mulf %19, %20 : vector<4x8x8xf32>
    %cst_7 = arith.constant dense<0xFF800000> : vector<4x8xf32>
    %22 = vector.multi_reduction <maximumf>, %21, %cst_7 [2] : vector<4x8x8xf32> to vector<4x8xf32>
    %23 = vector.shape_cast %22 : vector<4x8xf32> to vector<4x8x1xf32>
    %24 = vector.broadcast %23 : vector<4x8x1xf32> to vector<4x8x8xf32>
    %25 = arith.subf %21, %24 : vector<4x8x8xf32>
    %26 = math.exp %25 : vector<4x8x8xf32>
    %cst_8 = arith.constant dense<0.000000e+00> : vector<4x8xf32>
    %27 = vector.multi_reduction <add>, %26, %cst_8 [2] : vector<4x8x8xf32> to vector<4x8xf32>
    %28 = vector.shape_cast %27 : vector<4x8xf32> to vector<4x8x1xf32>
    %29 = tpu.reciprocal %28 : vector<4x8x1xf32> -> vector<4x8x1xf32>
    %30 = vector.broadcast %29 : vector<4x8x1xf32> to vector<4x8x8xf32>
    %31 = arith.mulf %26, %30 : vector<4x8x8xf32>
    %32 = arith.truncf %31 : vector<4x8x8xf32> to vector<4x8x8xbf16>
    "tpu.trace_start"() <{level = 10 : i32, message = "hqk,khd->qhd"}> : () -> ()
    %cst_9 = arith.constant dense<0.000000e+00> : vector<4x16x8xf32>
    %33 = tpu.matmul %18, %32, %cst_9 {dimension_numbers = #tpu.dot_dimension_numbers<[0], [2], [2], [1], [0, 1, 0, 2, 1, 1], [1], [0]>} : vector<8x4x16xbf16>, vector<4x8x8xbf16>, vector<4x16x8xf32> -> vector<4x16x8xf32>
    %34 = tpu.transpose %33, [2, 0, 1] : vector<4x16x8xf32> -> vector<8x4x16xf32>
    "tpu.trace_stop"() : () -> ()
    %35 = vector.shape_cast %34 : vector<8x4x16xf32> to vector<8x64xf32>
    %36 = vector.extract_strided_slice %7 {offsets = [8, 0], sizes = [8, 64], strides = [1, 1]} : vector<16x64xf32> to vector<8x64xf32>
    %37 = vector.shape_cast %36 : vector<8x64xf32> to vector<8x4x16xf32>
    %38 = arith.truncf %37 : vector<8x4x16xf32> to vector<8x4x16xbf16>
    %39 = vector.extract_strided_slice %8 {offsets = [8, 0], sizes = [8, 64], strides = [1, 1]} : vector<16x64xf32> to vector<8x64xf32>
    %40 = vector.shape_cast %39 : vector<8x64xf32> to vector<8x4x16xf32>
    %41 = arith.truncf %40 : vector<8x4x16xf32> to vector<8x4x16xbf16>
    %42 = vector.extract_strided_slice %9 {offsets = [8, 0], sizes = [8, 64], strides = [1, 1]} : vector<16x64xf32> to vector<8x64xf32>
    %43 = vector.shape_cast %42 : vector<8x64xf32> to vector<8x4x16xf32>
    %44 = arith.truncf %43 : vector<8x4x16xf32> to vector<8x4x16xbf16>
    "tpu.trace_start"() <{level = 10 : i32, message = "qhd,khd->hqk"}> : () -> ()
    %cst_10 = arith.constant dense<0.000000e+00> : vector<4x8x8xf32>
    %45 = tpu.matmul %38, %41, %cst_10 {dimension_numbers = #tpu.dot_dimension_numbers<[2], [2], [0], [0], [0, 1, 0, 0, 1, 0], [1], [1]>} : vector<8x4x16xbf16>, vector<8x4x16xbf16>, vector<4x8x8xf32> -> vector<4x8x8xf32>
    "tpu.trace_stop"() : () -> ()
    %cst_11 = arith.constant 2.500000e-01 : f32
    %46 = vector.broadcast %cst_11 : f32 to vector<4x8x8xf32>
    %47 = arith.mulf %45, %46 : vector<4x8x8xf32>
    %cst_12 = arith.constant dense<0xFF800000> : vector<4x8xf32>
    %48 = vector.multi_reduction <maximumf>, %47, %cst_12 [2] : vector<4x8x8xf32> to vector<4x8xf32>
    %49 = vector.shape_cast %48 : vector<4x8xf32> to vector<4x8x1xf32>
    %50 = vector.broadcast %49 : vector<4x8x1xf32> to vector<4x8x8xf32>
    %51 = arith.subf %47, %50 : vector<4x8x8xf32>
    %52 = math.exp %51 : vector<4x8x8xf32>
    %cst_13 = arith.constant dense<0.000000e+00> : vector<4x8xf32>
    %53 = vector.multi_reduction <add>, %52, %cst_13 [2] : vector<4x8x8xf32> to vector<4x8xf32>
    %54 = vector.shape_cast %53 : vector<4x8xf32> to vector<4x8x1xf32>
    %55 = tpu.reciprocal %54 : vector<4x8x1xf32> -> vector<4x8x1xf32>
    %56 = vector.broadcast %55 : vector<4x8x1xf32> to vector<4x8x8xf32>
    %57 = arith.mulf %52, %56 : vector<4x8x8xf32>
    %58 = arith.truncf %57 : vector<4x8x8xf32> to vector<4x8x8xbf16>
    "tpu.trace_start"() <{level = 10 : i32, message = "hqk,khd->qhd"}> : () -> ()
    %cst_14 = arith.constant dense<0.000000e+00> : vector<4x16x8xf32>
    %59 = tpu.matmul %44, %58, %cst_14 {dimension_numbers = #tpu.dot_dimension_numbers<[0], [2], [2], [1], [0, 1, 0, 2, 1, 1], [1], [0]>} : vector<8x4x16xbf16>, vector<4x8x8xbf16>, vector<4x16x8xf32> -> vector<4x16x8xf32>
    %60 = tpu.transpose %59, [2, 0, 1] : vector<4x16x8xf32> -> vector<8x4x16xf32>
    "tpu.trace_stop"() : () -> ()
    %61 = vector.shape_cast %60 : vector<8x4x16xf32> to vector<8x64xf32>
    %62 = tpu.concatenate %35, %61 in 0 : vector<8x64xf32>, vector<8x64xf32> -> vector<16x64xf32>
    %63 = arith.cmpf one, %62, %62 : vector<16x64xf32>
    %cst_15 = arith.constant 0.000000e+00 : f32
    %64 = vector.broadcast %cst_15 : f32 to vector<16x64xf32>
    %65 = arith.select %63, %64, %62 : vector<16x64xi1>, vector<16x64xf32>
    %66 = arith.truncf %65 : vector<16x64xf32> to vector<16x64xbf16>
    %c0_16 = arith.constant 0 : index
    %c0_17 = arith.constant 0 : index
    %67 = vector.load %arg4[%c0_16, %c0_17] : memref<64x32xbf16, #tpu.memory_space<vmem>>, vector<64x32xbf16>
    %cst_18 = arith.constant dense<0.000000e+00> : vector<16x32xf32>
    %68 = tpu.matmul %66, %67, %cst_18 {dimension_numbers = #tpu.dot_dimension_numbers<[1], [0], [0], [1], [0, 0, 1, 1], [], []>} : vector<16x64xbf16>, vector<64x32xbf16>, vector<16x32xf32> -> vector<16x32xf32>
    %c0_19 = arith.constant 0 : index
    %c0_20 = arith.constant 0 : index
    %69 = vector.load %arg5[%c0_19, %c0_20] : memref<1x32xf32, #tpu.memory_space<vmem>>, vector<1x32xf32>
    %70 = vector.broadcast %69 : vector<1x32xf32> to vector<16x32xf32>
    %71 = arith.addf %68, %70 : vector<16x32xf32>
    %72 = arith.addf %0, %71 : vector<16x32xf32>
    %cst_21 = arith.constant dense<0.000000e+00> : vector<16xf32>
    %73 = vector.multi_reduction <add>, %72, %cst_21 [1] : vector<16x32xf32> to vector<16xf32>
    %74 = vector.shape_cast %73 : vector<16xf32> to vector<16x1xf32>
    %cst_22 = arith.constant 3.200000e+01 : f32
    %75 = vector.broadcast %cst_22 : f32 to vector<16x1xf32>
    %76 = arith.divf %74, %75 : vector<16x1xf32>
    %77 = vector.broadcast %76 : vector<16x1xf32> to vector<16x32xf32>
    %78 = arith.subf %72, %77 : vector<16x32xf32>
    %79 = arith.mulf %78, %78 : vector<16x32xf32>
    %cst_23 = arith.constant dense<0.000000e+00> : vector<16xf32>
    %80 = vector.multi_reduction <add>, %79, %cst_23 [1] : vector<16x32xf32> to vector<16xf32>
    %81 = vector.shape_cast %80 : vector<16xf32> to vector<16x1xf32>
    %cst_24 = arith.constant 3.200000e+01 : f32
    %82 = vector.broadcast %cst_24 : f32 to vector<16x1xf32>
    %83 = arith.divf %81, %82 : vector<16x1xf32>
    %84 = vector.broadcast %76 : vector<16x1xf32> to vector<16x32xf32>
    %85 = arith.subf %72, %84 : vector<16x32xf32>
    %cst_25 = arith.constant 9.99999974E-6 : f32
    %86 = vector.broadcast %cst_25 : f32 to vector<16x1xf32>
    %87 = arith.addf %83, %86 : vector<16x1xf32>
    %88 = math.rsqrt %87 : vector<16x1xf32>
    %89 = vector.broadcast %88 : vector<16x1xf32> to vector<16x32xf32>
    %90 = arith.mulf %85, %89 : vector<16x32xf32>
    %c0_26 = arith.constant 0 : index
    %c0_27 = arith.constant 0 : index
    %91 = vector.load %arg6[%c0_26, %c0_27] : memref<1x32xf32, #tpu.memory_space<vmem>>, vector<1x32xf32>
    %92 = vector.broadcast %91 : vector<1x32xf32> to vector<16x32xf32>
    %93 = arith.mulf %90, %92 : vector<16x32xf32>
    %c0_28 = arith.constant 0 : index
    %c0_29 = arith.constant 0 : index
    %94 = vector.load %arg7[%c0_28, %c0_29] : memref<1x32xf32, #tpu.memory_space<vmem>>, vector<1x32xf32>
    %95 = vector.broadcast %94 : vector<1x32xf32> to vector<16x32xf32>
    %96 = arith.addf %93, %95 : vector<16x32xf32>
    %c0_30 = arith.constant 0 : index
    %c0_31 = arith.constant 0 : index
    %97 = vector.load %arg8[%c0_30, %c0_31] : memref<16x32xf32, #tpu.memory_space<vmem>>, vector<16x32xf32>
    tpu.vector_store %arg8[%c0_30, %c0_31], %96 {strides = array<i32>} : memref<16x32xf32, #tpu.memory_space<vmem>>, vector<16x32xf32>,
    %98 = arith.cmpf one, %96, %96 : vector<16x32xf32>
    %99 = arith.extui %98 : vector<16x32xi1> to vector<16x32xi32>
    %100 = arith.sitofp %99 : vector<16x32xi32> to vector<16x32xf32>
    %101 = vector.shape_cast %100 : vector<16x32xf32> to vector<1x16x32xf32>
    %cst_32 = arith.constant dense<0xFF800000> : vector<1xf32>
    %102 = vector.multi_reduction <maximumf>, %101, %cst_32 [1, 2] : vector<1x16x32xf32> to vector<1xf32>
    %103 = vector.shape_cast %102 : vector<1xf32> to vector<1x1x1xf32>
    %104 = vector.extract %103[0, 0, 0] : f32 from vector<1x1x1xf32>
    %105 = vector.broadcast %104 : f32 to vector<1x1xf32>
    %106 = arith.cmpf one, %72, %72 : vector<16x32xf32>
    %107 = arith.extui %106 : vector<16x32xi1> to vector<16x32xi32>
    %108 = arith.sitofp %107 : vector<16x32xi32> to vector<16x32xf32>
    %109 = vector.shape_cast %108 : vector<16x32xf32> to vector<1x16x32xf32>
    %cst_33 = arith.constant dense<0xFF800000> : vector<1xf32>
    %110 = vector.multi_reduction <maximumf>, %109, %cst_33 [1, 2] : vector<1x16x32xf32> to vector<1xf32>
    %111 = vector.shape_cast %110 : vector<1xf32> to vector<1x1x1xf32>
    %112 = vector.extract %111[0, 0, 0] : f32 from vector<1x1x1xf32>
    %113 = vector.broadcast %112 : f32 to vector<1x1xf32>
    %114 = tpu.iota {dimensions = array<i32: 1>} : vector<1x128xi32>
    %c0_i32 = arith.constant 0 : i32
    %115 = vector.broadcast %c0_i32 : i32 to vector<1x128xi32>
    %116 = arith.cmpi eq, %114, %115 : vector<1x128xi32>
    %c1_i32 = arith.constant 1 : i32
    %117 = vector.broadcast %c1_i32 : i32 to vector<1x128xi32>
    %118 = arith.cmpi eq, %114, %117 : vector<1x128xi32>
    %cst_34 = arith.constant 0.000000e+00 : f32
    %119 = vector.shape_cast %113 : vector<1x1xf32> to vector<1x1xf32>
    %120 = vector.broadcast %119 : vector<1x1xf32> to vector<1x128xf32>
    %121 = vector.broadcast %cst_34 : f32 to vector<1x128xf32>
    %122 = arith.select %118, %120, %121 : vector<1x128xi1>, vector<1x128xf32>
    %123 = vector.shape_cast %105 : vector<1x1xf32> to vector<1x1xf32>
    %124 = vector.broadcast %123 : vector<1x1xf32> to vector<1x128xf32>
    %125 = arith.select %116, %124, %122 : vector<1x128xi1>, vector<1x128xf32>
    %c0_35 = arith.constant 0 : index
    %c0_36 = arith.constant 0 : index
    %126 = vector.load %arg9[%c0_35, %c0_36] : memref<1x128xf32, #tpu.memory_space<vmem>>, vector<1x128xf32>
    tpu.vector_store %arg9[%c0_35, %c0_36], %125 {strides = array<i32>} : memref<1x128xf32, #tpu.memory_space<vmem>>, vector<1x128xf32>,
    return
  }
  func.func @transform_0(%arg0: i32) -> (i32, i32) {
    %c0_i32 = arith.constant 0 : i32
    %c0_i32_0 = arith.constant 0 : i32
    %c0_i32_1 = arith.constant 0 : i32
    return %c0_i32, %c0_i32_0 : i32, i32
  }
  func.func @transform_1(%arg0: i32) -> (i32, i32) {
    %c0_i32 = arith.constant 0 : i32
    %c0_i32_0 = arith.constant 0 : i32
    %c0_i32_1 = arith.constant 0 : i32
    return %c0_i32, %c0_i32_0 : i32, i32
  }
  func.func @transform_2(%arg0: i32) -> (i32, i32) {
    %c0_i32 = arith.constant 0 : i32
    %c0_i32_0 = arith.constant 0 : i32
    %c0_i32_1 = arith.constant 0 : i32
    return %c0_i32, %c0_i32_0 : i32, i32
  }
  func.func @transform_3(%arg0: i32) -> (i32, i32) {
    %c0_i32 = arith.constant 0 : i32
    %c0_i32_0 = arith.constant 0 : i32
    %c0_i32_1 = arith.constant 0 : i32
    return %c0_i32, %c0_i32_0 : i32, i32
  }
  func.func @transform_4(%arg0: i32) -> (i32, i32) {
    %c0_i32 = arith.constant 0 : i32
    %c0_i32_0 = arith.constant 0 : i32
    %c0_i32_1 = arith.constant 0 : i32
    return %c0_i32, %c0_i32_0 : i32, i32
  }
  func.func @transform_5(%arg0: i32) -> (i32, i32) {
    %c0_i32 = arith.constant 0 : i32
    %c0_i32_0 = arith.constant 0 : i32
    %c0_i32_1 = arith.constant 0 : i32
    return %c0_i32, %c0_i32_0 : i32, i32
  }
  func.func @transform_6(%arg0: i32) -> (i32, i32) {
    %c0_i32 = arith.constant 0 : i32
    %c0_i32_0 = arith.constant 0 : i32
    %c0_i32_1 = arith.constant 0 : i32
    return %c0_i32, %c0_i32_0 : i32, i32
  }
  func.func @transform_7(%arg0: i32) -> (i32, i32) {
    %c0_i32 = arith.constant 0 : i32
    %c0_i32_0 = arith.constant 0 : i32
    %c0_i32_1 = arith.constant 0 : i32
    return %c0_i32, %c0_i32_0 : i32, i32
  }
  func.func @transform_8(%arg0: i32) -> (i32, i32) {
    %c0_i32 = arith.constant 0 : i32
    %c0_i32_0 = arith.constant 0 : i32
    %c0_i32_1 = arith.constant 0 : i32
    return %c0_i32, %c0_i32_0 : i32, i32
  }
}

module attributes {stable_mosaic.version = 11 : i64} {
  func.func @encoder_layer_kernel(%arg0: i32, %arg1: memref<16x32xf32, #tpu.memory_space<vmem>>, %arg2: memref<32x192xbf16, #tpu.memory_space<vmem>>, %arg3: memref<1x192xf32, #tpu.memory_space<vmem>>, %arg4: memref<64x32xbf16, #tpu.memory_space<vmem>>, %arg5: memref<1x32xf32, #tpu.memory_space<vmem>>, %arg6: memref<1x32xf32, #tpu.memory_space<vmem>>, %arg7: memref<1x32xf32, #tpu.memory_space<vmem>>, %arg8: memref<16x32xf32, #tpu.memory_space<vmem>>, %arg9: memref<1x128xf32, #tpu.memory_space<vmem>>) attributes {dimension_semantics = [#tpu.dimension_semantics<arbitrary>], iteration_bounds = array<i64: 1>, scalar_prefetch = 0 : i64, scratch_operands = 0 : i64, tpu.core_type = #tpu.core_type<tc>, window_params = [{pipeline_mode = #tpu.pipeline_mode<synchronous>, transform_indices = @transform_0, window_bounds = array<i64: 16, 32>}, {pipeline_mode = #tpu.pipeline_mode<synchronous>, transform_indices = @transform_1, window_bounds = array<i64: 32, 192>}, {pipeline_mode = #tpu.pipeline_mode<synchronous>, transform_indices = @transform_2, window_bounds = array<i64: 1, 192>}, {pipeline_mode = #tpu.pipeline_mode<synchronous>, transform_indices = @transform_3, window_bounds = array<i64: 64, 32>}, {pipeline_mode = #tpu.pipeline_mode<synchronous>, transform_indices = @transform_4, window_bounds = array<i64: 1, 32>}, {pipeline_mode = #tpu.pipeline_mode<synchronous>, transform_indices = @transform_5, window_bounds = array<i64: 1, 32>}, {pipeline_mode = #tpu.pipeline_mode<synchronous>, transform_indices = @transform_6, window_bounds = array<i64: 1, 32>}, {pipeline_mode = #tpu.pipeline_mode<synchronous>, transform_indices = @transform_7, window_bounds = array<i64: 16, 32>}, {pipeline_mode = #tpu.pipeline_mode<synchronous>, transform_indices = @transform_8, window_bounds = array<i64: 1, 128>}]} {
    %c0 = arith.constant 0 : index
    %c0_0 = arith.constant 0 : index
    %0 = vector.load %arg1[%c0, %c0_0] : memref<16x32xf32, #tpu.memory_space<vmem>>, vector<16x32xf32>
    %1 = arith.truncf %0 : vector<16x32xf32> to vector<16x32xbf16>
    %c0_1 = arith.constant 0 : index
    %c0_2 = arith.constant 0 : index
    %2 = vector.load %arg2[%c0_1, %c0_2] : memref<32x192xbf16, #tpu.memory_space<vmem>>, vector<32x192xbf16>
    %cst = arith.constant dense<0.000000e+00> : vector<16x192xf32>
    %3 = tpu.matmul %1, %2, %cst {dimension_numbers = #tpu.dot_dimension_numbers<[1], [0], [0], [1], [0, 0, 1, 1], [], []>} : vector<16x32xbf16>, vector<32x192xbf16>, vector<16x192xf32> -> vector<16x192xf32>
    %c0_3 = arith.constant 0 : index
    %c0_4 = arith.constant 0 : index
    %4 = vector.load %arg3[%c0_3, %c0_4] : memref<1x192xf32, #tpu.memory_space<vmem>>, vector<1x192xf32>
    %5 = vector.broadcast %4 : vector<1x192xf32> to vector<16x192xf32>
    %6 = arith.addf %3, %5 : vector<16x192xf32>
    %7 = vector.extract_strided_slice %6 {offsets = [0, 0], sizes = [16, 64], strides = [1, 1]} : vector<16x192xf32> to vector<16x64xf32>
    %8 = vector.extract_strided_slice %6 {offsets = [0, 64], sizes = [16, 64], strides = [1, 1]} : vector<16x192xf32> to vector<16x64xf32>
    %9 = vector.extract_strided_slice %6 {offsets = [0, 128], sizes = [16, 64], strides = [1, 1]} : vector<16x192xf32> to vector<16x64xf32>
    %10 = vector.extract_strided_slice %7 {offsets = [0, 0], sizes = [8, 64], strides = [1, 1]} : vector<16x64xf32> to vector<8x64xf32>
    %11 = vector.shape_cast %10 : vector<8x64xf32> to vector<8x4x16xf32>
    %12 = arith.truncf %11 : vector<8x4x16xf32> to vector<8x4x16xbf16>
    %13 = vector.extract_strided_slice %8 {offsets = [0, 0], sizes = [8, 64], strides = [1, 1]} : vector<16x64xf32> to vector<8x64xf32>
    %14 = vector.shape_cast %13 : vector<8x64xf32> to vector<8x4x16xf32>
    %15 = arith.truncf %14 : vector<8x4x16xf32> to vector<8x4x16xbf16>
    %16 = vector.extract_strided_slice %9 {offsets = [0, 0], sizes = [8, 64], strides = [1, 1]} : vector<16x64xf32> to vector<8x64xf32>
    %17 = vector.shape_cast %16 : vector<8x64xf32> to vector<8x4x16xf32>
    %18 = arith.truncf %17 : vector<8x4x16xf32> to vector<8x4x16xbf16>
    "tpu.trace_start"() <{level = 10 : i32, message = "qhd,khd->hqk"}> : () -> ()
    %cst_5 = arith.constant dense<0.000000e+00> : vector<4x8x8xf32>
    %19 = tpu.matmul %12, %15, %cst_5 {dimension_numbers = #tpu.dot_dimension_numbers<[2], [2], [0], [0], [0, 1, 0, 0, 1, 0], [1], [1]>} : vector<8x4x16xbf16>, vector<8x4x16xbf16>, vector<4x8x8xf32> -> vector<4x8x8xf32>
    "tpu.trace_stop"() : () -> ()
    %cst_6 = arith.constant 2.500000e-01 : f32
    %20 = vector.broadcast %cst_6 : f32 to vector<4x8x8xf32>
    %21 = arith.mulf %19, %20 : vector<4x8x8xf32>
    %cst_7 = arith.constant dense<0xFF800000> : vector<4x8xf32>
    %22 = vector.multi_reduction <maximumf>, %21, %cst_7 [2] : vector<4x8x8xf32> to vector<4x8xf32>
    %23 = vector.shape_cast %22 : vector<4x8xf32> to vector<4x8x1xf32>
    %24 = vector.broadcast %23 : vector<4x8x1xf32> to vector<4x8x8xf32>
    %25 = arith.subf %21, %24 : vector<4x8x8xf32>
    %26 = math.exp %25 : vector<4x8x8xf32>
    %cst_8 = arith.constant dense<0.000000e+00> : vector<4x8xf32>
    %27 = vector.multi_reduction <add>, %26, %cst_8 [2] : vector<4x8x8xf32> to vector<4x8xf32>
    %28 = vector.shape_cast %27 : vector<4x8xf32> to vector<4x8x1xf32>
    %29 = tpu.reciprocal %28 : vector<4x8x1xf32> -> vector<4x8x1xf32>
    %30 = vector.broadcast %29 : vector<4x8x1xf32> to vector<4x8x8xf32>
    %31 = arith.mulf %26, %30 : vector<4x8x8xf32>
    %32 = arith.truncf %31 : vector<4x8x8xf32> to vector<4x8x8xbf16>
    "tpu.trace_start"() <{level = 10 : i32, message = "hqk,khd->qhd"}> : () -> ()
    %cst_9 = arith.constant dense<0.000000e+00> : vector<4x16x8xf32>
    %33 = tpu.matmul %18, %32, %cst_9 {dimension_numbers = #tpu.dot_dimension_numbers<[0], [2], [2], [1], [0, 1, 0, 2, 1, 1], [1], [0]>} : vector<8x4x16xbf16>, vector<4x8x8xbf16>, vector<4x16x8xf32> -> vector<4x16x8xf32>
    %34 = tpu.transpose %33, [2, 0, 1] : vector<4x16x8xf32> -> vector<8x4x16xf32>
    "tpu.trace_stop"() : () -> ()
    %35 = vector.shape_cast %34 : vector<8x4x16xf32> to vector<8x64xf32>
    %36 = vector.extract_strided_slice %7 {offsets = [8, 0], sizes = [8, 64], strides = [1, 1]} : vector<16x64xf32> to vector<8x64xf32>
    %37 = vector.shape_cast %36 : vector<8x64xf32> to vector<8x4x16xf32>
    %38 = arith.truncf %37 : vector<8x4x16xf32> to vector<8x4x16xbf16>
    %39 = vector.extract_strided_slice %8 {offsets = [8, 0], sizes = [8, 64], strides = [1, 1]} : vector<16x64xf32> to vector<8x64xf32>
    %40 = vector.shape_cast %39 : vector<8x64xf32> to vector<8x4x16xf32>
    %41 = arith.truncf %40 : vector<8x4x16xf32> to vector<8x4x16xbf16>
    %42 = vector.extract_strided_slice %9 {offsets = [8, 0], sizes = [8, 64], strides = [1, 1]} : vector<16x64xf32> to vector<8x64xf32>
    %43 = vector.shape_cast %42 : vector<8x64xf32> to vector<8x4x16xf32>
    %44 = arith.truncf %43 : vector<8x4x16xf32> to vector<8x4x16xbf16>
    "tpu.trace_start"() <{level = 10 : i32, message = "qhd,khd->hqk"}> : () -> ()
    %cst_10 = arith.constant dense<0.000000e+00> : vector<4x8x8xf32>
    %45 = tpu.matmul %38, %41, %cst_10 {dimension_numbers = #tpu.dot_dimension_numbers<[2], [2], [0], [0], [0, 1, 0, 0, 1, 0], [1], [1]>} : vector<8x4x16xbf16>, vector<8x4x16xbf16>, vector<4x8x8xf32> -> vector<4x8x8xf32>
    "tpu.trace_stop"() : () -> ()
    %cst_11 = arith.constant 2.500000e-01 : f32
    %46 = vector.broadcast %cst_11 : f32 to vector<4x8x8xf32>
    %47 = arith.mulf %45, %46 : vector<4x8x8xf32>
    %cst_12 = arith.constant dense<0xFF800000> : vector<4x8xf32>
    %48 = vector.multi_reduction <maximumf>, %47, %cst_12 [2] : vector<4x8x8xf32> to vector<4x8xf32>
    %49 = vector.shape_cast %48 : vector<4x8xf32> to vector<4x8x1xf32>
    %50 = vector.broadcast %49 : vector<4x8x1xf32> to vector<4x8x8xf32>
    %51 = arith.subf %47, %50 : vector<4x8x8xf32>
    %52 = math.exp %51 : vector<4x8x8xf32>
    %cst_13 = arith.constant dense<0.000000e+00> : vector<4x8xf32>
    %53 = vector.multi_reduction <add>, %52, %cst_13 [2] : vector<4x8x8xf32> to vector<4x8xf32>
    %54 = vector.shape_cast %53 : vector<4x8xf32> to vector<4x8x1xf32>
    %55 = tpu.reciprocal %54 : vector<4x8x1xf32> -> vector<4x8x1xf32>
    %56 = vector.broadcast %55 : vector<4x8x1xf32> to vector<4x8x8xf32>
    %57 = arith.mulf %52, %56 : vector<4x8x8xf32>
    %58 = arith.truncf %57 : vector<4x8x8xf32> to vector<4x8x8xbf16>
    "tpu.trace_start"() <{level = 10 : i32, message = "hqk,khd->qhd"}> : () -> ()
    %cst_14 = arith.constant dense<0.000000e+00> : vector<4x16x8xf32>
    %59 = tpu.matmul %44, %58, %cst_14 {dimension_numbers = #tpu.dot_dimension_numbers<[0], [2], [2], [1], [0, 1, 0, 2, 1, 1], [1], [0]>} : vector<8x4x16xbf16>, vector<4x8x8xbf16>, vector<4x16x8xf32> -> vector<4x16x8xf32>
    %60 = tpu.transpose %59, [2, 0, 1] : vector<4x16x8xf32> -> vector<8x4x16xf32>
    "tpu.trace_stop"() : () -> ()
    %61 = vector.shape_cast %60 : vector<8x4x16xf32> to vector<8x64xf32>
    %62 = tpu.concatenate %35, %61 in 0 : vector<8x64xf32>, vector<8x64xf32> -> vector<16x64xf32>
    %63 = arith.cmpf one, %62, %62 : vector<16x64xf32>
    %cst_15 = arith.constant 0.000000e+00 : f32
    %64 = vector.broadcast %cst_15 : f32 to vector<16x64xf32>
    %65 = arith.select %63, %64, %62 : vector<16x64xi1>, vector<16x64xf32>
    %66 = arith.truncf %65 : vector<16x64xf32> to vector<16x64xbf16>
    %c0_16 = arith.constant 0 : index
    %c0_17 = arith.constant 0 : index
    %67 = vector.load %arg4[%c0_16, %c0_17] : memref<64x32xbf16, #tpu.memory_space<vmem>>, vector<64x32xbf16>
    %cst_18 = arith.constant dense<0.000000e+00> : vector<16x32xf32>
    %68 = tpu.matmul %66, %67, %cst_18 {dimension_numbers = #tpu.dot_dimension_numbers<[1], [0], [0], [1], [0, 0, 1, 1], [], []>} : vector<16x64xbf16>, vector<64x32xbf16>, vector<16x32xf32> -> vector<16x32xf32>
    %c0_19 = arith.constant 0 : index
    %c0_20 = arith.constant 0 : index
    %69 = vector.load %arg5[%c0_19, %c0_20] : memref<1x32xf32, #tpu.memory_space<vmem>>, vector<1x32xf32>
    %70 = vector.broadcast %69 : vector<1x32xf32> to vector<16x32xf32>
    %71 = arith.addf %68, %70 : vector<16x32xf32>
    %72 = arith.addf %0, %71 : vector<16x32xf32>
    %cst_21 = arith.constant dense<0.000000e+00> : vector<16xf32>
    %73 = vector.multi_reduction <add>, %72, %cst_21 [1] : vector<16x32xf32> to vector<16xf32>
    %74 = vector.shape_cast %73 : vector<16xf32> to vector<16x1xf32>
    %cst_22 = arith.constant 3.200000e+01 : f32
    %75 = vector.broadcast %cst_22 : f32 to vector<16x1xf32>
    %76 = arith.divf %74, %75 : vector<16x1xf32>
    %77 = vector.broadcast %76 : vector<16x1xf32> to vector<16x32xf32>
    %78 = arith.subf %72, %77 : vector<16x32xf32>
    %79 = arith.mulf %78, %78 : vector<16x32xf32>
    %cst_23 = arith.constant dense<0.000000e+00> : vector<16xf32>
    %80 = vector.multi_reduction <add>, %79, %cst_23 [1] : vector<16x32xf32> to vector<16xf32>
    %81 = vector.shape_cast %80 : vector<16xf32> to vector<16x1xf32>
    %cst_24 = arith.constant 3.200000e+01 : f32
    %82 = vector.broadcast %cst_24 : f32 to vector<16x1xf32>
    %83 = arith.divf %81, %82 : vector<16x1xf32>
    %84 = vector.broadcast %76 : vector<16x1xf32> to vector<16x32xf32>
    %85 = arith.subf %72, %84 : vector<16x32xf32>
    %cst_25 = arith.constant 9.99999974E-6 : f32
    %86 = vector.broadcast %cst_25 : f32 to vector<16x1xf32>
    %87 = arith.addf %83, %86 : vector<16x1xf32>
    %88 = math.rsqrt %87 : vector<16x1xf32>
    %89 = vector.broadcast %88 : vector<16x1xf32> to vector<16x32xf32>
    %90 = arith.mulf %85, %89 : vector<16x32xf32>
    %c0_26 = arith.constant 0 : index
    %c0_27 = arith.constant 0 : index
    %91 = vector.load %arg6[%c0_26, %c0_27] : memref<1x32xf32, #tpu.memory_space<vmem>>, vector<1x32xf32>
    %92 = vector.broadcast %91 : vector<1x32xf32> to vector<16x32xf32>
    %93 = arith.mulf %90, %92 : vector<16x32xf32>
    %c0_28 = arith.constant 0 : index
    %c0_29 = arith.constant 0 : index
    %94 = vector.load %arg7[%c0_28, %c0_29] : memref<1x32xf32, #tpu.memory_space<vmem>>, vector<1x32xf32>
    %95 = vector.broadcast %94 : vector<1x32xf32> to vector<16x32xf32>
    %96 = arith.addf %93, %95 : vector<16x32xf32>
    %c0_30 = arith.constant 0 : index
    %c0_31 = arith.constant 0 : index
    %97 = vector.load %arg8[%c0_30, %c0_31] : memref<16x32xf32, #tpu.memory_space<vmem>>, vector<16x32xf32>
    tpu.vector_store %arg8[%c0_30, %c0_31], %72 {strides = array<i32>} : memref<16x32xf32, #tpu.memory_space<vmem>>, vector<16x32xf32>,
    %98 = arith.cmpf one, %96, %96 : vector<16x32xf32>
    %99 = arith.extui %98 : vector<16x32xi1> to vector<16x32xi32>
    %100 = arith.sitofp %99 : vector<16x32xi32> to vector<16x32xf32>
    %101 = vector.shape_cast %100 : vector<16x32xf32> to vector<1x16x32xf32>
    %cst_32 = arith.constant dense<0xFF800000> : vector<1xf32>
    %102 = vector.multi_reduction <maximumf>, %101, %cst_32 [1, 2] : vector<1x16x32xf32> to vector<1xf32>
    %103 = vector.shape_cast %102 : vector<1xf32> to vector<1x1x1xf32>
    %104 = vector.extract %103[0, 0, 0] : f32 from vector<1x1x1xf32>
    %105 = vector.broadcast %104 : f32 to vector<1x1xf32>
    %106 = arith.cmpf one, %72, %72 : vector<16x32xf32>
    %107 = arith.extui %106 : vector<16x32xi1> to vector<16x32xi32>
    %108 = arith.sitofp %107 : vector<16x32xi32> to vector<16x32xf32>
    %109 = vector.shape_cast %108 : vector<16x32xf32> to vector<1x16x32xf32>
    %cst_33 = arith.constant dense<0xFF800000> : vector<1xf32>
    %110 = vector.multi_reduction <maximumf>, %109, %cst_33 [1, 2] : vector<1x16x32xf32> to vector<1xf32>
    %111 = vector.shape_cast %110 : vector<1xf32> to vector<1x1x1xf32>
    %112 = vector.extract %111[0, 0, 0] : f32 from vector<1x1x1xf32>
    %113 = vector.broadcast %112 : f32 to vector<1x1xf32>
    %114 = tpu.iota {dimensions = array<i32: 1>} : vector<1x128xi32>
    %c0_i32 = arith.constant 0 : i32
    %115 = vector.broadcast %c0_i32 : i32 to vector<1x128xi32>
    %116 = arith.cmpi eq, %114, %115 : vector<1x128xi32>
    %c1_i32 = arith.constant 1 : i32
    %117 = vector.broadcast %c1_i32 : i32 to vector<1x128xi32>
    %118 = arith.cmpi eq, %114, %117 : vector<1x128xi32>
    %cst_34 = arith.constant 0.000000e+00 : f32
    %119 = vector.shape_cast %113 : vector<1x1xf32> to vector<1x1xf32>
    %120 = vector.broadcast %119 : vector<1x1xf32> to vector<1x128xf32>
    %121 = vector.broadcast %cst_34 : f32 to vector<1x128xf32>
    %122 = arith.select %118, %120, %121 : vector<1x128xi1>, vector<1x128xf32>
    %123 = vector.shape_cast %105 : vector<1x1xf32> to vector<1x1xf32>
    %124 = vector.broadcast %123 : vector<1x1xf32> to vector<1x128xf32>
    %125 = arith.select %116, %124, %122 : vector<1x128xi1>, vector<1x128xf32>
    %c0_35 = arith.constant 0 : index
    %c0_36 = arith.constant 0 : index
    %126 = vector.load %arg9[%c0_35, %c0_36] : memref<1x128xf32, #tpu.memory_space<vmem>>, vector<1x128xf32>
    tpu.vector_store %arg9[%c0_35, %c0_36], %125 {strides = array<i32>} : memref<1x128xf32, #tpu.memory_space<vmem>>, vector<1x128xf32>,
    return
  }
  func.func @transform_0(%arg0: i32) -> (i32, i32) {
    %c0_i32 = arith.constant 0 : i32
    %c0_i32_0 = arith.constant 0 : i32
    %c0_i32_1 = arith.constant 0 : i32
    return %c0_i32, %c0_i32_0 : i32, i32
  }
  func.func @transform_1(%arg0: i32) -> (i32, i32) {
    %c0_i32 = arith.constant 0 : i32
    %c0_i32_0 = arith.constant 0 : i32
    %c0_i32_1 = arith.constant 0 : i32
    return %c0_i32, %c0_i32_0 : i32, i32
  }
  func.func @transform_2(%arg0: i32) -> (i32, i32) {
    %c0_i32 = arith.constant 0 : i32
    %c0_i32_0 = arith.constant 0 : i32
    %c0_i32_1 = arith.constant 0 : i32
    return %c0_i32, %c0_i32_0 : i32, i32
  }
  func.func @transform_3(%arg0: i32) -> (i32, i32) {
    %c0_i32 = arith.constant 0 : i32
    %c0_i32_0 = arith.constant 0 : i32
    %c0_i32_1 = arith.constant 0 : i32
    return %c0_i32, %c0_i32_0 : i32, i32
  }
  func.func @transform_4(%arg0: i32) -> (i32, i32) {
    %c0_i32 = arith.constant 0 : i32
    %c0_i32_0 = arith.constant 0 : i32
    %c0_i32_1 = arith.constant 0 : i32
    return %c0_i32, %c0_i32_0 : i32, i32
  }
  func.func @transform_5(%arg0: i32) -> (i32, i32) {
    %c0_i32 = arith.constant 0 : i32
    %c0_i32_0 = arith.constant 0 : i32
    %c0_i32_1 = arith.constant 0 : i32
    return %c0_i32, %c0_i32_0 : i32, i32
  }
  func.func @transform_6(%arg0: i32) -> (i32, i32) {
    %c0_i32 = arith.constant 0 : i32
    %c0_i32_0 = arith.constant 0 : i32
    %c0_i32_1 = arith.constant 0 : i32
    return %c0_i32, %c0_i32_0 : i32, i32
  }
  func.func @transform_7(%arg0: i32) -> (i32, i32) {
    %c0_i32 = arith.constant 0 : i32
    %c0_i32_0 = arith.constant 0 : i32
    %c0_i32_1 = arith.constant 0 : i32
    return %c0_i32, %c0_i32_0 : i32, i32
  }
  func.func @transform_8(%arg0: i32) -> (i32, i32) {
    %c0_i32 = arith.constant 0 : i32
    %c0_i32_0 = arith.constant 0 : i32
    %c0_i32_1 = arith.constant 0 : i32
    return %c0_i32, %c0_i32_0 : i32, i32
  }
}

</mosaic_0001>

<bundles_post_ra>
// kernel: encoder_layer_forward.1
= control target key start
LH: loop header
LB: loop body
LE: loop exit
PB: predicated region body
PF: predicated region fallthrough
CT: control target
= control target key end

     0   :  { %v5253_v1 = vmov 0   ;;  %vm68_vm0 = vcmask 261120   ;;  %v38_v8 = vlaneseq  ;;  %v5254_v12 = vmov 0.0   ;;  %s5255_s18 = smov 80   ;;  %s5256_s19 = smov 112   ;;  %s6067_s1 = inlined_call_operand.vmem [shape: bf16[32,192], index: 1, kind: input, shape index: {}]   ;;  %s6068_s0 = inlined_call_operand.vmem [shape: f32[16,32], index: 0, kind: input, shape index: {}]   ;;  %s6069_s2 = inlined_call_operand.vmem [shape: f32[1,192], index: 2, kind: input, shape index: {}]   ;;  %s6070_s3 = inlined_call_operand.vmem [shape: bf16[64,32], index: 3, kind: input, shape index: {}]   ;;  %s6071_s4 = inlined_call_operand.vmem [shape: f32[1,32], index: 4, kind: input, shape index: {}]   ;;  %s6072_s5 = inlined_call_operand.vmem [shape: f32[1,32], index: 5, kind: input, shape index: {}]   ;;  %s6073_s6 = inlined_call_operand.vmem [shape: f32[1,32], index: 6, kind: input, shape index: {}]   ;;  %s6074_s7 = inlined_call_operand.vmem [shape: f32[16,32], index: 7, kind: output, shape index: {0}]   ;;  %s6075_s8 = inlined_call_operand.vmem [shape: f32[1,128], index: 8, kind: output, shape index: {1}]  }
   0x1   :  { %v5205_v0 = vld [vmem:[%s6067_s1 + $0x14] ss:$8 sps:$4 sm:$0xff]   ;;  %104 = vmatprep.mubr.bf16.mxu0 %v5253_v1  ;;  %v5207_v2 = vld [vmem:[%s6067_s1 + $0x10] ss:$8 sps:$4 sm:$0xff]   ;;  %v5208_v3 = vld [vmem:[%s6067_s1 + $0x4] ss:$8 sps:$4 sm:$0xff]   ;;  %5081 = vmatprep.subr.bf16.mxu1 %v5254_v12 }
   0x2   :  { %84 = vmatprep.subr.bf16.mxu0 %v5205_v0  ;;  %v5210_v4 = vld [vmem:[%s6067_s1] ss:$8 sps:$4 sm:$0xff]   ;;  %v5331_v9 = vshrl.u32 %v38_v8, 7  ;;  %s5258_s20 = smov 96   ;;  %v5259_v19 = vmov 1983009808  }
   0x3   :  { %85 = vmatpush1.bf16.msra.mxu0 %v5207_v2  ;;  %v29_v5 = vld [vmem:[%s6068_s0] sm:$0xff]  ;;  %v30_v6 = vld [vmem:[%s6068_s0 + $0x8] sm:$0xff]  ;;  %v128_v20 = vunpack.c.l.s4 %v5259_v19  ;;  %v5260_v22 = vmov 1934713408   ;;  %vm5261_vm1 = vmmov 0   ;;  %vm1105_vm2 = vcmask 130048  }
   0x4   :  { %86 = vmatprep.subr.bf16.mxu0 %v5208_v3  ;;  %v31_v7 = vpack.c.bf16 %v30_v6, %v29_v5  ;;  %v40_v10 = vsub.s32 0, %v5331_v9  ;;  %v5337_v11 = vld [vmem:[%s6069_s2] sm:$0x3]  ;;  %s5257_s2 = smov 64   ;;  %v160_v23 = vunpack.c.l.s4 %v5260_v22  ;;  %5083 = vmatprep.mubr.msk.bf16.mxu1 %vm5261_vm1, %v5254_v12  ;;  %vm1282_vm3 = vcmask 64512   ;;  %s5262_s21 = smov 32  }
   0x5   :  { %v129_v21 = vunpack.c.0.s8 %v128_v20  ;;  %s5263_s24 = smov 16   ;;  %s5264_s25 = smov 48   ;;  %vm2461_vm4 = vcmask 392192   ;;  %vm4852_vm7 = vcmask 523264  }
   0x6   :  { %v5342_v13 = vrot.slane %v5337_v11, %v40_v10  ;;  %v161_v27 = vunpack.c.0.s8 %v160_v23 }
   0x7   :  { %87 = vmatpush1.bf16.msra.mxu0 %v5210_v4  ;;  %v5368_v26 = vsub.s32 %v129_v21, %v5331_v9 }
   0x8   :  { %5105 = vmatprep.subr.bf16.mxu0 %v5254_v12  ;;  %v5375_v38 = vsub.s32 %v161_v27, %v5331_v9 }
   0xa   :  { %5003 = vmatmul.mubr.msk.bf16.vlgmr.msra.gmra.mxu0 %vm68_vm0, %v31_v7 }
   0xb   :  { %5107 = vmatprep.mubr.msk.bf16.mxu0 %vm5261_vm1, %v5254_v12 }
  0xca   :  { %v106_v14 = vpop.f32.mrf.mxu0 }
  0xcb   :  { %v5345_v15 = vadd.f32 %v106_v14, %v5342_v13 }
  0xcd   :  { %122 = vrot.lane.b32.xlu1 %v5345_v15, %s5255_s18  ;;  %116 = vrot.lane.b32.xlu0 %v5345_v15, %s5256_s19 }
  0xd1   :  { %201 = vrot.lane.b32.xlu1 %v5345_v15, %s5257_s2  ;;  %119 = vrot.lane.b32.xlu0 %v5345_v15, %s5258_s20 }
 0x13f   :  { %v5355_v16 = vpop.permute.xlu0 %116  ;;  %v5359_v17 = vpop.permute.xlu1 %122 }
 0x140   :  { %203 = vrot.lane.b32.xlu0 %v5355_v16, %s5257_s2 }
 0x143   :  { %v5361_v18 = vpop.permute.xlu0 %119  ;;  %v202_v24 = vpop.permute.xlu1 %201 }
 0x144   :  { %207 = vrot.lane.b32.xlu0 %v5359_v17, %s5257_s2  ;;  %205 = vrot.lane.b32.xlu1 %v5361_v18, %s5257_s2 }
 0x1b2   :  { %v204_v25 = vpop.permute.xlu0 %203 }
 0x1b6   :  { %v206_v28 = vpop.permute.xlu1 %205  ;;  %v208_v29 = vpop.permute.xlu0 %207 }
 0x1b7   :  { %v213_v30 = vcombine.low %v202_v24, %v206_v28  ;;  %v214_v31 = vcombine.high %v202_v24, %v206_v28  ;;  %v229_v32 = vcombine.low %v204_v25, %v208_v29  ;;  %v230_v33 = vcombine.high %v204_v25, %v208_v29 }
 0x1b9   :  { %v221_v34 = vrot.slane %v213_v30, %v5368_v26  ;;  %v228_v35 = vrot.slane %v214_v31, %v5368_v26  ;;  %v237_v36 = vrot.slane %v229_v32, %v5368_v26  ;;  %v244_v37 = vrot.slane %v230_v33, %v5368_v26 }
 0x1bb   :  { %v246_v39 = vcombine.high %v221_v34, %v237_v36  ;;  %v245_v40 = vcombine.low %v221_v34, %v237_v36  ;;  %v261_v41 = vcombine.low %v228_v35, %v244_v37  ;;  %v262_v44 = vcombine.high %v228_v35, %v244_v37 }
 0x1bd   :  { %v260_v42 = vrot.slane %v246_v39, %v5375_v38  ;;  %v253_v43 = vrot.slane %v245_v40, %v5375_v38  ;;  %v269_v47 = vrot.slane %v261_v41, %v5375_v38  ;;  %v276_v49 = vrot.slane %v262_v44, %v5375_v38 }
 0x1bf   :  { %v283_v45 = vpack.c.bf16 %v260_v42, %v260_v42  ;;  %v281_v46 = vpack.c.bf16 %v253_v43, %v253_v43  ;;  %v278_v48 = vcombine.high %v260_v42, %v5254_v12  ;;  %v285_v50 = vpack.c.bf16 %v269_v47, %v269_v47 }
 0x1c0   :  { %v279_v52 = vcombine.high %v269_v47, %v5254_v12  ;;  %v277_v53 = vcombine.high %v253_v43, %v5254_v12  ;;  %v280_v56 = vcombine.high %v276_v49, %v5254_v12  ;;  %v287_v58 = vpack.c.bf16 %v276_v49, %v276_v49 }
 0x1c1   :  { %469 = vxpose.xlu0.c.b16.start.end [1/1] (short) (narrow) %v283_v45, 16  ;;  %437 = vxpose.xlu1.c.b16.start.end [1/1] (short) (narrow) %v281_v46, 16  ;;  %v284_v51 = vpack.c.bf16 %v278_v48, %v278_v48 }
 0x1c2   :  { %v286_v54 = vpack.c.bf16 %v279_v52, %v279_v52  ;;  %v282_v55 = vpack.c.bf16 %v277_v53, %v277_v53  ;;  %v288_v57 = vpack.c.bf16 %v280_v56, %v280_v56 }
 0x1c5   :  { %501 = vxpose.xlu0.c.b16.start.end [1/1] (short) (narrow) %v285_v50, 16  ;;  %485 = vxpose.xlu1.c.b16.start.end [1/1] (short) (narrow) %v284_v51, 16 }
 0x1c9   :  { %517 = vxpose.xlu1.c.b16.start.end [1/1] (short) (narrow) %v286_v54, 16  ;;  %453 = vxpose.xlu0.c.b16.start.end [1/1] (short) (narrow) %v282_v55, 16 }
 0x1cd   :  { %549 = vxpose.xlu1.c.b16.start.end [1/1] (short) (narrow) %v288_v57, 16  ;;  %533 = vxpose.xlu0.c.b16.start.end [1/1] (short) (narrow) %v287_v58, 16 }
 0x223   :  { %v477_v59 = vpop.trf.xlu0  ;;  %v445_v60 = vpop.trf.xlu1 }
 0x224   :  { %v569_v63 = vshrl.u32 %v445_v60, 16  ;;  %v577_v20 = vshrl.u32 %v477_v59, 16 }
 0x227   :  { %v509_v61 = vpop.trf.xlu0  ;;  %v493_v62 = vpop.trf.xlu1 }
 0x228   :  { %v585_v0 = vshrl.u32 %v509_v61, 16  ;;  %v578_v10 = vshrl.u32 %v493_v62, 16  ;;  %v575_v21 = vpack.i.b16 %v493_v62, %v477_v59 }
 0x22a   :  { %v579_v29 = vpack.i.b16 %v578_v10, %v577_v20 }
 0x22b   :  { %v525_v2 = vpop.trf.xlu1  ;;  %v461_v3 = vpop.trf.xlu0 }
 0x22c   :  { %v583_v4 = vpack.i.b16 %v525_v2, %v509_v61  ;;  %v586_v5 = vshrl.u32 %v525_v2, 16  ;;  %v567_v6 = vpack.i.b16 %v461_v3, %v445_v60  ;;  %v570_v7 = vshrl.u32 %v461_v3, 16 }
 0x22e   :  { %v587_v14 = vpack.i.b16 %v586_v5, %v585_v0  ;;  %v571_v19 = vpack.i.b16 %v570_v7, %v569_v63  ;;  %v597_v24 = vcombine.low %v567_v6, %v583_v4  ;;  %v598_v37 = vcombine.high %v567_v6, %v583_v4  ;;  %v108_v6 = vpop.f32.mrf.mxu0 }
 0x22f   :  { %v557_v22 = vpop.trf.xlu1  ;;  %v541_v23 = vpop.trf.xlu0 }
 0x230   :  { %v594_v25 = vshrl.u32 %v557_v22, 16  ;;  %v591_v27 = vpack.i.b16 %v557_v22, %v541_v23  ;;  %v593_v28 = vshrl.u32 %v541_v23, 16  ;;  %v665_v32 = vcombine.low %v571_v19, %v587_v14 }
 0x231   :  { %v605_v34 = vrot.slane %v597_v24, %v5368_v26  ;;  %v666_v43 = vcombine.high %v571_v19, %v587_v14  ;;  %v612_v50 = vrot.slane %v598_v37, %v5368_v26  ;;  %v110_v14 = vpop.f32.mrf.mxu0  ;;  %v44_v19 = vsub.s32 1, %v5331_v9 }
 0x232   :  { %v595_v30 = vpack.i.b16 %v594_v25, %v593_v28  ;;  %v613_v31 = vcombine.low %v575_v21, %v591_v27  ;;  %v614_v33 = vcombine.high %v575_v21, %v591_v27  ;;  %v673_v40 = vrot.slane %v665_v32, %v5368_v26 }
 0x233   :  { %v680_v54 = vrot.slane %v666_v43, %v5368_v26  ;;  %v5415_v20 = vadd.f32 %v110_v14, %v5342_v13  ;;  %v5420_v21 = vrot.slane %v5337_v11, %v44_v19  ;;  %v125_v24 = vcombine.low %v5345_v15, %v5361_v18 }
 0x234   :  { %v621_v35 = vrot.slane %v613_v31, %v5368_v26  ;;  %v681_v36 = vcombine.low %v579_v29, %v595_v30  ;;  %v682_v42 = vcombine.high %v579_v29, %v595_v30  ;;  %v628_v47 = vrot.slane %v614_v33, %v5368_v26 }
 0x235   :  { %v5427_v22 = vadd.f32 %v108_v6, %v5420_v21  ;;  %v126_v25 = vcombine.high %v5345_v15, %v5361_v18  ;;  %v141_v28 = vcombine.low %v5355_v16, %v5359_v17  ;;  %v142_v29 = vcombine.high %v5355_v16, %v5359_v17 }
 0x236   :  { %v629_v39 = vcombine.low %v605_v34, %v621_v35  ;;  %v689_v41 = vrot.slane %v681_v36, %v5368_v26  ;;  %v630_v46 = vcombine.high %v605_v34, %v621_v35  ;;  %v696_v51 = vrot.slane %v682_v42, %v5368_v26 }
 0x237   :  { %v645_v53 = vcombine.low %v612_v50, %v628_v47  ;;  %v646_v58 = vcombine.high %v612_v50, %v628_v47  ;;  %v133_v31 = vrot.slane %v125_v24, %v5368_v26  ;;  %v140_v32 = vrot.slane %v126_v25, %v5368_v26 }
 0x238   :  { %v637_v44 = vrot.slane %v629_v39, %v5375_v38  ;;  %v697_v45 = vcombine.low %v673_v40, %v689_v41  ;;  %v698_v49 = vcombine.high %v673_v40, %v689_v41  ;;  %v644_v52 = vrot.slane %v630_v46, %v5375_v38 }
 0x239   :  { %v713_v56 = vcombine.low %v680_v54, %v696_v51  ;;  %v653_v57 = vrot.slane %v645_v53, %v5375_v38  ;;  %v714_v60 = vcombine.high %v680_v54, %v696_v51  ;;  %v660_v61 = vrot.slane %v646_v58, %v5375_v38 }
 0x23a   :  { %733 = vxpose.xlu0.c.b16.start.end [1/1] (short) (narrow) %v637_v44, 16  ;;  %v705_v48 = vrot.slane %v697_v45, %v5375_v38  ;;  %v712_v55 = vrot.slane %v698_v49, %v5375_v38  ;;  %v661_v63 = vcombine.high %v637_v44, %v5253_v1  ;;  %v662_v2 = vcombine.high %v644_v52, %v5253_v1 }
 0x23b   :  { %v721_v59 = vrot.slane %v713_v56, %v5375_v38  ;;  %v728_v62 = vrot.slane %v714_v60, %v5375_v38  ;;  %v663_v4 = vcombine.high %v653_v57, %v5253_v1  ;;  %v664_v7 = vcombine.high %v660_v61, %v5253_v1 }
 0x23c   :  { %749 = vxpose.xlu1.c.b16.start.end [1/1] (short) (narrow) %v705_v48, 16  ;;  %v729_v0 = vcombine.high %v705_v48, %v5253_v1  ;;  %v730_v3 = vcombine.high %v712_v55, %v5253_v1  ;;  %v149_v34 = vrot.slane %v141_v28, %v5368_v26  ;;  %v156_v35 = vrot.slane %v142_v29, %v5368_v26 }
 0x23d   :  { %v731_v5 = vcombine.high %v721_v59, %v5253_v1  ;;  %v732_v10 = vcombine.high %v728_v62, %v5253_v1 }
 0x23e   :  { %797 = vxpose.xlu0.c.b16.start.end [1/1] (short) (narrow) %v644_v52, 16  ;;  %v157_v37 = vcombine.low %v133_v31, %v149_v34  ;;  %v158_v15 = vcombine.high %v133_v31, %v149_v34  ;;  %v173_v18 = vcombine.low %v140_v32, %v156_v35  ;;  %v174_v39 = vcombine.high %v140_v32, %v156_v35 }
 0x240   :  { %813 = vxpose.xlu1.c.b16.start.end [1/1] (short) (narrow) %v712_v55, 16  ;;  %v165_v42 = vrot.slane %v157_v37, %v5375_v38  ;;  %v172_v16 = vrot.slane %v158_v15, %v5375_v38  ;;  %v181_v17 = vrot.slane %v173_v18, %v5375_v38  ;;  %v188_v43 = vrot.slane %v174_v39, %v5375_v38 }
 0x242   :  { %861 = vxpose.xlu0.c.b16.start.end [1/1] (short) (narrow) %v653_v57, 16  ;;  %v189_v46 = vcombine.high %v165_v42, %v5254_v12  ;;  %v190_v47 = vcombine.high %v172_v16, %v5254_v12  ;;  %v191_v48 = vcombine.high %v181_v17, %v5254_v12  ;;  %v192_v49 = vcombine.high %v188_v43, %v5254_v12 }
 0x244   :  { %877 = vxpose.xlu1.c.b16.start.end [1/1] (short) (narrow) %v721_v59, 16  ;;  %v5006_v58 = vpack.c.bf16 %v191_v48, %v189_v46  ;;  %v5007_v59 = vpack.c.bf16 %v192_v49, %v190_v47 }
 0x246   :  { %925 = vxpose.xlu0.c.b16.start.end [1/1] (short) (narrow) %v660_v61, 16  ;;  %v407_v19 = vrot.slane %v5006_v58, %v5368_v26 }
 0x248   :  { %941 = vxpose.xlu1.c.b16.start.end [1/1] (short) (narrow) %v728_v62, 16 }
 0x24a   :  { %765 = vxpose.xlu0.c.b16.start.end [1/1] (short) (narrow) %v661_v63, 16 }
 0x24c   :  { %781 = vxpose.xlu1.c.b16.start.end [1/1] (short) (narrow) %v729_v0, 16 }
 0x24e   :  { %829 = vxpose.xlu0.c.b16.start.end [1/1] (short) (narrow) %v662_v2, 16 }
 0x250   :  { %845 = vxpose.xlu1.c.b16.start.end [1/1] (short) (narrow) %v730_v3, 16 }
 0x252   :  { %893 = vxpose.xlu0.c.b16.start.end [1/1] (short) (narrow) %v663_v4, 16  ;;  %v5004_v4 = vpack.c.bf16 %v181_v17, %v165_v42 }
 0x254   :  { %909 = vxpose.xlu1.c.b16.start.end [1/1] (short) (narrow) %v731_v5, 16  ;;  %v5005_v5 = vpack.c.bf16 %v188_v43, %v172_v16  ;;  %v382_v25 = vrot.slane %v5004_v4, %v5368_v26 }
 0x256   :  { %957 = vxpose.xlu0.c.b16.start.end [1/1] (short) (narrow) %v664_v7, 16 }
 0x258   :  { %973 = vxpose.xlu1.c.b16.start.end [1/1] (short) (narrow) %v732_v10, 16 }
 0x25c   :  { %2467 = vrot.lane.b32.xlu1 %v5415_v20, %s5258_s20 }
 0x25f   :  { %2464 = vrot.lane.b32.xlu0 %v5415_v20, %s5256_s19 }
 0x260   :  { %2470 = vrot.lane.b32.xlu1 %v5415_v20, %s5255_s18 }
 0x263   :  { %293 = vrot.lane.b32.xlu0 %v5427_v22, %s5258_s20 }
 0x264   :  { %290 = vrot.lane.b32.xlu1 %v5427_v22, %s5256_s19 }
 0x268   :  { %296 = vrot.lane.b32.xlu1 %v5427_v22, %s5255_s18 }
 0x26c   :  { %2549 = vrot.lane.b32.xlu1 %v5415_v20, %s5257_s2 }
 0x29c   :  { %v741_v9 = vpop.trf.xlu0 }
 0x29e   :  { %v757_v11 = vpop.trf.xlu1 }
 0x2a0   :  { %v805_v13 = vpop.trf.xlu0 }
 0x2a1   :  { %v989_v50 = vcombine.low %v741_v9, %v805_v13  ;;  %v415_v9 = vrot.slane %v5007_v59, %v5368_v26 }
 0x2a2   :  { %v821_v23 = vpop.trf.xlu1 }
 0x2a3   :  { %v1039_v51 = vcombine.low %v757_v11, %v821_v23  ;;  %v996_v60 = vrot.slane %v989_v50, %v5368_v26 }
 0x2a4   :  { %v869_v27 = vpop.trf.xlu0 }
 0x2a5   :  { %v1046_v61 = vrot.slane %v1039_v51, %v5368_v26 }
 0x2a6   :  { %v885_v30 = vpop.trf.xlu1 }
 0x2a8   :  { %v933_v33 = vpop.trf.xlu0 }
 0x2a9   :  { %v1005_v53 = vcombine.low %v869_v27, %v933_v33  ;;  %v390_v27 = vrot.slane %v5005_v5, %v5368_v26 }
 0x2aa   :  { %v949_v36 = vpop.trf.xlu1 }
 0x2ab   :  { %v1055_v57 = vcombine.low %v885_v30, %v949_v36  ;;  %v1012_v63 = vrot.slane %v1005_v53, %v5368_v26  ;;  %v416_v30 = vcombine.low %v407_v19, %v415_v9  ;;  %v391_v34 = vcombine.low %v382_v25, %v390_v27 }
 0x2ac   :  { %v773_v40 = vpop.trf.xlu0 }
 0x2ad   :  { %v1062_v7 = vrot.slane %v1055_v57, %v5368_v26  ;;  %v423_v37 = vrot.slane %v416_v30, %v5375_v38  ;;  %v398_v39 = vrot.slane %v391_v34, %v5375_v38 }
 0x2ae   :  { %v789_v41 = vpop.trf.xlu1 }
 0x2af   :  { %v429_v16 = vshrl.u32 %v423_v37, 16  ;;  %v424_v50 = vcombine.high %v423_v37, %v5253_v1  ;;  %v399_v53 = vcombine.high %v398_v39, %v5253_v1 }
 0x2b0   :  { %v837_v44 = vpop.trf.xlu0 }
 0x2b1   :  { %v997_v54 = vcombine.low %v773_v40, %v837_v44  ;;  %v428_v44 = vshrl.u32 %v398_v39, 16  ;;  %v435_v58 = vshrl.u32 %v424_v50, 16 }
 0x2b2   :  { %v853_v45 = vpop.trf.xlu1 }
 0x2b3   :  { %v1047_v55 = vcombine.low %v789_v41, %v853_v45  ;;  %v1004_v0 = vrot.slane %v997_v54, %v5368_v26  ;;  %v427_v41 = vpack.i.b16 %v423_v37, %v398_v39  ;;  %v430_v46 = vpack.i.b16 %v429_v16, %v428_v44 }
 0x2b4   :  { %v901_v52 = vpop.trf.xlu0 }
 0x2b5   :  { %v1054_v2 = vrot.slane %v1047_v55, %v5368_v26  ;;  %v1021_v11 = vcombine.low %v996_v60, %v1004_v0  ;;  %v433_v55 = vpack.i.b16 %v424_v50, %v399_v53 }
 0x2b6   :  { %v917_v56 = vpop.trf.xlu1 }
 0x2b7   :  { %v1071_v13 = vcombine.low %v1046_v61, %v1054_v2  ;;  %v1028_v31 = vrot.slane %v1021_v11, %v5375_v38  ;;  %v434_v61 = vshrl.u32 %v399_v53, 16 }
 0x2b8   :  { %v965_v62 = vpop.trf.xlu0 }
 0x2b9   :  { %v1013_v3 = vcombine.low %v901_v52, %v965_v62  ;;  %v1078_v32 = vrot.slane %v1071_v13, %v5375_v38 }
 0x2ba   :  { %v981_v6 = vpop.trf.xlu1 }
 0x2bb   :  { %v1020_v10 = vrot.slane %v1013_v3, %v5368_v26  ;;  %v1063_v14 = vcombine.low %v917_v56, %v981_v6 }
 0x2bd   :  { %v1029_v23 = vcombine.low %v1012_v63, %v1020_v10  ;;  %v1070_v24 = vrot.slane %v1063_v14, %v5368_v26  ;;  %v436_v63 = vpack.i.b16 %v435_v58, %v434_v61 }
 0x2bf   :  { %v1079_v28 = vcombine.low %v1062_v7, %v1070_v24  ;;  %v1036_v29 = vrot.slane %v1029_v23, %v5375_v38 }
 0x2c1   :  { %v1086_v33 = vrot.slane %v1079_v28, %v5375_v38  ;;  %v1037_v35 = vcombine.low %v1028_v31, %v1036_v29  ;;  %v1038_v45 = vcombine.high %v1028_v31, %v1036_v29 }
 0x2c3   :  { %v1087_v36 = vcombine.low %v1078_v32, %v1086_v33  ;;  %v1093_v40 = vshrl.u32 %v1037_v35, 16  ;;  %v1088_v17 = vcombine.high %v1078_v32, %v1086_v33  ;;  %v1101_v54 = vshrl.u32 %v1038_v45, 16 }
 0x2c5   :  { %v1091_v15 = vpack.i.b16 %v1087_v36, %v1037_v35  ;;  %v1094_v18 = vshrl.u32 %v1087_v36, 16  ;;  %v1099_v48 = vpack.i.b16 %v1088_v17, %v1038_v45  ;;  %v1102_v51 = vshrl.u32 %v1088_v17, 16 }
 0x2c7   :  { %5082 = vmatpush3.bf16.msra.mxu1 %v1091_v15  ;;  %v1095_v42 = vpack.i.b16 %v1094_v18, %v1093_v40  ;;  %v1103_v56 = vpack.i.b16 %v1102_v51, %v1101_v54 }
 0x2c8   :  { %5087 = vmatprep.subr.bf16.mxu1 %v5254_v12 }
 0x2ca   :  { %5084 = vmatmul.mubr.msk.bf16.vlgmr.msra.gmra.mxu1 %vm1105_vm2, %v427_v41 }
 0x2cb   :  { %5088 = vmatpush3.bf16.msra.mxu1 %v1095_v42  ;;  %5089 = vmatprep.mubr.msk.bf16.mxu1 %vm5261_vm1, %v5254_v12 }
 0x2cc   :  { %5093 = vmatprep.subr.bf16.mxu1 %v5254_v12 }
 0x2ce   :  { %v5480_v43 = vpop.permute.xlu1 %2467 }
 0x2cf   :  { %2553 = vrot.lane.b32.xlu1 %v5480_v43, %s5257_s2 }
 0x2d1   :  { %v5484_v47 = vpop.permute.xlu0 %2464 }
 0x2d2   :  { %v5486_v49 = vpop.permute.xlu1 %2470  ;;  %5090 = vmatmul.mubr.msk.bf16.vlgmr.msra.gmra.mxu1 %vm1105_vm2, %v430_v46  ;;  %2551 = vrot.lane.b32.xlu0 %v5484_v47, %s5257_s2 }
 0x2d3   :  { %5094 = vmatpush3.bf16.msra.mxu1 %v1099_v48  ;;  %5095 = vmatprep.mubr.msk.bf16.mxu1 %vm5261_vm1, %v5254_v12 }
 0x2d4   :  { %5099 = vmatprep.subr.bf16.mxu1 %v5254_v12 }
 0x2d5   :  { %v294_v59 = vpop.permute.xlu0 %293 }
 0x2d6   :  { %v291_v52 = vpop.permute.xlu1 %290  ;;  %2555 = vrot.lane.b32.xlu0 %v5486_v49, %s5257_s2  ;;  %v299_v62 = vcombine.low %v5427_v22, %v294_v59  ;;  %v300_v4 = vcombine.high %v5427_v22, %v294_v59 }
 0x2d8   :  { %v307_v2 = vrot.slane %v299_v62, %v5368_v26  ;;  %v314_v10 = vrot.slane %v300_v4, %v5368_v26 }
 0x2da   :  { %5096 = vmatmul.mubr.msk.bf16.vlgmr.msra.gmra.mxu1 %vm1105_vm2, %v433_v55  ;;  %v297_v57 = vpop.permute.xlu1 %296 }
 0x2db   :  { %5100 = vmatpush3.bf16.msra.mxu1 %v1103_v56  ;;  %5101 = vmatprep.mubr.msk.bf16.mxu1 %vm5261_vm1, %v5254_v12  ;;  %v315_v60 = vcombine.low %v291_v52, %v297_v57  ;;  %v316_v3 = vcombine.high %v291_v52, %v297_v57 }
 0x2dc   :  { %5111 = vmatprep.subr.bf16.mxu1 %v5254_v12 }
 0x2dd   :  { %v323_v0 = vrot.slane %v315_v60, %v5368_v26  ;;  %v330_v6 = vrot.slane %v316_v3, %v5368_v26 }
 0x2de   :  { %v2550_v36 = vpop.permute.xlu1 %2549 }
 0x2df   :  { %v331_v5 = vcombine.low %v307_v2, %v323_v0  ;;  %v332_v7 = vcombine.high %v307_v2, %v323_v0  ;;  %v347_v9 = vcombine.low %v314_v10, %v330_v6  ;;  %v348_v25 = vcombine.high %v314_v10, %v330_v6 }
 0x2e1   :  { %v339_v14 = vrot.slane %v331_v5, %v5375_v38  ;;  %v346_v19 = vrot.slane %v332_v7, %v5375_v38  ;;  %v355_v24 = vrot.slane %v347_v9, %v5375_v38  ;;  %v362_v29 = vrot.slane %v348_v25, %v5375_v38 }
 0x2e2   :  { %5102 = vmatmul.mubr.msk.bf16.vlgmr.msra.gmra.mxu1 %vm1105_vm2, %v436_v63 }
 0x2e3   :  { %5113 = vmatprep.mubr.msk.bf16.mxu1 %vm5261_vm1, %v5254_v12  ;;  %v363_v11 = vcombine.high %v339_v14, %v5254_v12  ;;  %v367_v13 = vpack.c.bf16 %v339_v14, %v339_v14  ;;  %v364_v23 = vcombine.high %v346_v19, %v5254_v12  ;;  %v365_v28 = vcombine.high %v355_v24, %v5254_v12 }
 0x2e4   :  { %v369_v30 = vpack.c.bf16 %v346_v19, %v346_v19  ;;  %v366_v32 = vcombine.high %v362_v29, %v5254_v12  ;;  %v371_v33 = vpack.c.bf16 %v355_v24, %v355_v24  ;;  %v373_v35 = vpack.c.bf16 %v362_v29, %v362_v29 }
 0x2e5   :  { %v368_v22 = vpack.c.bf16 %v363_v11, %v363_v11  ;;  %v370_v27 = vpack.c.bf16 %v364_v23, %v364_v23  ;;  %v372_v31 = vpack.c.bf16 %v365_v28, %v365_v28 }
 0x2e6   :  { %v374_v34 = vpack.c.bf16 %v366_v32, %v366_v32 }
 0x2f2   :  { %1331 = vxpose.xlu1.c.b16.start.end [1/1] (short) (narrow) %v367_v13, 16 }
 0x2f4   :  { %1347 = vxpose.xlu0.c.b16.start.end [1/1] (short) (narrow) %v368_v22, 16 }
 0x2f6   :  { %1379 = vxpose.xlu1.c.b16.start.end [1/1] (short) (narrow) %v370_v27, 16 }
 0x2f8   :  { %1363 = vxpose.xlu0.c.b16.start.end [1/1] (short) (narrow) %v369_v30, 16 }
 0x2fa   :  { %1411 = vxpose.xlu1.c.b16.start.end [1/1] (short) (narrow) %v372_v31, 16 }
 0x2fc   :  { %1395 = vxpose.xlu0.c.b16.start.end [1/1] (short) (narrow) %v371_v33, 16 }
 0x2fe   :  { %1443 = vxpose.xlu1.c.b16.start.end [1/1] (short) (narrow) %v374_v34, 16 }
 0x300   :  { %1427 = vxpose.xlu0.c.b16.start.end [1/1] (short) (narrow) %v373_v35, 16 }
 0x341   :  { %v2554_v37 = vpop.permute.xlu1 %2553 }
 0x342   :  { %v2561_v18 = vcombine.low %v2550_v36, %v2554_v37  ;;  %v2562_v40 = vcombine.high %v2550_v36, %v2554_v37 }
 0x344   :  { %v2552_v15 = vpop.permute.xlu0 %2551  ;;  %v2569_v16 = vrot.slane %v2561_v18, %v5368_v26  ;;  %v2576_v45 = vrot.slane %v2562_v40, %v5368_v26 }
 0x348   :  { %v2556_v39 = vpop.permute.xlu0 %2555 }
 0x349   :  { %v2577_v41 = vcombine.low %v2552_v15, %v2556_v39  ;;  %v2578_v42 = vcombine.high %v2552_v15, %v2556_v39 }
 0x34b   :  { %v2585_v17 = vrot.slane %v2577_v41, %v5368_v26  ;;  %v2592_v44 = vrot.slane %v2578_v42, %v5368_v26 }
 0x34d   :  { %v2593_v46 = vcombine.low %v2569_v16, %v2585_v17  ;;  %v2594_v48 = vcombine.high %v2569_v16, %v2585_v17  ;;  %v2609_v52 = vcombine.low %v2576_v45, %v2592_v44  ;;  %v2610_v55 = vcombine.high %v2576_v45, %v2592_v44 }
 0x34f   :  { %v2601_v50 = vrot.slane %v2593_v46, %v5375_v38  ;;  %v2608_v51 = vrot.slane %v2594_v48, %v5375_v38  ;;  %v2617_v58 = vrot.slane %v2609_v52, %v5375_v38  ;;  %v2624_v61 = vrot.slane %v2610_v55, %v5375_v38 }
 0x351   :  { %v2629_v53 = vpack.c.bf16 %v2601_v50, %v2601_v50  ;;  %v2625_v54 = vcombine.high %v2601_v50, %v5254_v12  ;;  %v2626_v57 = vcombine.high %v2608_v51, %v5254_v12  ;;  %v2631_v60 = vpack.c.bf16 %v2608_v51, %v2608_v51 }
 0x352   :  { %v2627_v0 = vcombine.high %v2617_v58, %v5254_v12  ;;  %v2633_v3 = vpack.c.bf16 %v2617_v58, %v2617_v58  ;;  %v2628_v4 = vcombine.high %v2624_v61, %v5254_v12  ;;  %v2635_v19 = vpack.c.bf16 %v2624_v61, %v2624_v61 }
 0x353   :  { %2785 = vxpose.xlu0.c.b16.start.end [1/1] (short) (narrow) %v2629_v53, 16  ;;  %v2630_v56 = vpack.c.bf16 %v2625_v54, %v2625_v54  ;;  %v2632_v63 = vpack.c.bf16 %v2626_v57, %v2626_v57 }
 0x354   :  { %v1339_v59 = vpop.trf.xlu1  ;;  %v2634_v10 = vpack.c.bf16 %v2627_v0, %v2627_v0  ;;  %v2636_v13 = vpack.c.bf16 %v2628_v4, %v2628_v4 }
 0x355   :  { %2801 = vxpose.xlu1.c.b16.start.end [1/1] (short) (narrow) %v2630_v56, 16  ;;  %v1463_v5 = vshrl.u32 %v1339_v59, 16 }
 0x356   :  { %v1355_v62 = vpop.trf.xlu0 }
 0x357   :  { %2817 = vxpose.xlu0.c.b16.start.end [1/1] (short) (narrow) %v2631_v60, 16  ;;  %v1464_v6 = vshrl.u32 %v1355_v62, 16  ;;  %v1461_v9 = vpack.i.b16 %v1355_v62, %v1339_v59 }
 0x358   :  { %v1387_v2 = vpop.trf.xlu1 }
 0x359   :  { %2833 = vxpose.xlu1.c.b16.start.end [1/1] (short) (narrow) %v2632_v63, 16  ;;  %v1465_v23 = vpack.i.b16 %v1464_v6, %v1463_v5  ;;  %v1472_v25 = vshrl.u32 %v1387_v2, 16 }
 0x35a   :  { %v1371_v7 = vpop.trf.xlu0 }
 0x35b   :  { %2849 = vxpose.xlu0.c.b16.start.end [1/1] (short) (narrow) %v2633_v3, 16  ;;  %v1471_v22 = vshrl.u32 %v1371_v7, 16  ;;  %v1469_v30 = vpack.i.b16 %v1387_v2, %v1371_v7 }
 0x35c   :  { %v1419_v14 = vpop.trf.xlu1 }
 0x35d   :  { %2865 = vxpose.xlu1.c.b16.start.end [1/1] (short) (narrow) %v2634_v10, 16  ;;  %v1480_v11 = vshrl.u32 %v1419_v14, 16  ;;  %v1473_v35 = vpack.i.b16 %v1472_v25, %v1471_v22 }
 0x35e   :  { %v1403_v24 = vpop.trf.xlu0 }
 0x35f   :  { %2881 = vxpose.xlu0.c.b16.start.end [1/1] (short) (narrow) %v2635_v19, 16  ;;  %v1477_v27 = vpack.i.b16 %v1419_v14, %v1403_v24  ;;  %v1479_v28 = vshrl.u32 %v1403_v24, 16 }
 0x360   :  { %v1451_v29 = vpop.trf.xlu1 }
 0x361   :  { %2897 = vxpose.xlu1.c.b16.start.end [1/1] (short) (narrow) %v2636_v13, 16  ;;  %v1481_v31 = vpack.i.b16 %v1480_v11, %v1479_v28  ;;  %v1491_v32 = vcombine.low %v1461_v9, %v1477_v27  ;;  %v1488_v33 = vshrl.u32 %v1451_v29, 16  ;;  %v1492_v48 = vcombine.high %v1461_v9, %v1477_v27 }
 0x362   :  { %v1435_v34 = vpop.trf.xlu0 }
 0x363   :  { %v1485_v36 = vpack.i.b16 %v1451_v29, %v1435_v34  ;;  %v1487_v37 = vshrl.u32 %v1435_v34, 16  ;;  %v1559_v15 = vcombine.low %v1465_v23, %v1481_v31  ;;  %v1499_v40 = vrot.slane %v1491_v32, %v5368_v26 }
 0x364   :  { %v1560_v56 = vcombine.high %v1465_v23, %v1481_v31  ;;  %v1506_v59 = vrot.slane %v1492_v48, %v5368_v26 }
 0x365   :  { %v1489_v18 = vpack.i.b16 %v1488_v33, %v1487_v37  ;;  %v1507_v39 = vcombine.low %v1469_v30, %v1485_v36  ;;  %v1567_v42 = vrot.slane %v1559_v15, %v5368_v26  ;;  %v1508_v50 = vcombine.high %v1469_v30, %v1485_v36 }
 0x366   :  { %v1574_v62 = vrot.slane %v1560_v56, %v5368_v26 }
 0x367   :  { %v1515_v41 = vrot.slane %v1507_v39, %v5368_v26  ;;  %v1575_v16 = vcombine.low %v1473_v35, %v1489_v18  ;;  %v1576_v57 = vcombine.high %v1473_v35, %v1489_v18  ;;  %v1522_v60 = vrot.slane %v1508_v50, %v5368_v26 }
 0x369   :  { %v1523_v17 = vcombine.low %v1499_v40, %v1515_v41  ;;  %v1583_v44 = vrot.slane %v1575_v16, %v5368_v26  ;;  %v1524_v53 = vcombine.high %v1499_v40, %v1515_v41  ;;  %v1590_v63 = vrot.slane %v1576_v57, %v5368_v26 }
 0x36a   :  { %v1539_v2 = vcombine.low %v1506_v59, %v1522_v60  ;;  %v1540_v10 = vcombine.high %v1506_v59, %v1522_v60 }
 0x36b   :  { %v1531_v45 = vrot.slane %v1523_v17, %v5375_v38  ;;  %v1591_v46 = vcombine.low %v1567_v42, %v1583_v44  ;;  %v1592_v55 = vcombine.high %v1567_v42, %v1583_v44  ;;  %v1538_v58 = vrot.slane %v1524_v53, %v5375_v38 }
 0x36c   :  { %v1607_v4 = vcombine.low %v1574_v62, %v1590_v63  ;;  %v1547_v5 = vrot.slane %v1539_v2, %v5375_v38  ;;  %v1608_v19 = vcombine.high %v1574_v62, %v1590_v63  ;;  %v1554_v9 = vrot.slane %v1540_v10, %v5375_v38 }
 0x36d   :  { %1627 = vxpose.xlu0.c.b16.start.end [1/1] (short) (narrow) %v1531_v45, 16  ;;  %v1599_v51 = vrot.slane %v1591_v46, %v5375_v38  ;;  %v1555_v52 = vcombine.high %v1531_v45, %v5253_v1  ;;  %v1606_v61 = vrot.slane %v1592_v55, %v5375_v38  ;;  %v1556_v0 = vcombine.high %v1538_v58, %v5253_v1 }
 0x36e   :  { %v1615_v6 = vrot.slane %v1607_v4, %v5375_v38  ;;  %v1557_v7 = vcombine.high %v1547_v5, %v5253_v1  ;;  %v1622_v11 = vrot.slane %v1608_v19, %v5375_v38  ;;  %v1558_v13 = vcombine.high %v1554_v9, %v5253_v1 }
 0x36f   :  { %1643 = vxpose.xlu1.c.b16.start.end [1/1] (short) (narrow) %v1599_v51, 16  ;;  %v1623_v54 = vcombine.high %v1599_v51, %v5253_v1  ;;  %v1624_v3 = vcombine.high %v1606_v61, %v5253_v1 }
 0x370   :  { %v1625_v14 = vcombine.high %v1615_v6, %v5253_v1  ;;  %v1626_v23 = vcombine.high %v1622_v11, %v5253_v1 }
 0x371   :  { %1659 = vxpose.xlu0.c.b16.start.end [1/1] (short) (narrow) %v1555_v52, 16 }
 0x373   :  { %1675 = vxpose.xlu1.c.b16.start.end [1/1] (short) (narrow) %v1623_v54, 16 }
 0x375   :  { %1691 = vxpose.xlu0.c.b16.start.end [1/1] (short) (narrow) %v1538_v58, 16 }
 0x377   :  { %1707 = vxpose.xlu1.c.b16.start.end [1/1] (short) (narrow) %v1606_v61, 16 }
 0x379   :  { %1723 = vxpose.xlu0.c.b16.start.end [1/1] (short) (narrow) %v1556_v0, 16 }
 0x37b   :  { %1739 = vxpose.xlu1.c.b16.start.end [1/1] (short) (narrow) %v1624_v3, 16 }
 0x37d   :  { %1755 = vxpose.xlu0.c.b16.start.end [1/1] (short) (narrow) %v1547_v5, 16 }
 0x37f   :  { %1771 = vxpose.xlu1.c.b16.start.end [1/1] (short) (narrow) %v1615_v6, 16 }
 0x381   :  { %1787 = vxpose.xlu0.c.b16.start.end [1/1] (short) (narrow) %v1557_v7, 16 }
 0x383   :  { %1803 = vxpose.xlu1.c.b16.start.end [1/1] (short) (narrow) %v1625_v14, 16 }
 0x385   :  { %1819 = vxpose.xlu0.c.b16.start.end [1/1] (short) (narrow) %v1554_v9, 16 }
 0x387   :  { %1835 = vxpose.xlu1.c.b16.start.end [1/1] (short) (narrow) %v1622_v11, 16 }
 0x389   :  { %1851 = vxpose.xlu0.c.b16.start.end [1/1] (short) (narrow) %v1558_v13, 16 }
 0x38a   :  { %v5555_v24 = vpop.f32.mrf.mxu1 }
 0x38b   :  { %1867 = vxpose.xlu1.c.b16.start.end [1/1] (short) (narrow) %v1626_v23, 16 }
 0x38c   :  { %v5085_v25 = vpop.f32.mrf.mxu1 }
 0x38e   :  { %v1146_v22 = vpop.f32.mrf.mxu1 }
 0x390   :  { %v5086_v27 = vpop.f32.mrf.mxu1 }
 0x392   :  { %v5557_v28 = vpop.f32.mrf.mxu1 }
 0x394   :  { %v5091_v29 = vpop.f32.mrf.mxu1 }
 0x396   :  { %v1189_v30 = vpop.f32.mrf.mxu1 }
 0x398   :  { %v5092_v31 = vpop.f32.mrf.mxu1 }
 0x39a   :  { %v5559_v32 = vpop.f32.mrf.mxu1 }
 0x39c   :  { %v5097_v33 = vpop.f32.mrf.mxu1 }
 0x39e   :  { %v1232_v34 = vpop.f32.mrf.mxu1 }
 0x3a0   :  { %v5098_v35 = vpop.f32.mrf.mxu1 }
 0x3a2   :  { %v5561_v36 = vpop.f32.mrf.mxu1 }
 0x3a4   :  { %v5103_v37 = vpop.f32.mrf.mxu1 }
 0x3a6   :  { %v1275_v15 = vpop.f32.mrf.mxu1 }
 0x3a8   :  { %v5104_v18 = vpop.f32.mrf.mxu1 }
 0x3b5   :  { %v2793_v39 = vpop.trf.xlu0 }
 0x3b6   :  { %v2917_v44 = vshrl.u32 %v2793_v39, 16 }
 0x3b7   :  { %v2809_v40 = vpop.trf.xlu1 }
 0x3b8   :  { %v2918_v17 = vshrl.u32 %v2809_v40, 16  ;;  %v2915_v48 = vpack.i.b16 %v2809_v40, %v2793_v39 }
 0x3b9   :  { %v2825_v41 = vpop.trf.xlu0 }
 0x3ba   :  { %v2925_v53 = vshrl.u32 %v2825_v41, 16  ;;  %v2919_v55 = vpack.i.b16 %v2918_v17, %v2917_v44 }
 0x3bb   :  { %v2841_v42 = vpop.trf.xlu1 }
 0x3bc   :  { %v2926_v52 = vshrl.u32 %v2841_v42, 16  ;;  %v2923_v61 = vpack.i.b16 %v2841_v42, %v2825_v41 }
 0x3bd   :  { %v2857_v16 = vpop.trf.xlu0 }
 0x3be   :  { %v2933_v45 = vshrl.u32 %v2857_v16, 16  ;;  %v2927_v2 = vpack.i.b16 %v2926_v52, %v2925_v53 }
 0x3bf   :  { %v2873_v46 = vpop.trf.xlu1 }
 0x3c0   :  { %v2934_v50 = vshrl.u32 %v2873_v46, 16  ;;  %v2931_v51 = vpack.i.b16 %v2873_v46, %v2857_v16 }
 0x3c1   :  { %v2889_v54 = vpop.trf.xlu0 }
 0x3c2   :  { %v2935_v56 = vpack.i.b16 %v2934_v50, %v2933_v45  ;;  %v2946_v57 = vcombine.high %v2915_v48, %v2931_v51  ;;  %v2941_v58 = vshrl.u32 %v2889_v54, 16  ;;  %v2945_v59 = vcombine.low %v2915_v48, %v2931_v51 }
 0x3c3   :  { %v2905_v60 = vpop.trf.xlu1 }
 0x3c4   :  { %v3014_v62 = vcombine.high %v2919_v55, %v2935_v56  ;;  %v2942_v63 = vshrl.u32 %v2905_v60, 16  ;;  %v2939_v0 = vpack.i.b16 %v2905_v60, %v2889_v54  ;;  %v3013_v6 = vcombine.low %v2919_v55, %v2935_v56 }
 0x3c5   :  { %v5564_v7 = vrot.slane %v2946_v57, %v5368_v26  ;;  %v2953_v10 = vrot.slane %v2945_v59, %v5368_v26  ;;  %v5601_v56 = vmul.f32 0.25, %v5555_v24 }
 0x3c6   :  { %v2943_v3 = vpack.i.b16 %v2942_v63, %v2941_v58  ;;  %v2961_v4 = vcombine.low %v2923_v61, %v2939_v0  ;;  %v2962_v5 = vcombine.high %v2923_v61, %v2939_v0  ;;  %v3021_v23 = vrot.slane %v3013_v6, %v5368_v26 }
 0x3c7   :  { %v5576_v27 = vrot.slane %v3014_v62, %v5368_v26  ;;  %v5606_v61 = vmul.f32 0.25, %v5557_v28  ;;  %v1283_v24 = vsel %vm1282_vm3, %v5601_v56, -inf  ;;  %v5617_v28 = vmul.f32 0.25, %v5561_v36 }
 0x3c8   :  { %v5568_v14 = vrot.slane %v2962_v5, %v5368_v26  ;;  %v3030_v19 = vcombine.high %v2927_v2, %v2943_v3  ;;  %v2969_v9 = vrot.slane %v2961_v4, %v5368_v26  ;;  %v3029_v11 = vcombine.low %v2927_v2, %v2943_v3 }
 0x3c9   :  { %v5610_v2 = vmul.f32 0.25, %v5559_v32  ;;  %v1286_v5 = vsel %vm1282_vm3, %v5606_v61, -inf }
 0x3ca   :  { %v2977_v13 = vcombine.low %v2953_v10, %v2969_v9  ;;  %v3037_v25 = vrot.slane %v3029_v11, %v5368_v26  ;;  %v2993_v22 = vcombine.low %v5564_v7, %v5568_v14  ;;  %v5579_v29 = vrot.slane %v3030_v19, %v5368_v26 }
 0x3cb   :  { %v2994_v30 = vcombine.high %v5564_v7, %v5568_v14  ;;  %v2978_v34 = vcombine.high %v2953_v10, %v2969_v9  ;;  %v1289_v10 = vsel %vm1282_vm3, %v5610_v2, -inf  ;;  %v1292_v11 = vsel %vm1282_vm3, %v5617_v28, -inf }
 0x3cc   :  { %v2985_v31 = vrot.slane %v2977_v13, %v5375_v38  ;;  %v3045_v33 = vcombine.low %v3021_v23, %v3037_v25  ;;  %v3061_v35 = vcombine.low %v5576_v27, %v5579_v29  ;;  %v3062_v37 = vcombine.high %v5576_v27, %v5579_v29 }
 0x3cd   :  { %v3046_v18 = vcombine.high %v3021_v23, %v3037_v25  ;;  %v5590_v40 = vrot.slane %v2978_v34, %v5375_v38 }
 0x3ce   :  { %3081 = vxpose.xlu0.c.b16.start.end [1/1] (short) (narrow) %v2985_v31, 16  ;;  %v3053_v15 = vrot.slane %v3045_v33, %v5375_v38  ;;  %v3009_v17 = vcombine.high %v2985_v31, %v5253_v1 }
 0x3cf   :  { %v1635_v39 = vpop.trf.xlu0  ;;  %v5594_v42 = vrot.slane %v3046_v18, %v5375_v38 }
 0x3d0   :  { %3097 = vxpose.xlu1.c.b16.start.end [1/1] (short) (narrow) %v3053_v15, 16  ;;  %v3077_v45 = vcombine.high %v3053_v15, %v5253_v1 }
 0x3d1   :  { %v1651_v41 = vpop.trf.xlu1 }
 0x3d2   :  { %3145 = vxpose.xlu0.c.b16.start.end [1/1] (short) (narrow) %v5590_v40, 16 }
 0x3d3   :  { %v1667_v16 = vpop.trf.xlu0 }
 0x3d4   :  { %3161 = vxpose.xlu1.c.b16.start.end [1/1] (short) (narrow) %v5594_v42, 16 }
 0x3d5   :  { %v1683_v44 = vpop.trf.xlu1 }
 0x3d6   :  { %3113 = vxpose.xlu0.c.b16.start.end [1/1] (short) (narrow) %v3009_v17, 16 }
 0x3d7   :  { %v1699_v46 = vpop.trf.xlu0 }
 0x3d8   :  { %3129 = vxpose.xlu1.c.b16.start.end [1/1] (short) (narrow) %v3077_v45, 16  ;;  %v1883_v48 = vcombine.low %v1635_v39, %v1699_v46 }
 0x3d9   :  { %v1715_v50 = vpop.trf.xlu1 }
 0x3da   :  { %v1933_v51 = vcombine.low %v1651_v41, %v1715_v50  ;;  %v1890_v53 = vrot.slane %v1883_v48, %v5368_v26 }
 0x3db   :  { %v1731_v52 = vpop.trf.xlu0 }
 0x3dc   :  { %v1891_v54 = vcombine.low %v1667_v16, %v1731_v52  ;;  %v1940_v57 = vrot.slane %v1933_v51, %v5368_v26 }
 0x3dd   :  { %v1747_v55 = vpop.trf.xlu1 }
 0x3de   :  { %v1941_v58 = vcombine.low %v1683_v44, %v1747_v55  ;;  %v1898_v59 = vrot.slane %v1891_v54, %v5368_v26 }
 0x3df   :  { %v1763_v60 = vpop.trf.xlu0 }
 0x3e0   :  { %v1948_v62 = vrot.slane %v1941_v58, %v5368_v26  ;;  %v1915_v63 = vcombine.low %v1890_v53, %v1898_v59 }
 0x3e1   :  { %v1779_v0 = vpop.trf.xlu1 }
 0x3e2   :  { %v1965_v3 = vcombine.low %v1940_v57, %v1948_v62  ;;  %v1922_v18 = vrot.slane %v1915_v63, %v5375_v38  ;;  %v3078_v62 = vcombine.high %v5594_v42, %v5253_v1  ;;  %v3010_v63 = vcombine.high %v5590_v40, %v5253_v1 }
 0x3e3   :  { %1284 = vmax.xlane.f32.xlu0 %v1283_v24  ;;  %v1795_v4 = vpop.trf.xlu0 }
 0x3e4   :  { %v1972_v16 = vrot.slane %v1965_v3, %v5375_v38 }
 0x3e5   :  { %1287 = vmax.xlane.f32.xlu1 %v1286_v5  ;;  %v1811_v6 = vpop.trf.xlu1 }
 0x3e7   :  { %1290 = vmax.xlane.f32.xlu0 %v1289_v10  ;;  %v1827_v32 = vpop.trf.xlu0 }
 0x3e8   :  { %v1899_v19 = vcombine.low %v1763_v60, %v1827_v32 }
 0x3e9   :  { %v1843_v9 = vpop.trf.xlu1 }
 0x3ea   :  { %v1949_v13 = vcombine.low %v1779_v0, %v1843_v9  ;;  %v1906_v25 = vrot.slane %v1899_v19, %v5368_v26 }
 0x3eb   :  { %1293 = vmax.xlane.f32.xlu0 %v1292_v11  ;;  %v1859_v23 = vpop.trf.xlu0 }
 0x3ec   :  { %v1907_v31 = vcombine.low %v1795_v4, %v1859_v23  ;;  %v1956_v36 = vrot.slane %v1949_v13, %v5368_v26 }
 0x3ed   :  { %v1875_v33 = vpop.trf.xlu1 }
 0x3ee   :  { %v1957_v34 = vcombine.low %v1811_v6, %v1875_v33  ;;  %v1914_v15 = vrot.slane %v1907_v31, %v5368_v26 }
 0x3f0   :  { %v1964_v39 = vrot.slane %v1957_v34, %v5368_v26  ;;  %v1923_v41 = vcombine.low %v1906_v25, %v1914_v15 }
 0x3f2   :  { %v1973_v17 = vcombine.low %v1956_v36, %v1964_v39  ;;  %v1930_v44 = vrot.slane %v1923_v41, %v5375_v38 }
 0x3f4   :  { %v1980_v45 = vrot.slane %v1973_v17, %v5375_v38  ;;  %v5631_v46 = vcombine.low %v1922_v18, %v1930_v44  ;;  %v5633_v48 = vcombine.high %v1922_v18, %v1930_v44 }
 0x3f6   :  { %v5635_v50 = vcombine.low %v1972_v16, %v1980_v45  ;;  %v5637_v51 = vcombine.high %v1972_v16, %v1980_v45  ;;  %v1986_v52 = vshrl.u32 %v5631_v46, 16  ;;  %v1992_v53 = vshrl.u32 %v5633_v48, 16 }
 0x3f8   :  { %v1987_v54 = vshrl.u32 %v5635_v50, 16  ;;  %v1993_v55 = vshrl.u32 %v5637_v51, 16  ;;  %v1985_v57 = vpack.i.b16 %v5635_v50, %v5631_v46  ;;  %v1991_v58 = vpack.i.b16 %v5637_v51, %v5633_v48 }
 0x3f9   :  { %v2473_v46 = vcombine.low %v5415_v20, %v5480_v43  ;;  %v2474_v50 = vcombine.high %v5415_v20, %v5480_v43 }
 0x3fa   :  { %v5647_v59 = vpack.i.b16 %v1987_v54, %v1986_v52  ;;  %v5649_v60 = vpack.i.b16 %v1993_v55, %v1992_v53 }
 0x412   :  { %3193 = vxpose.xlu1.c.b16.start.end [1/1] (short) (narrow) %v3078_v62, 16  ;;  %v3001_v62 = vrot.slane %v2993_v22, %v5375_v38 }
 0x414   :  { %v3011_v22 = vcombine.high %v3001_v62, %v5253_v1 }
 0x418   :  { %3177 = vxpose.xlu0.c.b16.start.end [1/1] (short) (narrow) %v3010_v63, 16  ;;  %v3069_v63 = vrot.slane %v3061_v35, %v5375_v38  ;;  %v3008_v35 = vrot.slane %v2994_v30, %v5375_v38 }
 0x430   :  { %v3089_v0 = vpop.trf.xlu0 }
 0x432   :  { %v3105_v24 = vpop.trf.xlu1 }
 0x434   :  { %v3153_v3 = vpop.trf.xlu0 }
 0x435   :  { %v3337_v4 = vcombine.low %v3089_v0, %v3153_v3  ;;  %v3079_v3 = vcombine.high %v3069_v63, %v5253_v1 }
 0x436   :  { %v3169_v5 = vpop.trf.xlu1 }
 0x437   :  { %v3387_v6 = vcombine.low %v3105_v24, %v3169_v5  ;;  %v3012_v5 = vcombine.high %v3008_v35, %v5253_v1 }
 0x438   :  { %v3121_v10 = vpop.trf.xlu0 }
 0x439   :  { %v5658_v36 = vrot.slane %v3387_v6, %v5368_v26 }
 0x43a   :  { %v3137_v32 = vpop.trf.xlu1 }
 0x46c   :  { %v1285_v19 = vpop.xlane.xlu0 %1284 }
 0x46d   :  { %v1295_v9 = vsub.f32 %v5601_v56, %v1285_v19 }
 0x46e   :  { %v1288_v11 = vpop.xlane.xlu1 %1287 }
 0x46f   :  { %v1299_v13 = vmul.f32 1.442695, %v1295_v9  ;;  %v1296_v42 = vsub.f32 %v5606_v61, %v1288_v11  ;;  %v5666_v61 = vrot.slane %v3337_v4, %v5368_v26  ;;  %v3076_v4 = vrot.slane %v3062_v37, %v5375_v38 }
 0x470   :  { %v1291_v23 = vpop.xlane.xlu0 %1290 }
 0x471   :  { %5215 = vpow2.f32 %v1299_v13  ;;  %v1301_v25 = vmul.f32 1.442695, %v1296_v42  ;;  %v1297_v52 = vsub.f32 %v5610_v2, %v1291_v23  ;;  %v3080_v6 = vcombine.high %v3076_v4, %v5253_v1 }
 0x472   :  { %v2489_v13 = vcombine.low %v5484_v47, %v5486_v49  ;;  %v2490_v42 = vcombine.high %v5484_v47, %v5486_v49 }
 0x473   :  { %5217 = vpow2.f32 %v1301_v25  ;;  %v1303_v54 = vmul.f32 1.442695, %v1297_v52 }
 0x474   :  { %v3201_v40 = vpop.trf.xlu1  ;;  %v1294_v33 = vpop.xlane.xlu0 %1293  ;;  %v2497_v25 = vrot.slane %v2489_v13, %v5368_v26 }
 0x475   :  { %v3395_v31 = vcombine.low %v3137_v32, %v3201_v40  ;;  %v1298_v53 = vsub.f32 %v5617_v28, %v1294_v33  ;;  %5219 = vpow2.f32 %v1303_v54  ;;  %v2481_v40 = vrot.slane %v2473_v46, %v5368_v26 }
 0x477   :  { %v5661_v34 = vrot.slane %v3395_v31, %v5368_v26  ;;  %v1305_v55 = vmul.f32 1.442695, %v1298_v53  ;;  %v2488_v31 = vrot.slane %v2474_v50, %v5368_v26  ;;  %v2506_v47 = vcombine.high %v2481_v40, %v2497_v25 }
 0x479   :  { %v3419_v56 = vcombine.low %v5658_v36, %v5661_v34  ;;  %5221 = vpow2.f32 %v1305_v55  ;;  %v2520_v20 = vrot.slane %v2506_v47, %v5375_v38 }
 0x47a   :  { %v3185_v15 = vpop.trf.xlu0 }
 0x47b   :  { %v3345_v18 = vcombine.low %v3121_v10, %v3185_v15  ;;  %v112_v10 = vpop.f32.mrf.mxu0  ;;  %v2505_v15 = vcombine.low %v2481_v40, %v2497_v25  ;;  %v2538_v54 = vcombine.high %v2520_v20, %v5254_v12 }
 0x47c   :  { %v5706_v32 = vadd.f32 %v112_v10, %v5420_v21 }
 0x47d   :  { %v5669_v39 = vrot.slane %v3345_v18, %v5368_v26 }
 0x47e   :  { %v5216_v41 = vpop.eup %5215 }
 0x47f   :  { %v3369_v16 = vcombine.low %v5666_v61, %v5669_v39  ;;  %v1307_v17 = vsel %vm1282_vm3, %v5216_v41, 0.0 }
 0x480   :  { %v5218_v44 = vpop.eup %5217  ;;  %1308 = vadd.xlane.f32.xlu0 %v1307_v17  ;;  %v2513_v17 = vrot.slane %v2505_v15, %v5375_v38  ;;  %v3426_v15 = vrot.slane %v3419_v56, %v5375_v38 }
 0x481   :  { %v1310_v45 = vsel %vm1282_vm3, %v5218_v44, 0.0 }
 0x482   :  { %1311 = vadd.xlane.f32.xlu1 %v1310_v45  ;;  %v5685_v0 = vpop.eup %5219  ;;  %v2537_v53 = vcombine.high %v2513_v17, %v5254_v12 }
 0x483   :  { %v1313_v28 = vsel %vm1282_vm3, %v5685_v0, 0.0 }
 0x486   :  { %v5687_v2 = vpop.eup %5221 }
 0x487   :  { %v1316_v24 = vsel %vm1282_vm3, %v5687_v2, 0.0 }
 0x4ad   :  { %3209 = vxpose.xlu0.c.b16.start.end [1/1] (short) (narrow) %v3001_v62, 16 }
 0x4af   :  { %3225 = vxpose.xlu1.c.b16.start.end [1/1] (short) (narrow) %v3069_v63, 16 }
 0x4ba   :  { %1314 = vadd.xlane.f32.xlu0 %v1313_v28 }
 0x4bc   :  { %1317 = vadd.xlane.f32.xlu1 %v1316_v24 }
 0x4e7   :  { %3241 = vxpose.xlu0.c.b16.start.end [1/1] (short) (narrow) %v3011_v22, 16 }
 0x4e9   :  { %3257 = vxpose.xlu1.c.b16.start.end [1/1] (short) (narrow) %v3079_v3, 16 }
 0x4eb   :  { %3273 = vxpose.xlu0.c.b16.start.end [1/1] (short) (narrow) %v3008_v35, 16 }
 0x4ed   :  { %3289 = vxpose.xlu1.c.b16.start.end [1/1] (short) (narrow) %v3076_v4, 16 }
 0x4ef   :  { %3305 = vxpose.xlu0.c.b16.start.end [1/1] (short) (narrow) %v3012_v5, 16 }
 0x4f1   :  { %3321 = vxpose.xlu1.c.b16.start.end [1/1] (short) (narrow) %v3080_v6, 16 }
 0x4f5   :  { %2641 = vrot.lane.b32.xlu1 %v5706_v32, %s5258_s20 }
 0x4f8   :  { %2638 = vrot.lane.b32.xlu0 %v5706_v32, %s5256_s19 }
 0x4f9   :  { %2644 = vrot.lane.b32.xlu1 %v5706_v32, %s5255_s18 }
 0x509   :  { %v1309_v7 = vpop.xlane.xlu0 %1308 }
 0x50a   :  { %5223 = vrcp.f32 %v1309_v7 }
 0x50b   :  { %v1312_v14 = vpop.xlane.xlu1 %1311 }
 0x50c   :  { %5225 = vrcp.f32 %v1312_v14 }
 0x50f   :  { %v3217_v23 = vpop.trf.xlu0 }
 0x517   :  { %v5224_v27 = vpop.eup %5223 }
 0x518   :  { %v1323_v29 = vmul.f32 %v5224_v27, %v5216_v41 }
 0x519   :  { %v5226_v30 = vpop.eup %5225 }
 0x51a   :  { %v1327_v37 = vpack.c.bf16 %v1323_v29, %v1323_v29  ;;  %v1324_v19 = vmul.f32 %v5226_v30, %v5218_v44 }
 0x51c   :  { %v1999_v21 = vsel %vm1282_vm3, %v1327_v37, 0  ;;  %v1328_v9 = vpack.c.bf16 %v1324_v19, %v1324_v19 }
 0x51d   :  { %5106 = vmatpush3.bf16.xpose.msra.mxu0 %v1999_v21 }
 0x51e   :  { %v2046_v11 = vsel %vm1282_vm3, %v1328_v9, 0  ;;  %5117 = vmatprep.subr.bf16.mxu0 %v5254_v12 }
 0x51f   :  { %5112 = vmatpush3.bf16.xpose.msra.mxu1 %v2046_v11 }
 0x520   :  { %5123 = vmatprep.subr.bf16.mxu1 %v5254_v12 }
 0x524   :  { %5108 = vmatmul.mubr.msk.bf16.vlgmr.msra.gmra.mxu0 %vm1282_vm3, %v1985_v57  ;;  %v3233_v57 = vpop.trf.xlu1 }
 0x525   :  { %5119 = vmatprep.mubr.msk.bf16.mxu0 %vm5261_vm1, %v5254_v12 }
 0x526   :  { %5114 = vmatmul.mubr.msk.bf16.vlgmr.msra.gmra.mxu1 %vm1282_vm3, %v5647_v59  ;;  %v2504_v59 = vrot.slane %v2490_v42, %v5368_v26 }
 0x527   :  { %5125 = vmatprep.mubr.msk.bf16.mxu1 %vm5261_vm1, %v5254_v12 }
 0x528   :  { %v2521_v49 = vcombine.low %v2488_v31, %v2504_v59  ;;  %v2522_v18 = vcombine.high %v2488_v31, %v2504_v59 }
 0x52a   :  { %v2529_v43 = vrot.slane %v2521_v49, %v5375_v38  ;;  %v2536_v44 = vrot.slane %v2522_v18, %v5375_v38 }
 0x52c   :  { %v2539_v55 = vcombine.high %v2529_v43, %v5254_v12  ;;  %v2540_v62 = vcombine.high %v2536_v44, %v5254_v12  ;;  %v5018_v14 = vpack.c.bf16 %v2529_v43, %v2513_v17  ;;  %v5019_v27 = vpack.c.bf16 %v2536_v44, %v2520_v20 }
 0x52e   :  { %v5020_v3 = vpack.c.bf16 %v2539_v55, %v2537_v53  ;;  %v5021_v35 = vpack.c.bf16 %v2540_v62, %v2538_v54  ;;  %v2738_v25 = vrot.slane %v5019_v27, %v5368_v26 }
 0x530   :  { %v2755_v11 = vrot.slane %v5020_v3, %v5368_v26  ;;  %v2763_v13 = vrot.slane %v5021_v35, %v5368_v26 }
 0x543   :  { %v1315_v33 = vpop.xlane.xlu0 %1314 }
 0x544   :  { %5227 = vrcp.f32 %v1315_v33  ;;  %v2764_v33 = vcombine.low %v2755_v11, %v2763_v13 }
 0x545   :  { %v1318_v41 = vpop.xlane.xlu1 %1317 }
 0x546   :  { %5229 = vrcp.f32 %v1318_v41  ;;  %v2771_v17 = vrot.slane %v2764_v33, %v5375_v38 }
 0x548   :  { %v2777_v48 = vshrl.u32 %v2771_v17, 16 }
 0x549   :  { %v3249_v45 = vpop.trf.xlu0 }
 0x54b   :  { %v3265_v52 = vpop.trf.xlu1 }
 0x54d   :  { %v3281_v63 = vpop.trf.xlu0 }
 0x54e   :  { %v3353_v28 = vcombine.low %v3217_v23, %v3281_v63 }
 0x54f   :  { %v3297_v24 = vpop.trf.xlu1 }
 0x550   :  { %v3403_v4 = vcombine.low %v3233_v57, %v3297_v24  ;;  %v3360_v29 = vrot.slane %v3353_v28, %v5368_v26  ;;  %v2730_v57 = vrot.slane %v5018_v14, %v5368_v26 }
 0x551   :  { %v5228_v22 = vpop.eup %5227  ;;  %v3313_v5 = vpop.trf.xlu0 }
 0x552   :  { %v3361_v6 = vcombine.low %v3249_v45, %v3313_v5  ;;  %v1325_v10 = vmul.f32 %v5228_v22, %v5685_v0  ;;  %v3410_v42 = vrot.slane %v3403_v4, %v5368_v26  ;;  %v2739_v61 = vcombine.low %v2730_v57, %v2738_v25 }
 0x553   :  { %v5230_v7 = vpop.eup %5229  ;;  %v3329_v30 = vpop.trf.xlu1 }
 0x554   :  { %v3368_v37 = vrot.slane %v3361_v6, %v5368_v26  ;;  %v3411_v19 = vcombine.low %v3265_v52, %v3329_v30  ;;  %v1329_v21 = vpack.c.bf16 %v1325_v10, %v1325_v10  ;;  %v1326_v9 = vmul.f32 %v5230_v7, %v5687_v2 }
 0x555   :  { %v3376_v2 = vrot.slane %v3369_v16, %v5375_v38  ;;  %v2746_v45 = vrot.slane %v2739_v61, %v5375_v38 }
 0x556   :  { %v3377_v23 = vcombine.low %v3360_v29, %v3368_v37  ;;  %v3418_v0 = vrot.slane %v3411_v19, %v5368_v26  ;;  %v2093_v46 = vsel %vm1282_vm3, %v1329_v21, 0  ;;  %v1330_v50 = vpack.c.bf16 %v1326_v9, %v1326_v9 }
 0x557   :  { %5118 = vmatpush3.bf16.xpose.msra.mxu0 %v2093_v46  ;;  %v2775_v51 = vpack.i.b16 %v2771_v17, %v2746_v45  ;;  %v2747_v55 = vcombine.high %v2746_v45, %v5253_v1 }
 0x558   :  { %v3384_v59 = vrot.slane %v3377_v23, %v5375_v38  ;;  %v3427_v40 = vcombine.low %v3410_v42, %v3418_v0  ;;  %v2140_v31 = vsel %vm1282_vm3, %v1330_v50, 0  ;;  %5129 = vmatprep.subr.bf16.mxu0 %v5254_v12 }
 0x559   :  { %5124 = vmatpush3.bf16.xpose.msra.mxu1 %v2140_v31  ;;  %v2782_v22 = vshrl.u32 %v2747_v55, 16 }
 0x55a   :  { %v3385_v47 = vcombine.low %v3376_v2, %v3384_v59  ;;  %v3386_v49 = vcombine.high %v3376_v2, %v3384_v59  ;;  %v3434_v18 = vrot.slane %v3427_v40, %v5375_v38  ;;  %5135 = vmatprep.subr.bf16.mxu1 %v5254_v12 }
 0x55c   :  { %v3435_v39 = vcombine.low %v3426_v15, %v3434_v18  ;;  %v3436_v16 = vcombine.high %v3426_v15, %v3434_v18  ;;  %v3441_v41 = vshrl.u32 %v3385_v47, 16  ;;  %v3449_v20 = vshrl.u32 %v3386_v49, 16 }
 0x55e   :  { %5120 = vmatmul.mubr.msk.bf16.vlgmr.msra.gmra.mxu0 %vm1282_vm3, %v1991_v58  ;;  %v3439_v36 = vpack.i.b16 %v3435_v39, %v3385_v47  ;;  %v3442_v34 = vshrl.u32 %v3435_v39, 16  ;;  %v3447_v56 = vpack.i.b16 %v3436_v16, %v3386_v49  ;;  %v3450_v43 = vshrl.u32 %v3436_v16, 16 }
 0x55f   :  { %5131 = vmatprep.mubr.msk.bf16.mxu0 %vm5261_vm1, %v5254_v12  ;;  %v2776_v58 = vshrl.u32 %v2746_v45, 16 }
 0x560   :  { %5126 = vmatmul.mubr.msk.bf16.vlgmr.msra.gmra.mxu1 %vm1282_vm3, %v5649_v60  ;;  %5130 = vmatpush3.bf16.msra.mxu0 %v3439_v36  ;;  %v3443_v44 = vpack.i.b16 %v3442_v34, %v3441_v41  ;;  %v3451_v52 = vpack.i.b16 %v3450_v43, %v3449_v20  ;;  %v2772_v60 = vcombine.high %v2771_v17, %v5253_v1 }
 0x561   :  { %5141 = vmatprep.subr.bf16.mxu0 %v5254_v12  ;;  %5137 = vmatprep.mubr.msk.bf16.mxu1 %vm5261_vm1, %v5254_v12  ;;  %v2778_v53 = vpack.i.b16 %v2777_v48, %v2776_v58 }
 0x562   :  { %5136 = vmatpush3.bf16.msra.mxu1 %v3443_v44  ;;  %v2783_v28 = vshrl.u32 %v2772_v60, 16  ;;  %v2781_v5 = vpack.i.b16 %v2772_v60, %v2747_v55 }
 0x563   :  { %5147 = vmatprep.subr.bf16.mxu1 %v5254_v12 }
 0x564   :  { %v2784_v14 = vpack.i.b16 %v2783_v28, %v2782_v22 }
 0x566   :  { %5132 = vmatmul.mubr.msk.bf16.vlgmr.msra.gmra.mxu0 %vm1105_vm2, %v2775_v51 }
 0x567   :  { %5142 = vmatpush3.bf16.msra.mxu0 %v3447_v56  ;;  %v2642_v54 = vpop.permute.xlu1 %2641  ;;  %5143 = vmatprep.mubr.msk.bf16.mxu0 %vm5261_vm1, %v5254_v12 }
 0x568   :  { %5138 = vmatmul.mubr.msk.bf16.vlgmr.msra.gmra.mxu1 %vm1105_vm2, %v2778_v53  ;;  %5153 = vmatprep.subr.bf16.mxu0 %v5254_v12  ;;  %v2647_v62 = vcombine.low %v5706_v32, %v2642_v54  ;;  %v2648_v3 = vcombine.high %v5706_v32, %v2642_v54 }
 0x569   :  { %5148 = vmatpush3.bf16.msra.mxu1 %v3451_v52  ;;  %5149 = vmatprep.mubr.msk.bf16.mxu1 %vm5261_vm1, %v5254_v12 }
 0x56a   :  { %v2639_v63 = vpop.permute.xlu0 %2638  ;;  %5159 = vmatprep.subr.bf16.mxu1 %v5254_v12  ;;  %v2655_v6 = vrot.slane %v2647_v62, %v5368_v26  ;;  %v2662_v27 = vrot.slane %v2648_v3, %v5368_v26 }
 0x56b   :  { %v2645_v24 = vpop.permute.xlu1 %2644 }
 0x56c   :  { %v2663_v35 = vcombine.low %v2639_v63, %v2645_v24  ;;  %v2664_v4 = vcombine.high %v2639_v63, %v2645_v24 }
 0x56e   :  { %v2671_v10 = vrot.slane %v2663_v35, %v5368_v26  ;;  %v2678_v7 = vrot.slane %v2664_v4, %v5368_v26  ;;  %5144 = vmatmul.mubr.msk.bf16.vlgmr.msra.gmra.mxu0 %vm1105_vm2, %v2781_v5 }
 0x56f   :  { %5155 = vmatprep.mubr.msk.bf16.mxu0 %vm5261_vm1, %v5254_v12 }
 0x570   :  { %v2679_v29 = vcombine.low %v2655_v6, %v2671_v10  ;;  %v2680_v30 = vcombine.high %v2655_v6, %v2671_v10  ;;  %5150 = vmatmul.mubr.msk.bf16.vlgmr.msra.gmra.mxu1 %vm1105_vm2, %v2784_v14  ;;  %v2695_v37 = vcombine.low %v2662_v27, %v2678_v7  ;;  %v2696_v11 = vcombine.high %v2662_v27, %v2678_v7 }
 0x571   :  { %5161 = vmatprep.mubr.msk.bf16.mxu1 %vm5261_vm1, %v5254_v12 }
 0x572   :  { %v2687_v32 = vrot.slane %v2679_v29, %v5375_v38  ;;  %v2694_v9 = vrot.slane %v2680_v30, %v5375_v38  ;;  %v2703_v42 = vrot.slane %v2695_v37, %v5375_v38  ;;  %v2710_v50 = vrot.slane %v2696_v11, %v5375_v38 }
 0x574   :  { %v2715_v19 = vpack.c.bf16 %v2687_v32, %v2687_v32  ;;  %v2711_v21 = vcombine.high %v2687_v32, %v5254_v12  ;;  %v2717_v23 = vpack.c.bf16 %v2694_v9, %v2694_v9  ;;  %v2712_v0 = vcombine.high %v2694_v9, %v5254_v12 }
 0x575   :  { %v2719_v46 = vpack.c.bf16 %v2703_v42, %v2703_v42  ;;  %v2713_v25 = vcombine.high %v2703_v42, %v5254_v12  ;;  %v2721_v2 = vpack.c.bf16 %v2710_v50, %v2710_v50  ;;  %v2714_v40 = vcombine.high %v2710_v50, %v5254_v12 }
 0x576   :  { %3677 = vxpose.xlu0.c.b16.start.end [1/1] (short) (narrow) %v2715_v19, 16  ;;  %v2716_v13 = vpack.c.bf16 %v2711_v21, %v2711_v21  ;;  %v2718_v57 = vpack.c.bf16 %v2712_v0, %v2712_v0 }
 0x577   :  { %v2720_v59 = vpack.c.bf16 %v2713_v25, %v2713_v25  ;;  %v2722_v31 = vpack.c.bf16 %v2714_v40, %v2714_v40 }
 0x578   :  { %3693 = vxpose.xlu1.c.b16.start.end [1/1] (short) (narrow) %v2716_v13, 16 }
 0x57a   :  { %3709 = vxpose.xlu0.c.b16.start.end [1/1] (short) (narrow) %v2717_v23, 16 }
 0x57c   :  { %3741 = vxpose.xlu1.c.b16.start.end [1/1] (short) (narrow) %v2719_v46, 16 }
 0x57e   :  { %3725 = vxpose.xlu0.c.b16.start.end [1/1] (short) (narrow) %v2718_v57, 16 }
 0x580   :  { %3773 = vxpose.xlu1.c.b16.start.end [1/1] (short) (narrow) %v2721_v2, 16 }
 0x582   :  { %3757 = vxpose.xlu0.c.b16.start.end [1/1] (short) (narrow) %v2720_v59, 16 }
 0x586   :  { %3789 = vxpose.xlu0.c.b16.start.end [1/1] (short) (narrow) %v2722_v31, 16 }
 0x5d8   :  { %v3685_v33 = vpop.trf.xlu0 }
 0x5d9   :  { %v3809_v61 = vshrl.u32 %v3685_v33, 16 }
 0x5da   :  { %v3701_v15 = vpop.trf.xlu1 }
 0x5db   :  { %v3810_v39 = vshrl.u32 %v3701_v15, 16  ;;  %v5816_v16 = vpack.i.b16 %v3701_v15, %v3685_v33 }
 0x5dc   :  { %v3717_v47 = vpop.trf.xlu0 }
 0x5dd   :  { %v5820_v36 = vpack.i.b16 %v3810_v39, %v3809_v61  ;;  %v3817_v52 = vshrl.u32 %v3717_v47, 16 }
 0x5de   :  { %v3749_v49 = vpop.trf.xlu1 }
 0x5df   :  { %v3825_v41 = vshrl.u32 %v3749_v49, 16 }
 0x5e0   :  { %v3733_v18 = vpop.trf.xlu0 }
 0x5e1   :  { %v3818_v48 = vshrl.u32 %v3733_v18, 16  ;;  %v3815_v54 = vpack.i.b16 %v3733_v18, %v3717_v47 }
 0x5e2   :  { %v3781_v43 = vpop.trf.xlu1 }
 0x5e3   :  { %v3833_v55 = vshrl.u32 %v3781_v43, 16  ;;  %v3819_v22 = vpack.i.b16 %v3818_v48, %v3817_v52 }
 0x5e4   :  { %v5818_v17 = vpop.f32.mrf.mxu0  ;;  %v3765_v20 = vpop.trf.xlu0 }
 0x5e5   :  { %v3826_v34 = vshrl.u32 %v3765_v20, 16  ;;  %v5822_v56 = vpack.i.b16 %v3765_v20, %v3749_v49 }
 0x5e6   :  { %v5109_v44 = vpop.f32.mrf.mxu0  ;;  %v5824_v45 = vpop.f32.mrf.mxu1 }
 0x5e7   :  { %v3827_v51 = vpack.i.b16 %v3826_v34, %v3825_v41  ;;  %v3838_v58 = vcombine.high %v5816_v16, %v5822_v56 }
 0x5e8   :  { %v5828_v53 = vpop.f32.mrf.mxu0  ;;  %v5115_v60 = vpop.f32.mrf.mxu1 }
 0x5e9   :  { %v3906_v62 = vcombine.high %v5820_v36, %v3827_v51  ;;  %v3797_v63 = vpop.trf.xlu0  ;;  %v5834_v10 = vrot.slane %v3838_v58, %v5368_v26  ;;  %v3905_v48 = vcombine.low %v5820_v36, %v3827_v51  ;;  %v3837_v60 = vcombine.low %v5816_v16, %v5822_v56 }
 0x5ea   :  { %v5110_v28 = vpop.f32.mrf.mxu0  ;;  %v5831_v24 = vpop.f32.mrf.mxu1  ;;  %v3834_v3 = vshrl.u32 %v3797_v63, 16  ;;  %v3831_v35 = vpack.i.b16 %v3797_v63, %v3781_v43 }
 0x5eb   :  { %v5840_v27 = vrot.slane %v3906_v62, %v5368_v26  ;;  %v3913_v62 = vrot.slane %v3905_v48, %v5368_v26  ;;  %v3845_v28 = vrot.slane %v3837_v60, %v5368_v26 }
 0x5ec   :  { %v5116_v4 = vpop.f32.mrf.mxu1  ;;  %v3835_v5 = vpack.i.b16 %v3834_v3, %v3833_v55  ;;  %v3854_v6 = vcombine.high %v3815_v54, %v3831_v35  ;;  %v3853_v55 = vcombine.low %v3815_v54, %v3831_v35 }
 0x5ee   :  { %v5837_v7 = vrot.slane %v3854_v6, %v5368_v26  ;;  %v3922_v14 = vcombine.high %v3819_v22, %v3835_v5  ;;  %v3921_v58 = vcombine.low %v3819_v22, %v3835_v5  ;;  %v3861_v3 = vrot.slane %v3853_v55, %v5368_v26 }
 0x5f0   :  { %v5843_v29 = vrot.slane %v3922_v14, %v5368_v26  ;;  %v3885_v30 = vcombine.low %v5834_v10, %v5837_v7  ;;  %v3886_v32 = vcombine.high %v5834_v10, %v5837_v7  ;;  %v3929_v63 = vrot.slane %v3921_v58, %v5368_v26 }
 0x5f1   :  { %v3869_v6 = vcombine.low %v3845_v28, %v3861_v3 }
 0x5f2   :  { %v3953_v37 = vcombine.low %v5840_v27, %v5843_v29  ;;  %v3954_v19 = vcombine.high %v5840_v27, %v5843_v29  ;;  %v3937_v4 = vcombine.low %v3913_v62, %v3929_v63  ;;  %v3938_v35 = vcombine.high %v3913_v62, %v3929_v63 }
 0x5f3   :  { %v3877_v36 = vrot.slane %v3869_v6, %v5375_v38 }
 0x5f4   :  { %v3945_v14 = vrot.slane %v3937_v4, %v5375_v38 }
 0x5f5   :  { %v3901_v5 = vcombine.high %v3877_v36, %v5253_v1 }
 0x5f6   :  { %v3969_v54 = vcombine.high %v3945_v14, %v5253_v1 }
 0x61e   :  { %v5853_v21 = vpop.f32.mrf.mxu0 }
 0x620   :  { %v5121_v9 = vpop.f32.mrf.mxu0  ;;  %v5855_v11 = vpop.f32.mrf.mxu1 }
 0x621   :  { %v3870_v9 = vcombine.high %v3845_v28, %v3861_v3 }
 0x622   :  { %v5857_v13 = vpop.f32.mrf.mxu0  ;;  %v5127_v42 = vpop.f32.mrf.mxu1 }
 0x623   :  { %v3952_v42 = vrot.slane %v3938_v35, %v5375_v38 }
 0x624   :  { %v5122_v23 = vpop.f32.mrf.mxu0  ;;  %v5859_v0 = vpop.f32.mrf.mxu1 }
 0x625   :  { %v3884_v23 = vrot.slane %v3870_v9, %v5375_v38 }
 0x626   :  { %v5128_v46 = vpop.f32.mrf.mxu1  ;;  %v3490_v50 = vpop.f32.mrf.mxu0 }
 0x627   :  { %v5861_v57 = vmul.f32 0.25, %v3490_v50  ;;  %v3970_v46 = vcombine.high %v3952_v42, %v5253_v1  ;;  %v3902_v50 = vcombine.high %v3884_v23, %v5253_v1 }
 0x628   :  { %v5133_v25 = vpop.f32.mrf.mxu0  ;;  %v3533_v2 = vpop.f32.mrf.mxu1 }
 0x629   :  { %v5863_v59 = vmul.f32 0.25, %v3533_v2  ;;  %v3629_v40 = vsel %vm1282_vm3, %v5861_v57, -inf  ;;  %v3961_v25 = vrot.slane %v3953_v37, %v5375_v38  ;;  %v3893_v2 = vrot.slane %v3885_v30, %v5375_v38 }
 0x62a   :  { %v3493_v31 = vpop.f32.mrf.mxu0  ;;  %v5139_v33 = vpop.f32.mrf.mxu1  ;;  %3630 = vmax.xlane.f32.xlu0 %v3629_v40  ;;  %v3900_v37 = vrot.slane %v3886_v32, %v5375_v38 }
 0x62b   :  { %v3632_v15 = vsel %vm1282_vm3, %v5863_v59, -inf  ;;  %v3971_v40 = vcombine.high %v3961_v25, %v5253_v1  ;;  %v3903_v31 = vcombine.high %v3893_v2, %v5253_v1  ;;  %v3968_v33 = vrot.slane %v3954_v19, %v5375_v38 }
 0x62c   :  { %v5134_v47 = vpop.f32.mrf.mxu0  ;;  %v3536_v49 = vpop.f32.mrf.mxu1  ;;  %3633 = vmax.xlane.f32.xlu1 %v3632_v15  ;;  %v3904_v35 = vcombine.high %v3900_v37, %v5253_v1 }
 0x62e   :  { %v5140_v18 = vpop.f32.mrf.mxu1  ;;  %v3576_v61 = vpop.f32.mrf.mxu0 }
 0x62f   :  { %v3627_v51 = vmul.f32 0.25, %v3576_v61 }
 0x630   :  { %v5145_v39 = vpop.f32.mrf.mxu0  ;;  %v3619_v41 = vpop.f32.mrf.mxu1 }
 0x631   :  { %v3628_v22 = vmul.f32 0.25, %v3619_v41  ;;  %v3635_v16 = vsel %vm1282_vm3, %v3627_v51, -inf }
 0x632   :  { %v3579_v20 = vpop.f32.mrf.mxu0  ;;  %v5151_v34 = vpop.f32.mrf.mxu1 }
 0x633   :  { %v3638_v56 = vsel %vm1282_vm3, %v3628_v22, -inf }
 0x634   :  { %v5146_v43 = vpop.f32.mrf.mxu0  ;;  %v3622_v44 = vpop.f32.mrf.mxu1 }
 0x636   :  { %v5152_v52 = vpop.f32.mrf.mxu1 }
 0x657   :  { %3989 = vxpose.xlu0.c.b16.start.end [1/1] (short) (narrow) %v3945_v14, 16 }
 0x659   :  { %3973 = vxpose.xlu1.c.b16.start.end [1/1] (short) (narrow) %v3877_v36, 16 }
 0x664   :  { %3636 = vmax.xlane.f32.xlu0 %v3635_v16 }
 0x666   :  { %3639 = vmax.xlane.f32.xlu1 %v3638_v56 }
 0x691   :  { %4021 = vxpose.xlu0.c.b16.start.end [1/1] (short) (narrow) %v3969_v54, 16 }
 0x693   :  { %4005 = vxpose.xlu1.c.b16.start.end [1/1] (short) (narrow) %v3901_v5, 16  ;;  %v3972_v5 = vcombine.high %v3968_v33, %v5253_v1 }
 0x695   :  { %4053 = vxpose.xlu0.c.b16.start.end [1/1] (short) (narrow) %v3952_v42, 16 }
 0x697   :  { %4037 = vxpose.xlu1.c.b16.start.end [1/1] (short) (narrow) %v3884_v23, 16 }
 0x699   :  { %4085 = vxpose.xlu0.c.b16.start.end [1/1] (short) (narrow) %v3970_v46, 16 }
 0x69b   :  { %4069 = vxpose.xlu1.c.b16.start.end [1/1] (short) (narrow) %v3902_v50, 16 }
 0x69d   :  { %4117 = vxpose.xlu0.c.b16.start.end [1/1] (short) (narrow) %v3961_v25, 16 }
 0x69f   :  { %4101 = vxpose.xlu1.c.b16.start.end [1/1] (short) (narrow) %v3893_v2, 16 }
 0x6a1   :  { %4149 = vxpose.xlu0.c.b16.start.end [1/1] (short) (narrow) %v3971_v40, 16 }
 0x6a3   :  { %4133 = vxpose.xlu1.c.b16.start.end [1/1] (short) (narrow) %v3903_v31, 16 }
 0x6a5   :  { %4181 = vxpose.xlu0.c.b16.start.end [1/1] (short) (narrow) %v3968_v33, 16 }
 0x6a7   :  { %4165 = vxpose.xlu1.c.b16.start.end [1/1] (short) (narrow) %v3900_v37, 16 }
 0x6b3   :  { %v3631_v30 = vpop.xlane.xlu0 %3630 }
 0x6b4   :  { %v3641_v15 = vsub.f32 %v5861_v57, %v3631_v30 }
 0x6b5   :  { %v3634_v47 = vpop.xlane.xlu1 %3633 }
 0x6b6   :  { %v3645_v49 = vmul.f32 1.442695, %v3641_v15  ;;  %v3642_v18 = vsub.f32 %v5863_v59, %v3634_v47 }
 0x6b8   :  { %5231 = vpow2.f32 %v3645_v49  ;;  %v3647_v61 = vmul.f32 1.442695, %v3642_v18 }
 0x6b9   :  { %v3997_v10 = vpop.trf.xlu0 }
 0x6ba   :  { %5233 = vpow2.f32 %v3647_v61 }
 0x6bb   :  { %v3981_v7 = vpop.trf.xlu1 }
 0x6c5   :  { %v5232_v39 = vpop.eup %5231 }
 0x6c6   :  { %v3653_v27 = vsel %vm1282_vm3, %v5232_v39, 0.0 }
 0x6c7   :  { %v5234_v29 = vpop.eup %5233  ;;  %3654 = vadd.xlane.f32.xlu1 %v3653_v27 }
 0x6c8   :  { %v3656_v19 = vsel %vm1282_vm3, %v5234_v29, 0.0 }
 0x6c9   :  { %3657 = vadd.xlane.f32.xlu0 %v3656_v19 }
 0x6ed   :  { %v3637_v32 = vpop.xlane.xlu0 %3636 }
 0x6ee   :  { %v3643_v41 = vsub.f32 %v3627_v51, %v3637_v32 }
 0x6ef   :  { %v3640_v57 = vpop.xlane.xlu1 %3639 }
 0x6f0   :  { %v3649_v20 = vmul.f32 1.442695, %v3643_v41  ;;  %v3644_v34 = vsub.f32 %v3628_v22, %v3640_v57 }
 0x6f2   :  { %5235 = vpow2.f32 %v3649_v20  ;;  %v3651_v59 = vmul.f32 1.442695, %v3644_v34 }
 0x6f3   :  { %v4029_v43 = vpop.trf.xlu0 }
 0x6f4   :  { %5237 = vpow2.f32 %v3651_v59 }
 0x6f5   :  { %v4013_v44 = vpop.trf.xlu1 }
 0x6f7   :  { %v4061_v52 = vpop.trf.xlu0 }
 0x6f8   :  { %v4279_v48 = vcombine.low %v3997_v10, %v4061_v52 }
 0x6f9   :  { %v4045_v58 = vpop.trf.xlu1 }
 0x6fa   :  { %v4229_v60 = vcombine.low %v3981_v7, %v4045_v58  ;;  %v5909_v28 = vrot.slane %v4279_v48, %v5368_v26 }
 0x6fb   :  { %v4093_v55 = vpop.trf.xlu0 }
 0x6fc   :  { %v4287_v62 = vcombine.low %v4029_v43, %v4093_v55  ;;  %v4236_v14 = vrot.slane %v4229_v60, %v5368_v26 }
 0x6fd   :  { %v4077_v63 = vpop.trf.xlu1 }
 0x6fe   :  { %v5912_v3 = vrot.slane %v4287_v62, %v5368_v26  ;;  %v4237_v4 = vcombine.low %v4013_v44, %v4077_v63 }
 0x6ff   :  { %v5914_v6 = vpop.eup %5235  ;;  %v4125_v42 = vpop.trf.xlu0 }
 0x700   :  { %v4311_v36 = vcombine.low %v5909_v28, %v5912_v3  ;;  %v4244_v51 = vrot.slane %v4237_v4, %v5368_v26  ;;  %v3659_v22 = vsel %vm1282_vm3, %v5914_v6, 0.0 }
 0x701   :  { %v5922_v16 = vpop.eup %5237  ;;  %3660 = vadd.xlane.f32.xlu1 %v3659_v22  ;;  %v4109_v9 = vpop.trf.xlu1 }
 0x702   :  { %v4261_v56 = vcombine.low %v4236_v14, %v4244_v51  ;;  %v3662_v54 = vsel %vm1282_vm3, %v5922_v16, 0.0  ;;  %v4318_v41 = vrot.slane %v4311_v36, %v5375_v38 }
 0x703   :  { %3663 = vadd.xlane.f32.xlu0 %v3662_v54  ;;  %v4157_v23 = vpop.trf.xlu0 }
 0x704   :  { %v4268_v19 = vrot.slane %v4261_v56, %v5375_v38 }
 0x705   :  { %v4141_v1 = vpop.trf.xlu1 }
 0x709   :  { %v4173_v46 = vpop.trf.xlu1 }
 0x70a   :  { %v4245_v33 = vcombine.low %v4109_v9, %v4173_v46 }
 0x70c   :  { %v4252_v49 = vrot.slane %v4245_v33, %v5368_v26 }
 0x72e   :  { %4197 = vxpose.xlu1.c.b16.start.end [1/1] (short) (narrow) %v3904_v35, 16 }
 0x730   :  { %4213 = vxpose.xlu0.c.b16.start.end [1/1] (short) (narrow) %v3972_v5, 16 }
 0x734   :  { %2215 = vxpose.xlu0.b32.start [1/2] (short) (narrow) %v5824_v45, 8  ;;  %v4189_v45 = vpop.trf.xlu0 }
 0x735   :  { %v4295_v30 = vcombine.low %v4125_v42, %v4189_v45 }
 0x738   :  { %2183 = vxpose.xlu1.b32.start [1/2] (short) (narrow) %v5818_v17, 8  ;;  %2216 = vxpose.xlu0.b32.end [2/2] (short) (narrow) %v5831_v24, 8 }
 0x73c   :  { %2184 = vxpose.xlu1.b32.end [2/2] (short) (narrow) %v5828_v53, 8  ;;  %2247 = vxpose.xlu0.b32.start [1/2] (short) (narrow) %v5853_v21, 8 }
 0x740   :  { %2279 = vxpose.xlu1.b32.start [1/2] (short) (narrow) %v5855_v11, 8  ;;  %2248 = vxpose.xlu0.b32.end [2/2] (short) (narrow) %v5857_v13, 8 }
 0x744   :  { %2280 = vxpose.xlu1.b32.end [2/2] (short) (narrow) %v5859_v0, 8 }
 0x750   :  { %v3655_v50 = vpop.xlane.xlu1 %3654 }
 0x751   :  { %5239 = vrcp.f32 %v3655_v50 }
 0x752   :  { %v3658_v17 = vpop.xlane.xlu0 %3657 }
 0x753   :  { %5241 = vrcp.f32 %v3658_v17 }
 0x75e   :  { %v5240_v24 = vpop.eup %5239 }
 0x75f   :  { %v3669_v53 = vmul.f32 %v5240_v24, %v5232_v39  ;;  %v4302_v39 = vrot.slane %v4295_v30, %v5368_v26 }
 0x760   :  { %v5242_v25 = vpop.eup %5241 }
 0x761   :  { %v3673_v21 = vpack.c.bf16 %v3669_v53, %v3669_v53  ;;  %v3670_v2 = vmul.f32 %v5242_v25, %v5234_v29 }
 0x763   :  { %v4345_v11 = vsel %vm1282_vm3, %v3673_v21, 0  ;;  %v3674_v40 = vpack.c.bf16 %v3670_v2, %v3670_v2 }
 0x764   :  { %5154 = vmatpush3.bf16.xpose.msra.mxu0 %v4345_v11 }
 0x765   :  { %v4392_v13 = vsel %vm1282_vm3, %v3674_v40, 0  ;;  %5165 = vmatprep.subr.bf16.mxu0 %v5254_v12 }
 0x766   :  { %5160 = vmatpush3.bf16.xpose.msra.mxu1 %v4392_v13 }
 0x767   :  { %5171 = vmatprep.subr.bf16.mxu1 %v5254_v12 }
 0x78a   :  { %v3661_v0 = vpop.xlane.xlu1 %3660 }
 0x78b   :  { %5243 = vrcp.f32 %v3661_v0 }
 0x78c   :  { %v3664_v31 = vpop.xlane.xlu0 %3663 }
 0x78d   :  { %5245 = vrcp.f32 %v3664_v31 }
 0x790   :  { %v4205_v37 = vpop.trf.xlu1 }
 0x791   :  { %v4253_v15 = vcombine.low %v4141_v1, %v4205_v37 }
 0x792   :  { %v4221_v47 = vpop.trf.xlu0 }
 0x793   :  { %v4260_v18 = vrot.slane %v4253_v15, %v5368_v26  ;;  %v4303_v61 = vcombine.low %v4157_v23, %v4221_v47 }
 0x795   :  { %v4269_v27 = vcombine.low %v4252_v49, %v4260_v18  ;;  %v4310_v29 = vrot.slane %v4303_v61, %v5368_v26 }
 0x797   :  { %v4276_v10 = vrot.slane %v4269_v27, %v5375_v38  ;;  %v4319_v7 = vcombine.low %v4302_v39, %v4310_v29 }
 0x798   :  { %v5244_v32 = vpop.eup %5243 }
 0x799   :  { %v4277_v57 = vcombine.low %v4268_v19, %v4276_v10  ;;  %v4278_v20 = vcombine.high %v4268_v19, %v4276_v10  ;;  %v4326_v34 = vrot.slane %v4319_v7, %v5375_v38  ;;  %v3671_v59 = vmul.f32 %v5244_v32, %v5914_v6 }
 0x79a   :  { %v5246_v43 = vpop.eup %5245 }
 0x79b   :  { %v4327_v44 = vcombine.low %v4318_v41, %v4326_v34  ;;  %v4328_v52 = vcombine.high %v4318_v41, %v4326_v34  ;;  %v4332_v48 = vshrl.u32 %v4277_v57, 16  ;;  %v4338_v58 = vshrl.u32 %v4278_v20, 16 }
 0x79c   :  { %v3675_v60 = vpack.c.bf16 %v3671_v59, %v3671_v59  ;;  %v3672_v55 = vmul.f32 %v5246_v43, %v5922_v16 }
 0x79d   :  { %v4331_v62 = vpack.i.b16 %v4327_v44, %v4277_v57  ;;  %v4333_v63 = vshrl.u32 %v4327_v44, 16  ;;  %v4337_v28 = vpack.i.b16 %v4328_v52, %v4278_v20  ;;  %v4339_v3 = vshrl.u32 %v4328_v52, 16 }
 0x79e   :  { %v4439_v4 = vsel %vm1282_vm3, %v3675_v60, 0  ;;  %v3676_v14 = vpack.c.bf16 %v3672_v55, %v3672_v55 }
 0x79f   :  { %5156 = vmatmul.mubr.msk.bf16.vlgmr.msra.gmra.mxu0 %vm1282_vm3, %v4331_v62  ;;  %v4334_v36 = vpack.i.b16 %v4333_v63, %v4332_v48  ;;  %v4340_v51 = vpack.i.b16 %v4339_v3, %v4338_v58 }
 0x7a0   :  { %5166 = vmatpush3.bf16.xpose.msra.mxu0 %v4439_v4  ;;  %v4486_v6 = vsel %vm1282_vm3, %v3676_v14, 0  ;;  %5167 = vmatprep.mubr.msk.bf16.mxu0 %vm5261_vm1, %v5254_v12 }
 0x7a1   :  { %5162 = vmatmul.mubr.msk.bf16.vlgmr.msra.gmra.mxu1 %vm1282_vm3, %v4334_v36  ;;  %5177 = vmatprep.subr.bf16.mxu0 %v5254_v12 }
 0x7a2   :  { %5172 = vmatpush3.bf16.xpose.msra.mxu1 %v4486_v6  ;;  %5173 = vmatprep.mubr.msk.bf16.mxu1 %vm5261_vm1, %v5254_v12 }
 0x7a7   :  { %5168 = vmatmul.mubr.msk.bf16.vlgmr.msra.gmra.mxu0 %vm1282_vm3, %v4337_v28  ;;  %v5211_v28 = vld [vmem:[%s6070_s3 + $0x18] sm:$0xff]  }
 0x7a8   :  { %5185 = vmatprep.mubr.msk.bf16.mxu0 %vm5261_vm1, %v5254_v12  ;;  %5178 = vmatpush3.bf16.msra.mxu0 %v5211_v28 }
 0x7a9   :  { %5174 = vmatmul.mubr.msk.bf16.vlgmr.msra.gmra.mxu1 %vm1282_vm3, %v4340_v51  ;;  %5179 = vmatprep.subr.bf16.mxu0 %v5254_v12 }
 0x7b0   :  { %v2231_v22 = vpop.trf.xlu0 }
 0x7b4   :  { %v2199_v16 = vpop.trf.xlu1 }
 0x7b8   :  { %v2263_v42 = vpop.trf.xlu0 }
 0x7b9   :  { %v2311_v17 = vcombine.low %v2199_v16, %v2263_v42  ;;  %v2312_v24 = vcombine.high %v2199_v16, %v2263_v42 }
 0x7bb   :  { %v2319_v13 = vrot.slane %v2311_v17, %v5368_v26  ;;  %v2326_v0 = vrot.slane %v2312_v24, %v5368_v26 }
 0x7bc   :  { %v2295_v1 = vpop.trf.xlu1 }
 0x7bd   :  { %v2327_v53 = vcombine.low %v2231_v22, %v2295_v1  ;;  %v2328_v25 = vcombine.high %v2231_v22, %v2295_v1 }
 0x7bf   :  { %v2335_v31 = vrot.slane %v2327_v53, %v5368_v26  ;;  %v2342_v33 = vrot.slane %v2328_v25, %v5368_v26 }
 0x7c1   :  { %v2343_v47 = vcombine.low %v2319_v13, %v2335_v31  ;;  %v2344_v49 = vcombine.high %v2319_v13, %v2335_v31  ;;  %v2359_v18 = vcombine.low %v2326_v0, %v2342_v33  ;;  %v2360_v61 = vcombine.high %v2326_v0, %v2342_v33  ;;  %v5213_v13 = vld [vmem:[%s6070_s3 + $0x8] sm:$0xff]  }
 0x7c3   :  { %v2351_v39 = vrot.slane %v2343_v47, %v5375_v38  ;;  %v2358_v27 = vrot.slane %v2344_v49, %v5375_v38  ;;  %v2367_v29 = vrot.slane %v2359_v18, %v5375_v38  ;;  %v2374_v19 = vrot.slane %v2360_v61, %v5375_v38 }
 0x7c5   :  { %v2379_v10 = vcombine.low %v2351_v39, %v2358_v27  ;;  %v5016_v7 = vcombine.high %v2351_v39, %v2358_v27  ;;  %v2395_v32 = vcombine.low %v2367_v29, %v2374_v19  ;;  %v5017_v41 = vcombine.high %v2367_v29, %v2374_v19 }
 0x7c7   :  { %v2386_v57 = vrot.slane %v2379_v10, %v5368_v26  ;;  %v2394_v20 = vrot.slane %v5016_v7, %v5368_v26  ;;  %v2402_v34 = vrot.slane %v2395_v32, %v5368_v26  ;;  %v2410_v59 = vrot.slane %v5017_v41, %v5368_v26 }
 0x7c9   :  { %v2412_v43 = vcombine.high %v2386_v57, %v2394_v20  ;;  %v2428_v44 = vcombine.high %v2402_v34, %v2410_v59  ;;  %v2411_v60 = vcombine.low %v2386_v57, %v2394_v20  ;;  %v2427_v55 = vcombine.low %v2402_v34, %v2410_v59 }
 0x7cb   :  { %v2426_v52 = vrot.slane %v2412_v43, %v5375_v38  ;;  %v2442_v48 = vrot.slane %v2428_v44, %v5375_v38  ;;  %v5979_v62 = vrot.slane %v2411_v60, %v5375_v38  ;;  %v5982_v63 = vrot.slane %v2427_v55, %v5375_v38 }
 0x7cd   :  { %v2445_v58 = vcombine.low %v2426_v52, %v2442_v48  ;;  %v2444_v3 = vcombine.high %v5979_v62, %v5982_v63  ;;  %v2446_v4 = vcombine.high %v2426_v52, %v2442_v48  ;;  %v2443_v57 = vcombine.low %v5979_v62, %v5982_v63  ;;  %v5032_v63 = vld [vmem:[%s6071_s4] ss:$0 sm:$0xff] }
 0x85f   :  { %v4381_v56 = vpop.f32.mrf.mxu0 }
 0x860   :  { %4529 = vxpose.xlu0.b32.start [1/2] (short) (narrow) %v4381_v56, 8 }
 0x861   :  { %v5157_v54 = vpop.f32.mrf.mxu0  ;;  %v4428_v35 = vpop.f32.mrf.mxu1 }
 0x862   :  { %4561 = vxpose.xlu1.b32.start [1/2] (short) (narrow) %v4428_v35, 8 }
 0x863   :  { %v4384_v5 = vpop.f32.mrf.mxu0  ;;  %v5163_v9 = vpop.f32.mrf.mxu1 }
 0x864   :  { %4530 = vxpose.xlu0.b32.end [2/2] (short) (narrow) %v4384_v5, 8 }
 0x865   :  { %v5158_v23 = vpop.f32.mrf.mxu0  ;;  %v4431_v46 = vpop.f32.mrf.mxu1 }
 0x866   :  { %4562 = vxpose.xlu1.b32.end [2/2] (short) (narrow) %v4431_v46, 8 }
 0x867   :  { %v5164_v45 = vpop.f32.mrf.mxu1  ;;  %v4475_v50 = vpop.f32.mrf.mxu0 }
 0x868   :  { %4593 = vxpose.xlu0.b32.start [1/2] (short) (narrow) %v4475_v50, 8  ;;  %v5212_v50 = vld [vmem:[%s6070_s3 + $0x10] sm:$0xff]  }
 0x869   :  { %v5169_v21 = vpop.f32.mrf.mxu0  ;;  %v4522_v2 = vpop.f32.mrf.mxu1  ;;  %5180 = vmatpush3.bf16.msra.mxu0 %v5212_v50 }
 0x86a   :  { %4625 = vxpose.xlu1.b32.start [1/2] (short) (narrow) %v4522_v2, 8  ;;  %5181 = vmatprep.subr.bf16.mxu0 %v5254_v12 }
 0x86b   :  { %v4478_v11 = vpop.f32.mrf.mxu0  ;;  %v5175_v40 = vpop.f32.mrf.mxu1 }
 0x86c   :  { %4594 = vxpose.xlu0.b32.end [2/2] (short) (narrow) %v4478_v11, 8 }
 0x86d   :  { %v5170_v37 = vpop.f32.mrf.mxu0  ;;  %v4525_v30 = vpop.f32.mrf.mxu1  ;;  %5182 = vmatpush3.bf16.msra.mxu0 %v5213_v13 }
 0x86e   :  { %4626 = vxpose.xlu1.b32.end [2/2] (short) (narrow) %v4525_v30, 8  ;;  %5183 = vmatprep.subr.bf16.mxu0 %v5254_v12 }
 0x86f   :  { %v5176_v15 = vpop.f32.mrf.mxu1 }
 0x88c   :  { %2452 = vrot.lane.b32.xlu1 %v2445_v58, %s5262_s21 }
 0x895   :  { %2448 = vrot.lane.b32.xlu0 %v2444_v3, %s5263_s24 }
 0x899   :  { %2456 = vrot.lane.b32.xlu0 %v2446_v4, %s5264_s25 }
 0x8dc   :  { %v4545_v14 = vpop.trf.xlu0 }
 0x8de   :  { %v4577_v36 = vpop.trf.xlu1 }
 0x8e4   :  { %v4609_v51 = vpop.trf.xlu0 }
 0x8e5   :  { %v4657_v6 = vcombine.low %v4545_v14, %v4609_v51  ;;  %v4658_v22 = vcombine.high %v4545_v14, %v4609_v51 }
 0x8e6   :  { %v4641_v16 = vpop.trf.xlu1 }
 0x8e7   :  { %v4673_v56 = vcombine.low %v4577_v36, %v4641_v16  ;;  %v4674_v54 = vcombine.high %v4577_v36, %v4641_v16  ;;  %v4665_v35 = vrot.slane %v4657_v6, %v5368_v26  ;;  %v4672_v5 = vrot.slane %v4658_v22, %v5368_v26  ;;  %v5251_v36 = vld [vmem:[%s6068_s0] sm:$0xff] }
 0x8e9   :  { %v4681_v9 = vrot.slane %v4673_v56, %v5368_v26  ;;  %v4688_v42 = vrot.slane %v4674_v54, %v5368_v26  ;;  %v5252_v54 = vld [vmem:[%s6068_s0 + $0x8] sm:$0xff] }
 0x8eb   :  { %v4689_v1 = vcombine.low %v4665_v35, %v4681_v9  ;;  %v4690_v23 = vcombine.high %v4665_v35, %v4681_v9  ;;  %v4705_v46 = vcombine.low %v4672_v5, %v4688_v42  ;;  %v4706_v45 = vcombine.high %v4672_v5, %v4688_v42 }
 0x8ed   :  { %v4697_v17 = vrot.slane %v4689_v1, %v5375_v38  ;;  %v4704_v24 = vrot.slane %v4690_v23, %v5375_v38  ;;  %v4713_v53 = vrot.slane %v4705_v46, %v5375_v38  ;;  %v4720_v25 = vrot.slane %v4706_v45, %v5375_v38 }
 0x8ef   :  { %v4725_v21 = vcombine.low %v4697_v17, %v4704_v24  ;;  %v5030_v2 = vcombine.high %v4697_v17, %v4704_v24  ;;  %v4741_v11 = vcombine.low %v4713_v53, %v4720_v25  ;;  %v5031_v40 = vcombine.high %v4713_v53, %v4720_v25 }
 0x8f1   :  { %v4732_v0 = vrot.slane %v4725_v21, %v5368_v26  ;;  %v4740_v31 = vrot.slane %v5030_v2, %v5368_v26  ;;  %v4748_v33 = vrot.slane %v4741_v11, %v5368_v26  ;;  %v4756_v37 = vrot.slane %v5031_v40, %v5368_v26  ;;  %v5214_v26 = vld [vmem:[%s6070_s3] sm:$0xff]  }
 0x8f2   :  { %5184 = vmatpush3.bf16.msra.mxu0 %v5214_v26 }
 0x8f3   :  { %v4757_v30 = vcombine.low %v4732_v0, %v4740_v31  ;;  %v4773_v15 = vcombine.low %v4748_v33, %v4756_v37  ;;  %v4758_v47 = vcombine.high %v4732_v0, %v4740_v31  ;;  %v4774_v49 = vcombine.high %v4748_v33, %v4756_v37 }
 0x8f5   :  { %v4765_v18 = vrot.slane %v4757_v30, %v5375_v38  ;;  %v4781_v61 = vrot.slane %v4773_v15, %v5375_v38  ;;  %v4772_v27 = vrot.slane %v4758_v47, %v5375_v38  ;;  %v4788_v29 = vrot.slane %v4774_v49, %v5375_v38  ;;  %v5038_v47 = vld [vmem:[%s6072_s5] ss:$0 sm:$0xff] }
 0x8f7   :  { %v4790_v39 = vcombine.high %v4765_v18, %v4781_v61  ;;  %v4789_v19 = vcombine.low %v4765_v18, %v4781_v61  ;;  %v4791_v10 = vcombine.low %v4772_v27, %v4788_v29  ;;  %v4792_v7 = vcombine.high %v4772_v27, %v4788_v29  ;;  %v5039_v18 = vld [vmem:[%s6073_s6] ss:$0 sm:$0xff] }
 0x8f9   :  { %4794 = vrot.lane.b32.xlu1 %v4790_v39, %s5263_s24 }
 0x8fd   :  { %4798 = vrot.lane.b32.xlu1 %v4791_v10, %s5262_s21 }
 0x8fe   :  { %v2453_v41 = vpop.permute.xlu1 %2452 }
 0x901   :  { %4802 = vrot.lane.b32.xlu1 %v4792_v7, %s5264_s25 }
 0x907   :  { %v2449_v32 = vpop.permute.xlu0 %2448 }
 0x908   :  { %v2459_v20 = vsel %vm1105_vm2, %v2443_v57, %v2449_v32 }
 0x909   :  { %v2460_v59 = vsel %vm68_vm0, %v2459_v20, %v2453_v41 }
 0x90b   :  { %v2457_v34 = vpop.permute.xlu0 %2456 }
 0x90c   :  { %v2462_v44 = vsel %vm2461_vm4, %v2460_v59, %v2457_v34 }
 0x90d   :  { %vm4808_vm5 = vcmp.ne.f32.partialorder %v2462_v44, %v2462_v44 }
 0x90e   :  { %v4810_v55 = vsel %vm4808_vm5, 0.0, %v2462_v44 }
 0x96b   :  { %v4795_v38 = vpop.permute.xlu1 %4794 }
 0x96c   :  { %v4805_v52 = vsel %vm1105_vm2, %v4789_v19, %v4795_v38 }
 0x96f   :  { %v4799_v43 = vpop.permute.xlu1 %4798 }
 0x970   :  { %v4806_v48 = vsel %vm68_vm0, %v4805_v52, %v4799_v43 }
 0x973   :  { %v4803_v58 = vpop.permute.xlu1 %4802 }
 0x974   :  { %v4807_v60 = vsel %vm2461_vm4, %v4806_v48, %v4803_v58 }
 0x975   :  { %vm4809_vm6 = vcmp.ne.f32.partialorder %v4807_v60, %v4807_v60 }
 0x976   :  { %v4811_v28 = vsel %vm4809_vm6, 0.0, %v4807_v60 }
 0x977   :  { %v4812_v62 = vpack.c.bf16 %v4811_v28, %v4810_v55 }
 0x979   :  { %5186 = vmatmul.mubr.msk.bf16.vlgmr.msra.gmra.mxu0 %vm4852_vm7, %v4812_v62 }
 0xa39   :  { %v4890_v3 = vpop.f32.mrf.mxu0 }
 0xa3a   :  { %v4891_v4 = vadd.f32 %v5032_v63, %v4890_v3 }
 0xa3b   :  { %v5187_v14 = vpop.f32.mrf.mxu0 }
 0xa3c   :  { %v4897_v51 = vadd.f32 %v5251_v36, %v4891_v4 }
 0xa3d   :  { %v4893_v6 = vpop.f32.mrf.mxu0 }
 0xa3e   :  { %v4894_v22 = vadd.f32 %v5032_v63, %v4893_v6  ;;  %v4899_v16 = vsel %vm68_vm0, %v4897_v51, 0.0  ;;  %vm4964_vm9 = vcmp.ne.f32.partialorder %v4897_v51, %v4897_v51  ;;  %v4983_v63 = vand.u32 127, %v38_v8 }
 0xa3f   :  { %4900 = vadd.xlane.f32.xlu0 %v4899_v16  ;;  %v5188_v56 = vpop.f32.mrf.mxu0  ;;  %v5042_v25 = vsel %vm4964_vm9, 1.0, %v5254_v12 }
 0xa40   :  { %v4898_v35 = vadd.f32 %v5252_v54, %v4894_v22  ;;  %v4970_v11 = vsel %vm68_vm0, %v5042_v25, -inf  ;;  %vm4985_vm12 = vcmp.eq.s32.totalorder %v4983_v63, 1  ;;  %vm4984_vm13 = vcmp.eq.s32.totalorder %v4983_v63, 0 }
 0xa42   :  { %v4902_v5 = vsel %vm68_vm0, %v4898_v35, 0.0  ;;  %vm4965_vm8 = vcmp.ne.f32.partialorder %v4898_v35, %v4898_v35 }
 0xa43   :  { %4903 = vadd.xlane.f32.xlu1 %v4902_v5  ;;  %v5043_v24 = vsel %vm4965_vm8, 1.0, %v5254_v12 }
 0xa44   :  { %v4971_v2 = vsel %vm68_vm0, %v5043_v24, -inf }
 0xa45   :  { %v4972_v40 = vmax.f32 %v4970_v11, %v4971_v2 }
 0xac8   :  { %v4901_v9 = vpop.xlane.xlu0 %4900 }
 0xac9   :  { %v4906_v42 = vmul.f32 0.03125, %v4901_v9 }
 0xacb   :  { %v4908_v1 = vsub.f32 %v4897_v51, %v4906_v42 }
 0xacc   :  { %v4904_v23 = vpop.xlane.xlu1 %4903 }
 0xacd   :  { %v4907_v46 = vmul.f32 0.03125, %v4904_v23  ;;  %v4910_v45 = vmul.f32 %v4908_v1, %v4908_v1 }
 0xacf   :  { %v4909_v50 = vsub.f32 %v4898_v35, %v4907_v46  ;;  %v4912_v17 = vsel %vm68_vm0, %v4910_v45, 0.0 }
 0xad0   :  { %4913 = vadd.xlane.f32.xlu0 %v4912_v17 }
 0xad1   :  { %v4911_v53 = vmul.f32 %v4909_v50, %v4909_v50 }
 0xad3   :  { %v4915_v21 = vsel %vm68_vm0, %v4911_v53, 0.0 }
 0xad4   :  { %4916 = vadd.xlane.f32.xlu0 %v4915_v21 }
 0xad8   :  { %4973 = vmax.xlane.f32.xlu0 %v4972_v40 }
 0xb59   :  { %v4914_v13 = vpop.xlane.xlu0 %4913 }
 0xb5a   :  { %v4918_v0 = vmul.f32 0.03125, %v4914_v13 }
 0xb5c   :  { %v4920_v31 = vadd.f32 1e-05, %v4918_v0 }
 0xb5d   :  { %v4917_v33 = vpop.xlane.xlu0 %4916 }
 0xb5e   :  { %5247 = vrsqrt.f32 %v4920_v31  ;;  %v4919_v37 = vmul.f32 0.03125, %v4917_v33 }
 0xb60   :  { %v4921_v30 = vadd.f32 1e-05, %v4919_v37 }
 0xb61   :  { %v4974_v38 = vpop.xlane.xlu0 %4973 }
 0xb62   :  { %5249 = vrsqrt.f32 %v4921_v30  ;;  %v4975_v20 = vrot.slane %v4974_v38, 4 }
 0xb64   :  { %v4976_v34 = vmax.f32 %v4974_v38, %v4975_v20 }
 0xb66   :  { %v4977_v59 = vrot.slane %v4976_v34, 2 }
 0xb68   :  { %v4978_v48 = vmax.f32 %v4976_v34, %v4977_v59 }
 0xb6a   :  { %v4979_v55 = vrot.slane %v4978_v48, 1 }
 0xb6b   :  { %v5248_v15 = vpop.eup %5247 }
 0xb6c   :  { %v4924_v49 = vmul.f32 %v5248_v15, %v4908_v1 }
 0xb6e   :  { %v4933_v61 = vmul.f32 %v5038_v47, %v4924_v49 }
 0xb6f   :  { %v5250_v39 = vpop.eup %5249 }
 0xb70   :  { %v4925_v27 = vmul.f32 %v5250_v39, %v4909_v50  ;;  %v4942_v29 = vadd.f32 %v5039_v18, %v4933_v61 }
 0xb72   :  { %v4934_v19 = vmul.f32 %v5038_v47, %v4925_v27  ;;  %4944 = vst.msk [vmem:[%s6074_s7] sm:$0xff] %vm68_vm0, %v4942_v29  ;;  %vm4946_vm10 = vcmp.ne.f32.partialorder %v4942_v29, %v4942_v29 }
 0xb73   :  { %v5040_v10 = vsel %vm4946_vm10, 1.0, %v5254_v12 }
 0xb74   :  { %v4943_v26 = vadd.f32 %v5039_v18, %v4934_v19  ;;  %v4952_v32 = vsel %vm68_vm0, %v5040_v10, -inf }
 0xb76   :  { %vm4947_vm11 = vcmp.ne.f32.partialorder %v4943_v26, %v4943_v26  ;;  %4945 = vst.msk [vmem:[%s6074_s7 + $0x8] sm:$0xff] %vm68_vm0, %v4943_v26 }
 0xb77   :  { %v5041_v7 = vsel %vm4947_vm11, 1.0, %v5254_v12  ;;  %v4980_v12 = vmax.f32 %v4978_v48, %v4979_v55 }
 0xb78   :  { %v4953_v41 = vsel %vm68_vm0, %v5041_v7, -inf }
 0xb79   :  { %v4954_v57 = vmax.f32 %v4952_v32, %v4953_v41 }
 0xb7b   :  { %4955 = vmax.xlane.f32.xlu1 %v4954_v57 }
 0xc04   :  { %v4956_v43 = vpop.xlane.xlu1 %4955 }
 0xc05   :  { %v4957_v44 = vrot.slane %v4956_v43, 4 }
 0xc07   :  { %v4958_v52 = vmax.f32 %v4956_v43, %v4957_v44 }
 0xc09   :  { %v4959_v58 = vrot.slane %v4958_v52, 2 }
 0xc0b   :  { %v4960_v60 = vmax.f32 %v4958_v52, %v4959_v58 }
 0xc0d   :  { %v4961_v28 = vrot.slane %v4960_v60, 1 }
 0xc0f   :  { %v4962_v62 = vmax.f32 %v4960_v60, %v4961_v28 }
 0xc11   :  { %5189 = vpush %v4962_v62 }
 0xc12   :  { %5191 = vpush %v4980_v12 }
 0xc42   :  { %s5190_s6 = spop %5189 }
 0xc43   :  { %v4988_v3 = vstv %s5190_s6  ;;  %s5192_s7 = spop %5191 }
 0xc44   :  { %v4986_v4 = vstv %s5192_s7 }
 0xc45   :  { %v4987_v14 = vsel %vm4985_vm12, %v4986_v4, 0.0 }
 0xc46   :  { %v4989_v36 = vsel %vm4984_vm13, %v4988_v3, %v4987_v14 }
 0xc47   :  { %4990 = vst [vmem:[%s6075_s8] sm:$0x1] %v4989_v36 }

// kernel: branch_1_fun.1
= control target key start
LH: loop header
LB: loop body
LE: loop exit
PB: predicated region body
PF: predicated region fallthrough
CT: control target
= control target key end

     0   :  { %14 = vsyncpa [#allocation3], 0  ;;  %v5325_v2 = vmov 0   ;;  %s6140_s0 = inlined_call_operand.vmem [shape: f32[16,32], index: 0, kind: input, shape index: {}]   ;;  %s6141_s1 = inlined_call_operand.vmem [shape: bf16[32,192], index: 1, kind: input, shape index: {}]   ;;  %s6142_s2 = inlined_call_operand.vmem [shape: f32[1,192], index: 2, kind: input, shape index: {}]   ;;  %s6143_s3 = inlined_call_operand.vmem [shape: bf16[64,32], index: 3, kind: input, shape index: {}]   ;;  %s6144_s4 = inlined_call_operand.vmem [shape: f32[1,32], index: 4, kind: input, shape index: {}]   ;;  %s6145_s5 = inlined_call_operand.vmem [shape: f32[1,32], index: 5, kind: input, shape index: {}]   ;;  %s6146_s6 = inlined_call_operand.vmem [shape: f32[1,32], index: 6, kind: input, shape index: {}]   ;;  %s6147_s7 = inlined_call_operand.hbm [shape: f32[16,32], index: 7, kind: output, shape index: {0}]   ;;  %s6148_s8 = inlined_call_operand.hbm [shape: f32[1,128], index: 8, kind: output, shape index: {1}]  }
   0x1   :  { %v5233_v0 = vld [vmem:[%s6141_s1 + $0x14] ss:$8 sps:$4 sm:$0xff]   ;;  %v5235_v1 = vld [vmem:[%s6141_s1 + $0x10] ss:$8 sps:$4 sm:$0xff]   ;;  %106 = vmatprep.mubr.bf16.mxu0 %v5325_v2  ;;  %v5236_v3 = vld [vmem:[%s6141_s1 + $0x4] ss:$8 sps:$4 sm:$0xff]  }
   0x2   :  { %86 = vmatprep.subr.bf16.mxu0 %v5233_v0  ;;  %v5238_v4 = vld [vmem:[%s6141_s1] ss:$8 sps:$4 sm:$0xff]  }
   0x3   :  { %87 = vmatpush1.bf16.msra.mxu0 %v5235_v1  ;;  %v31_v5 = vld [vmem:[%s6140_s0] sm:$0xff]  ;;  %v32_v6 = vld [vmem:[%s6140_s0 + $0x8] sm:$0xff] }
   0x4   :  { %88 = vmatprep.subr.bf16.mxu0 %v5236_v3  ;;  %v33_v7 = vpack.c.bf16 %v32_v6, %v31_v5 }
   0x5   :  { %15 = vsyncpa [#allocation5], 0  ;;  %vm70_vm0 = vcmask 261120   ;;  %v40_v8 = vlaneseq  ;;  %v5413_v11 = vld [vmem:[%s6142_s2] sm:$0x3]  ;;  %v5326_v12 = vmov 0.0  }
   0x6   :  { %5105 = vmatprep.subr.bf16.mxu1 %v5326_v12  ;;  %s5327_s18 = smov 80   ;;  %s5328_s19 = smov 112   ;;  %v5331_v19 = vmov 1983009808   ;;  %v5332_v22 = vmov 1934713408  }
   0x7   :  { %89 = vmatpush1.bf16.msra.mxu0 %v5238_v4  ;;  %v5407_v9 = vshrl.u32 %v40_v8, 7  ;;  %s5329_s2 = smov 64   ;;  %s5330_s20 = smov 96   ;;  %v130_v20 = vunpack.c.l.s4 %v5331_v19  ;;  %v162_v23 = vunpack.c.l.s4 %v5332_v22  ;;  %vm5333_vm1 = vmmov 0  }
   0x8   :  { %5129 = vmatprep.subr.bf16.mxu0 %v5326_v12  ;;  %5107 = vmatprep.mubr.msk.bf16.mxu1 %vm5333_vm1, %v5326_v12  ;;  %vm1107_vm2 = vcmask 130048   ;;  %vm1284_vm3 = vcmask 64512   ;;  %s5334_s21 = smov 32   ;;  %s5335_s24 = smov 16   ;;  %vm2463_vm4 = vcmask 392192   ;;  %vm4854_vm7 = vcmask 523264  }
   0x9   :  { %v42_v10 = vsub.s32 0, %v5407_v9  ;;  %v131_v21 = vunpack.c.0.s8 %v130_v20  ;;  %v163_v27 = vunpack.c.0.s8 %v162_v23  ;;  %s5336_s25 = smov 48  }
   0xa   :  { %5027 = vmatmul.mubr.msk.bf16.vlgmr.msra.gmra.mxu0 %vm70_vm0, %v33_v7 }
   0xb   :  { %v5418_v13 = vrot.slane %v5413_v11, %v42_v10  ;;  %v5444_v26 = vsub.s32 %v131_v21, %v5407_v9  ;;  %v5451_v38 = vsub.s32 %v163_v27, %v5407_v9  ;;  %5131 = vmatprep.mubr.msk.bf16.mxu0 %vm5333_vm1, %v5326_v12 }
  0xca   :  { %v108_v14 = vpop.f32.mrf.mxu0 }
  0xcb   :  { %v5421_v15 = vadd.f32 %v108_v14, %v5418_v13 }
  0xcd   :  { %124 = vrot.lane.b32.xlu1 %v5421_v15, %s5327_s18  ;;  %118 = vrot.lane.b32.xlu0 %v5421_v15, %s5328_s19 }
  0xd1   :  { %203 = vrot.lane.b32.xlu1 %v5421_v15, %s5329_s2  ;;  %121 = vrot.lane.b32.xlu0 %v5421_v15, %s5330_s20 }
 0x13f   :  { %v5431_v16 = vpop.permute.xlu0 %118  ;;  %v5435_v17 = vpop.permute.xlu1 %124 }
 0x140   :  { %205 = vrot.lane.b32.xlu0 %v5431_v16, %s5329_s2 }
 0x143   :  { %v5437_v18 = vpop.permute.xlu0 %121  ;;  %v204_v24 = vpop.permute.xlu1 %203 }
 0x144   :  { %209 = vrot.lane.b32.xlu0 %v5435_v17, %s5329_s2  ;;  %207 = vrot.lane.b32.xlu1 %v5437_v18, %s5329_s2 }
 0x1b2   :  { %v206_v25 = vpop.permute.xlu0 %205 }
 0x1b6   :  { %v208_v28 = vpop.permute.xlu1 %207  ;;  %v210_v29 = vpop.permute.xlu0 %209 }
 0x1b7   :  { %v215_v30 = vcombine.low %v204_v24, %v208_v28  ;;  %v216_v31 = vcombine.high %v204_v24, %v208_v28  ;;  %v231_v32 = vcombine.low %v206_v25, %v210_v29  ;;  %v232_v33 = vcombine.high %v206_v25, %v210_v29 }
 0x1b9   :  { %v223_v34 = vrot.slane %v215_v30, %v5444_v26  ;;  %v230_v35 = vrot.slane %v216_v31, %v5444_v26  ;;  %v239_v36 = vrot.slane %v231_v32, %v5444_v26  ;;  %v246_v37 = vrot.slane %v232_v33, %v5444_v26 }
 0x1bb   :  { %v248_v39 = vcombine.high %v223_v34, %v239_v36  ;;  %v247_v40 = vcombine.low %v223_v34, %v239_v36  ;;  %v263_v41 = vcombine.low %v230_v35, %v246_v37  ;;  %v264_v44 = vcombine.high %v230_v35, %v246_v37 }
 0x1bd   :  { %v262_v42 = vrot.slane %v248_v39, %v5451_v38  ;;  %v255_v43 = vrot.slane %v247_v40, %v5451_v38  ;;  %v271_v47 = vrot.slane %v263_v41, %v5451_v38  ;;  %v278_v49 = vrot.slane %v264_v44, %v5451_v38 }
 0x1bf   :  { %v285_v45 = vpack.c.bf16 %v262_v42, %v262_v42  ;;  %v283_v46 = vpack.c.bf16 %v255_v43, %v255_v43  ;;  %v280_v48 = vcombine.high %v262_v42, %v5326_v12  ;;  %v287_v50 = vpack.c.bf16 %v271_v47, %v271_v47 }
 0x1c0   :  { %v281_v52 = vcombine.high %v271_v47, %v5326_v12  ;;  %v279_v53 = vcombine.high %v255_v43, %v5326_v12  ;;  %v282_v56 = vcombine.high %v278_v49, %v5326_v12  ;;  %v289_v58 = vpack.c.bf16 %v278_v49, %v278_v49 }
 0x1c1   :  { %471 = vxpose.xlu0.c.b16.start.end [1/1] (short) (narrow) %v285_v45, 16  ;;  %439 = vxpose.xlu1.c.b16.start.end [1/1] (short) (narrow) %v283_v46, 16  ;;  %v286_v51 = vpack.c.bf16 %v280_v48, %v280_v48 }
 0x1c2   :  { %v288_v54 = vpack.c.bf16 %v281_v52, %v281_v52  ;;  %v284_v55 = vpack.c.bf16 %v279_v53, %v279_v53  ;;  %v290_v57 = vpack.c.bf16 %v282_v56, %v282_v56 }
 0x1c5   :  { %503 = vxpose.xlu0.c.b16.start.end [1/1] (short) (narrow) %v287_v50, 16  ;;  %487 = vxpose.xlu1.c.b16.start.end [1/1] (short) (narrow) %v286_v51, 16 }
 0x1c9   :  { %519 = vxpose.xlu1.c.b16.start.end [1/1] (short) (narrow) %v288_v54, 16  ;;  %455 = vxpose.xlu0.c.b16.start.end [1/1] (short) (narrow) %v284_v55, 16 }
 0x1cd   :  { %551 = vxpose.xlu1.c.b16.start.end [1/1] (short) (narrow) %v290_v57, 16  ;;  %535 = vxpose.xlu0.c.b16.start.end [1/1] (short) (narrow) %v289_v58, 16 }
 0x223   :  { %v479_v59 = vpop.trf.xlu0  ;;  %v447_v60 = vpop.trf.xlu1 }
 0x224   :  { %v571_v63 = vshrl.u32 %v447_v60, 16  ;;  %v579_v20 = vshrl.u32 %v479_v59, 16 }
 0x227   :  { %v511_v61 = vpop.trf.xlu0  ;;  %v495_v62 = vpop.trf.xlu1 }
 0x228   :  { %v587_v0 = vshrl.u32 %v511_v61, 16  ;;  %v580_v10 = vshrl.u32 %v495_v62, 16  ;;  %v577_v21 = vpack.i.b16 %v495_v62, %v479_v59 }
 0x22a   :  { %v581_v29 = vpack.i.b16 %v580_v10, %v579_v20 }
 0x22b   :  { %v527_v1 = vpop.trf.xlu1  ;;  %v463_v3 = vpop.trf.xlu0 }
 0x22c   :  { %v585_v4 = vpack.i.b16 %v527_v1, %v511_v61  ;;  %v588_v5 = vshrl.u32 %v527_v1, 16  ;;  %v569_v6 = vpack.i.b16 %v463_v3, %v447_v60  ;;  %v572_v7 = vshrl.u32 %v463_v3, 16 }
 0x22e   :  { %v589_v14 = vpack.i.b16 %v588_v5, %v587_v0  ;;  %v573_v19 = vpack.i.b16 %v572_v7, %v571_v63  ;;  %v599_v24 = vcombine.low %v569_v6, %v585_v4  ;;  %v600_v37 = vcombine.high %v569_v6, %v585_v4  ;;  %v110_v6 = vpop.f32.mrf.mxu0 }
 0x22f   :  { %v559_v22 = vpop.trf.xlu1  ;;  %v543_v23 = vpop.trf.xlu0 }
 0x230   :  { %v596_v25 = vshrl.u32 %v559_v22, 16  ;;  %v593_v27 = vpack.i.b16 %v559_v22, %v543_v23  ;;  %v595_v28 = vshrl.u32 %v543_v23, 16  ;;  %v667_v32 = vcombine.low %v573_v19, %v589_v14 }
 0x231   :  { %v607_v34 = vrot.slane %v599_v24, %v5444_v26  ;;  %v668_v43 = vcombine.high %v573_v19, %v589_v14  ;;  %v614_v50 = vrot.slane %v600_v37, %v5444_v26  ;;  %v112_v14 = vpop.f32.mrf.mxu0  ;;  %v46_v19 = vsub.s32 1, %v5407_v9 }
 0x232   :  { %v597_v30 = vpack.i.b16 %v596_v25, %v595_v28  ;;  %v615_v31 = vcombine.low %v577_v21, %v593_v27  ;;  %v616_v33 = vcombine.high %v577_v21, %v593_v27  ;;  %v675_v40 = vrot.slane %v667_v32, %v5444_v26 }
 0x233   :  { %v682_v54 = vrot.slane %v668_v43, %v5444_v26  ;;  %v5491_v20 = vadd.f32 %v112_v14, %v5418_v13  ;;  %v5496_v21 = vrot.slane %v5413_v11, %v46_v19  ;;  %v127_v24 = vcombine.low %v5421_v15, %v5437_v18 }
 0x234   :  { %v623_v35 = vrot.slane %v615_v31, %v5444_v26  ;;  %v683_v36 = vcombine.low %v581_v29, %v597_v30  ;;  %v684_v42 = vcombine.high %v581_v29, %v597_v30  ;;  %v630_v47 = vrot.slane %v616_v33, %v5444_v26 }
 0x235   :  { %v5503_v22 = vadd.f32 %v110_v6, %v5496_v21  ;;  %v128_v25 = vcombine.high %v5421_v15, %v5437_v18  ;;  %v143_v28 = vcombine.low %v5431_v16, %v5435_v17  ;;  %v144_v29 = vcombine.high %v5431_v16, %v5435_v17 }
 0x236   :  { %v631_v39 = vcombine.low %v607_v34, %v623_v35  ;;  %v691_v41 = vrot.slane %v683_v36, %v5444_v26  ;;  %v632_v46 = vcombine.high %v607_v34, %v623_v35  ;;  %v698_v51 = vrot.slane %v684_v42, %v5444_v26 }
 0x237   :  { %v647_v53 = vcombine.low %v614_v50, %v630_v47  ;;  %v648_v58 = vcombine.high %v614_v50, %v630_v47  ;;  %v135_v31 = vrot.slane %v127_v24, %v5444_v26  ;;  %v142_v32 = vrot.slane %v128_v25, %v5444_v26 }
 0x238   :  { %v639_v44 = vrot.slane %v631_v39, %v5451_v38  ;;  %v699_v45 = vcombine.low %v675_v40, %v691_v41  ;;  %v700_v49 = vcombine.high %v675_v40, %v691_v41  ;;  %v646_v52 = vrot.slane %v632_v46, %v5451_v38 }
 0x239   :  { %v715_v56 = vcombine.low %v682_v54, %v698_v51  ;;  %v655_v57 = vrot.slane %v647_v53, %v5451_v38  ;;  %v716_v60 = vcombine.high %v682_v54, %v698_v51  ;;  %v662_v61 = vrot.slane %v648_v58, %v5451_v38 }
 0x23a   :  { %735 = vxpose.xlu0.c.b16.start.end [1/1] (short) (narrow) %v639_v44, 16  ;;  %v707_v48 = vrot.slane %v699_v45, %v5451_v38  ;;  %v714_v55 = vrot.slane %v700_v49, %v5451_v38  ;;  %v663_v63 = vcombine.high %v639_v44, %v5325_v2  ;;  %v664_v1 = vcombine.high %v646_v52, %v5325_v2 }
 0x23b   :  { %v723_v59 = vrot.slane %v715_v56, %v5451_v38  ;;  %v730_v62 = vrot.slane %v716_v60, %v5451_v38  ;;  %v665_v4 = vcombine.high %v655_v57, %v5325_v2  ;;  %v666_v7 = vcombine.high %v662_v61, %v5325_v2 }
 0x23c   :  { %751 = vxpose.xlu1.c.b16.start.end [1/1] (short) (narrow) %v707_v48, 16  ;;  %v731_v0 = vcombine.high %v707_v48, %v5325_v2  ;;  %v732_v3 = vcombine.high %v714_v55, %v5325_v2  ;;  %v151_v34 = vrot.slane %v143_v28, %v5444_v26  ;;  %v158_v35 = vrot.slane %v144_v29, %v5444_v26 }
 0x23d   :  { %v733_v5 = vcombine.high %v723_v59, %v5325_v2  ;;  %v734_v10 = vcombine.high %v730_v62, %v5325_v2 }
 0x23e   :  { %799 = vxpose.xlu0.c.b16.start.end [1/1] (short) (narrow) %v646_v52, 16  ;;  %v159_v37 = vcombine.low %v135_v31, %v151_v34  ;;  %v160_v15 = vcombine.high %v135_v31, %v151_v34  ;;  %v175_v18 = vcombine.low %v142_v32, %v158_v35  ;;  %v176_v39 = vcombine.high %v142_v32, %v158_v35 }
 0x240   :  { %815 = vxpose.xlu1.c.b16.start.end [1/1] (short) (narrow) %v714_v55, 16  ;;  %v167_v42 = vrot.slane %v159_v37, %v5451_v38  ;;  %v174_v16 = vrot.slane %v160_v15, %v5451_v38  ;;  %v183_v17 = vrot.slane %v175_v18, %v5451_v38  ;;  %v190_v43 = vrot.slane %v176_v39, %v5451_v38 }
 0x242   :  { %863 = vxpose.xlu0.c.b16.start.end [1/1] (short) (narrow) %v655_v57, 16  ;;  %v191_v46 = vcombine.high %v167_v42, %v5326_v12  ;;  %v192_v47 = vcombine.high %v174_v16, %v5326_v12  ;;  %v193_v48 = vcombine.high %v183_v17, %v5326_v12  ;;  %v194_v49 = vcombine.high %v190_v43, %v5326_v12 }
 0x244   :  { %879 = vxpose.xlu1.c.b16.start.end [1/1] (short) (narrow) %v723_v59, 16  ;;  %v5030_v58 = vpack.c.bf16 %v193_v48, %v191_v46  ;;  %v5031_v59 = vpack.c.bf16 %v194_v49, %v192_v47 }
 0x246   :  { %927 = vxpose.xlu0.c.b16.start.end [1/1] (short) (narrow) %v662_v61, 16  ;;  %v409_v19 = vrot.slane %v5030_v58, %v5444_v26 }
 0x248   :  { %943 = vxpose.xlu1.c.b16.start.end [1/1] (short) (narrow) %v730_v62, 16 }
 0x24a   :  { %767 = vxpose.xlu0.c.b16.start.end [1/1] (short) (narrow) %v663_v63, 16 }
 0x24c   :  { %783 = vxpose.xlu1.c.b16.start.end [1/1] (short) (narrow) %v731_v0, 16 }
 0x24e   :  { %831 = vxpose.xlu0.c.b16.start.end [1/1] (short) (narrow) %v664_v1, 16 }
 0x250   :  { %847 = vxpose.xlu1.c.b16.start.end [1/1] (short) (narrow) %v732_v3, 16 }
 0x252   :  { %895 = vxpose.xlu0.c.b16.start.end [1/1] (short) (narrow) %v665_v4, 16  ;;  %v5028_v4 = vpack.c.bf16 %v183_v17, %v167_v42 }
 0x254   :  { %911 = vxpose.xlu1.c.b16.start.end [1/1] (short) (narrow) %v733_v5, 16  ;;  %v5029_v5 = vpack.c.bf16 %v190_v43, %v174_v16  ;;  %v384_v25 = vrot.slane %v5028_v4, %v5444_v26 }
 0x256   :  { %959 = vxpose.xlu0.c.b16.start.end [1/1] (short) (narrow) %v666_v7, 16 }
 0x258   :  { %975 = vxpose.xlu1.c.b16.start.end [1/1] (short) (narrow) %v734_v10, 16 }
 0x25c   :  { %2469 = vrot.lane.b32.xlu1 %v5491_v20, %s5330_s20 }
 0x25f   :  { %2466 = vrot.lane.b32.xlu0 %v5491_v20, %s5328_s19 }
 0x260   :  { %2472 = vrot.lane.b32.xlu1 %v5491_v20, %s5327_s18 }
 0x263   :  { %295 = vrot.lane.b32.xlu0 %v5503_v22, %s5330_s20 }
 0x264   :  { %292 = vrot.lane.b32.xlu1 %v5503_v22, %s5328_s19 }
 0x268   :  { %298 = vrot.lane.b32.xlu1 %v5503_v22, %s5327_s18 }
 0x26c   :  { %2551 = vrot.lane.b32.xlu1 %v5491_v20, %s5329_s2 }
 0x29c   :  { %v743_v9 = vpop.trf.xlu0 }
 0x29e   :  { %v759_v11 = vpop.trf.xlu1 }
 0x2a0   :  { %v807_v13 = vpop.trf.xlu0 }
 0x2a1   :  { %v991_v50 = vcombine.low %v743_v9, %v807_v13  ;;  %v417_v9 = vrot.slane %v5031_v59, %v5444_v26 }
 0x2a2   :  { %v823_v23 = vpop.trf.xlu1 }
 0x2a3   :  { %v1041_v51 = vcombine.low %v759_v11, %v823_v23  ;;  %v998_v60 = vrot.slane %v991_v50, %v5444_v26 }
 0x2a4   :  { %v871_v27 = vpop.trf.xlu0 }
 0x2a5   :  { %v1048_v61 = vrot.slane %v1041_v51, %v5444_v26 }
 0x2a6   :  { %v887_v30 = vpop.trf.xlu1 }
 0x2a8   :  { %v935_v33 = vpop.trf.xlu0 }
 0x2a9   :  { %v1007_v53 = vcombine.low %v871_v27, %v935_v33  ;;  %v392_v27 = vrot.slane %v5029_v5, %v5444_v26 }
 0x2aa   :  { %v951_v36 = vpop.trf.xlu1 }
 0x2ab   :  { %v1057_v57 = vcombine.low %v887_v30, %v951_v36  ;;  %v1014_v63 = vrot.slane %v1007_v53, %v5444_v26  ;;  %v418_v30 = vcombine.low %v409_v19, %v417_v9  ;;  %v393_v34 = vcombine.low %v384_v25, %v392_v27 }
 0x2ac   :  { %v775_v40 = vpop.trf.xlu0 }
 0x2ad   :  { %v1064_v7 = vrot.slane %v1057_v57, %v5444_v26  ;;  %v425_v37 = vrot.slane %v418_v30, %v5451_v38  ;;  %v400_v39 = vrot.slane %v393_v34, %v5451_v38 }
 0x2ae   :  { %v791_v41 = vpop.trf.xlu1 }
 0x2af   :  { %v431_v16 = vshrl.u32 %v425_v37, 16  ;;  %v426_v50 = vcombine.high %v425_v37, %v5325_v2  ;;  %v401_v53 = vcombine.high %v400_v39, %v5325_v2 }
 0x2b0   :  { %v839_v44 = vpop.trf.xlu0 }
 0x2b1   :  { %v999_v54 = vcombine.low %v775_v40, %v839_v44  ;;  %v430_v44 = vshrl.u32 %v400_v39, 16  ;;  %v437_v58 = vshrl.u32 %v426_v50, 16 }
 0x2b2   :  { %v855_v45 = vpop.trf.xlu1 }
 0x2b3   :  { %v1049_v55 = vcombine.low %v791_v41, %v855_v45  ;;  %v1006_v0 = vrot.slane %v999_v54, %v5444_v26  ;;  %v429_v41 = vpack.i.b16 %v425_v37, %v400_v39  ;;  %v432_v46 = vpack.i.b16 %v431_v16, %v430_v44 }
 0x2b4   :  { %v903_v52 = vpop.trf.xlu0 }
 0x2b5   :  { %v1056_v1 = vrot.slane %v1049_v55, %v5444_v26  ;;  %v1023_v11 = vcombine.low %v998_v60, %v1006_v0  ;;  %v435_v55 = vpack.i.b16 %v426_v50, %v401_v53 }
 0x2b6   :  { %v919_v56 = vpop.trf.xlu1 }
 0x2b7   :  { %v1073_v13 = vcombine.low %v1048_v61, %v1056_v1  ;;  %v1030_v31 = vrot.slane %v1023_v11, %v5451_v38  ;;  %v436_v61 = vshrl.u32 %v401_v53, 16 }
 0x2b8   :  { %v967_v62 = vpop.trf.xlu0 }
 0x2b9   :  { %v1015_v3 = vcombine.low %v903_v52, %v967_v62  ;;  %v1080_v32 = vrot.slane %v1073_v13, %v5451_v38 }
 0x2ba   :  { %v983_v6 = vpop.trf.xlu1 }
 0x2bb   :  { %v1022_v10 = vrot.slane %v1015_v3, %v5444_v26  ;;  %v1065_v14 = vcombine.low %v919_v56, %v983_v6 }
 0x2bd   :  { %v1031_v23 = vcombine.low %v1014_v63, %v1022_v10  ;;  %v1072_v24 = vrot.slane %v1065_v14, %v5444_v26  ;;  %v438_v63 = vpack.i.b16 %v437_v58, %v436_v61 }
 0x2bf   :  { %v1081_v28 = vcombine.low %v1064_v7, %v1072_v24  ;;  %v1038_v29 = vrot.slane %v1031_v23, %v5451_v38 }
 0x2c1   :  { %v1088_v33 = vrot.slane %v1081_v28, %v5451_v38  ;;  %v1039_v35 = vcombine.low %v1030_v31, %v1038_v29  ;;  %v1040_v45 = vcombine.high %v1030_v31, %v1038_v29 }
 0x2c3   :  { %v1089_v36 = vcombine.low %v1080_v32, %v1088_v33  ;;  %v1095_v40 = vshrl.u32 %v1039_v35, 16  ;;  %v1090_v17 = vcombine.high %v1080_v32, %v1088_v33  ;;  %v1103_v54 = vshrl.u32 %v1040_v45, 16 }
 0x2c5   :  { %v1093_v15 = vpack.i.b16 %v1089_v36, %v1039_v35  ;;  %v1096_v18 = vshrl.u32 %v1089_v36, 16  ;;  %v1101_v48 = vpack.i.b16 %v1090_v17, %v1040_v45  ;;  %v1104_v51 = vshrl.u32 %v1090_v17, 16 }
 0x2c7   :  { %5106 = vmatpush3.bf16.msra.mxu1 %v1093_v15  ;;  %v1097_v42 = vpack.i.b16 %v1096_v18, %v1095_v40  ;;  %v1105_v56 = vpack.i.b16 %v1104_v51, %v1103_v54 }
 0x2c8   :  { %5111 = vmatprep.subr.bf16.mxu1 %v5326_v12 }
 0x2ca   :  { %5108 = vmatmul.mubr.msk.bf16.vlgmr.msra.gmra.mxu1 %vm1107_vm2, %v429_v41 }
 0x2cb   :  { %5112 = vmatpush3.bf16.msra.mxu1 %v1097_v42  ;;  %5113 = vmatprep.mubr.msk.bf16.mxu1 %vm5333_vm1, %v5326_v12 }
 0x2cc   :  { %5117 = vmatprep.subr.bf16.mxu1 %v5326_v12 }
 0x2ce   :  { %v5556_v43 = vpop.permute.xlu1 %2469 }
 0x2cf   :  { %2555 = vrot.lane.b32.xlu1 %v5556_v43, %s5329_s2 }
 0x2d1   :  { %v5560_v47 = vpop.permute.xlu0 %2466 }
 0x2d2   :  { %v5562_v49 = vpop.permute.xlu1 %2472  ;;  %5114 = vmatmul.mubr.msk.bf16.vlgmr.msra.gmra.mxu1 %vm1107_vm2, %v432_v46  ;;  %2553 = vrot.lane.b32.xlu0 %v5560_v47, %s5329_s2 }
 0x2d3   :  { %5118 = vmatpush3.bf16.msra.mxu1 %v1101_v48  ;;  %5119 = vmatprep.mubr.msk.bf16.mxu1 %vm5333_vm1, %v5326_v12 }
 0x2d4   :  { %5123 = vmatprep.subr.bf16.mxu1 %v5326_v12 }
 0x2d5   :  { %v296_v59 = vpop.permute.xlu0 %295 }
 0x2d6   :  { %v293_v52 = vpop.permute.xlu1 %292  ;;  %2557 = vrot.lane.b32.xlu0 %v5562_v49, %s5329_s2  ;;  %v301_v62 = vcombine.low %v5503_v22, %v296_v59  ;;  %v302_v4 = vcombine.high %v5503_v22, %v296_v59 }
 0x2d8   :  { %v309_v1 = vrot.slane %v301_v62, %v5444_v26  ;;  %v316_v10 = vrot.slane %v302_v4, %v5444_v26 }
 0x2da   :  { %5120 = vmatmul.mubr.msk.bf16.vlgmr.msra.gmra.mxu1 %vm1107_vm2, %v435_v55  ;;  %v299_v57 = vpop.permute.xlu1 %298 }
 0x2db   :  { %5124 = vmatpush3.bf16.msra.mxu1 %v1105_v56  ;;  %5125 = vmatprep.mubr.msk.bf16.mxu1 %vm5333_vm1, %v5326_v12  ;;  %v317_v60 = vcombine.low %v293_v52, %v299_v57  ;;  %v318_v3 = vcombine.high %v293_v52, %v299_v57 }
 0x2dc   :  { %5135 = vmatprep.subr.bf16.mxu1 %v5326_v12 }
 0x2dd   :  { %v325_v0 = vrot.slane %v317_v60, %v5444_v26  ;;  %v332_v6 = vrot.slane %v318_v3, %v5444_v26 }
 0x2de   :  { %v2552_v36 = vpop.permute.xlu1 %2551 }
 0x2df   :  { %v333_v5 = vcombine.low %v309_v1, %v325_v0  ;;  %v334_v7 = vcombine.high %v309_v1, %v325_v0  ;;  %v349_v9 = vcombine.low %v316_v10, %v332_v6  ;;  %v350_v25 = vcombine.high %v316_v10, %v332_v6 }
 0x2e1   :  { %v341_v14 = vrot.slane %v333_v5, %v5451_v38  ;;  %v348_v19 = vrot.slane %v334_v7, %v5451_v38  ;;  %v357_v24 = vrot.slane %v349_v9, %v5451_v38  ;;  %v364_v29 = vrot.slane %v350_v25, %v5451_v38 }
 0x2e2   :  { %5126 = vmatmul.mubr.msk.bf16.vlgmr.msra.gmra.mxu1 %vm1107_vm2, %v438_v63 }
 0x2e3   :  { %5137 = vmatprep.mubr.msk.bf16.mxu1 %vm5333_vm1, %v5326_v12  ;;  %v365_v11 = vcombine.high %v341_v14, %v5326_v12  ;;  %v369_v13 = vpack.c.bf16 %v341_v14, %v341_v14  ;;  %v366_v23 = vcombine.high %v348_v19, %v5326_v12  ;;  %v367_v28 = vcombine.high %v357_v24, %v5326_v12 }
 0x2e4   :  { %v371_v30 = vpack.c.bf16 %v348_v19, %v348_v19  ;;  %v368_v32 = vcombine.high %v364_v29, %v5326_v12  ;;  %v373_v33 = vpack.c.bf16 %v357_v24, %v357_v24  ;;  %v375_v35 = vpack.c.bf16 %v364_v29, %v364_v29 }
 0x2e5   :  { %v370_v22 = vpack.c.bf16 %v365_v11, %v365_v11  ;;  %v372_v27 = vpack.c.bf16 %v366_v23, %v366_v23  ;;  %v374_v31 = vpack.c.bf16 %v367_v28, %v367_v28 }
 0x2e6   :  { %v376_v34 = vpack.c.bf16 %v368_v32, %v368_v32 }
 0x2f2   :  { %1333 = vxpose.xlu1.c.b16.start.end [1/1] (short) (narrow) %v369_v13, 16 }
 0x2f4   :  { %1349 = vxpose.xlu0.c.b16.start.end [1/1] (short) (narrow) %v370_v22, 16 }
 0x2f6   :  { %1381 = vxpose.xlu1.c.b16.start.end [1/1] (short) (narrow) %v372_v27, 16 }
 0x2f8   :  { %1365 = vxpose.xlu0.c.b16.start.end [1/1] (short) (narrow) %v371_v30, 16 }
 0x2fa   :  { %1413 = vxpose.xlu1.c.b16.start.end [1/1] (short) (narrow) %v374_v31, 16 }
 0x2fc   :  { %1397 = vxpose.xlu0.c.b16.start.end [1/1] (short) (narrow) %v373_v33, 16 }
 0x2fe   :  { %1445 = vxpose.xlu1.c.b16.start.end [1/1] (short) (narrow) %v376_v34, 16 }
 0x300   :  { %1429 = vxpose.xlu0.c.b16.start.end [1/1] (short) (narrow) %v375_v35, 16 }
 0x341   :  { %v2556_v37 = vpop.permute.xlu1 %2555 }
 0x342   :  { %v2563_v18 = vcombine.low %v2552_v36, %v2556_v37  ;;  %v2564_v40 = vcombine.high %v2552_v36, %v2556_v37 }
 0x344   :  { %v2554_v15 = vpop.permute.xlu0 %2553  ;;  %v2571_v16 = vrot.slane %v2563_v18, %v5444_v26  ;;  %v2578_v45 = vrot.slane %v2564_v40, %v5444_v26 }
 0x348   :  { %v2558_v39 = vpop.permute.xlu0 %2557 }
 0x349   :  { %v2579_v41 = vcombine.low %v2554_v15, %v2558_v39  ;;  %v2580_v42 = vcombine.high %v2554_v15, %v2558_v39 }
 0x34b   :  { %v2587_v17 = vrot.slane %v2579_v41, %v5444_v26  ;;  %v2594_v44 = vrot.slane %v2580_v42, %v5444_v26 }
 0x34d   :  { %v2595_v46 = vcombine.low %v2571_v16, %v2587_v17  ;;  %v2596_v48 = vcombine.high %v2571_v16, %v2587_v17  ;;  %v2611_v52 = vcombine.low %v2578_v45, %v2594_v44  ;;  %v2612_v55 = vcombine.high %v2578_v45, %v2594_v44 }
 0x34f   :  { %v2603_v50 = vrot.slane %v2595_v46, %v5451_v38  ;;  %v2610_v51 = vrot.slane %v2596_v48, %v5451_v38  ;;  %v2619_v58 = vrot.slane %v2611_v52, %v5451_v38  ;;  %v2626_v61 = vrot.slane %v2612_v55, %v5451_v38 }
 0x351   :  { %v2631_v53 = vpack.c.bf16 %v2603_v50, %v2603_v50  ;;  %v2627_v54 = vcombine.high %v2603_v50, %v5326_v12  ;;  %v2628_v57 = vcombine.high %v2610_v51, %v5326_v12  ;;  %v2633_v60 = vpack.c.bf16 %v2610_v51, %v2610_v51 }
 0x352   :  { %v2629_v0 = vcombine.high %v2619_v58, %v5326_v12  ;;  %v2635_v3 = vpack.c.bf16 %v2619_v58, %v2619_v58  ;;  %v2630_v4 = vcombine.high %v2626_v61, %v5326_v12  ;;  %v2637_v19 = vpack.c.bf16 %v2626_v61, %v2626_v61 }
 0x353   :  { %2787 = vxpose.xlu0.c.b16.start.end [1/1] (short) (narrow) %v2631_v53, 16  ;;  %v2632_v56 = vpack.c.bf16 %v2627_v54, %v2627_v54  ;;  %v2634_v63 = vpack.c.bf16 %v2628_v57, %v2628_v57 }
 0x354   :  { %v1341_v59 = vpop.trf.xlu1  ;;  %v2636_v10 = vpack.c.bf16 %v2629_v0, %v2629_v0  ;;  %v2638_v13 = vpack.c.bf16 %v2630_v4, %v2630_v4 }
 0x355   :  { %2803 = vxpose.xlu1.c.b16.start.end [1/1] (short) (narrow) %v2632_v56, 16  ;;  %v1465_v5 = vshrl.u32 %v1341_v59, 16 }
 0x356   :  { %v1357_v62 = vpop.trf.xlu0 }
 0x357   :  { %2819 = vxpose.xlu0.c.b16.start.end [1/1] (short) (narrow) %v2633_v60, 16  ;;  %v1466_v6 = vshrl.u32 %v1357_v62, 16  ;;  %v1463_v9 = vpack.i.b16 %v1357_v62, %v1341_v59 }
 0x358   :  { %v1389_v1 = vpop.trf.xlu1 }
 0x359   :  { %2835 = vxpose.xlu1.c.b16.start.end [1/1] (short) (narrow) %v2634_v63, 16  ;;  %v1467_v23 = vpack.i.b16 %v1466_v6, %v1465_v5  ;;  %v1474_v25 = vshrl.u32 %v1389_v1, 16 }
 0x35a   :  { %v1373_v7 = vpop.trf.xlu0 }
 0x35b   :  { %2851 = vxpose.xlu0.c.b16.start.end [1/1] (short) (narrow) %v2635_v3, 16  ;;  %v1473_v22 = vshrl.u32 %v1373_v7, 16  ;;  %v1471_v30 = vpack.i.b16 %v1389_v1, %v1373_v7 }
 0x35c   :  { %v1421_v14 = vpop.trf.xlu1 }
 0x35d   :  { %2867 = vxpose.xlu1.c.b16.start.end [1/1] (short) (narrow) %v2636_v10, 16  ;;  %v1482_v11 = vshrl.u32 %v1421_v14, 16  ;;  %v1475_v35 = vpack.i.b16 %v1474_v25, %v1473_v22 }
 0x35e   :  { %v1405_v24 = vpop.trf.xlu0 }
 0x35f   :  { %2883 = vxpose.xlu0.c.b16.start.end [1/1] (short) (narrow) %v2637_v19, 16  ;;  %v1479_v27 = vpack.i.b16 %v1421_v14, %v1405_v24  ;;  %v1481_v28 = vshrl.u32 %v1405_v24, 16 }
 0x360   :  { %v1453_v29 = vpop.trf.xlu1 }
 0x361   :  { %2899 = vxpose.xlu1.c.b16.start.end [1/1] (short) (narrow) %v2638_v13, 16  ;;  %v1483_v31 = vpack.i.b16 %v1482_v11, %v1481_v28  ;;  %v1493_v32 = vcombine.low %v1463_v9, %v1479_v27  ;;  %v1490_v33 = vshrl.u32 %v1453_v29, 16  ;;  %v1494_v48 = vcombine.high %v1463_v9, %v1479_v27 }
 0x362   :  { %v1437_v34 = vpop.trf.xlu0 }
 0x363   :  { %v1487_v36 = vpack.i.b16 %v1453_v29, %v1437_v34  ;;  %v1489_v37 = vshrl.u32 %v1437_v34, 16  ;;  %v1561_v15 = vcombine.low %v1467_v23, %v1483_v31  ;;  %v1501_v40 = vrot.slane %v1493_v32, %v5444_v26 }
 0x364   :  { %v1562_v56 = vcombine.high %v1467_v23, %v1483_v31  ;;  %v1508_v59 = vrot.slane %v1494_v48, %v5444_v26 }
 0x365   :  { %v1491_v18 = vpack.i.b16 %v1490_v33, %v1489_v37  ;;  %v1509_v39 = vcombine.low %v1471_v30, %v1487_v36  ;;  %v1569_v42 = vrot.slane %v1561_v15, %v5444_v26  ;;  %v1510_v50 = vcombine.high %v1471_v30, %v1487_v36 }
 0x366   :  { %v1576_v62 = vrot.slane %v1562_v56, %v5444_v26 }
 0x367   :  { %v1517_v41 = vrot.slane %v1509_v39, %v5444_v26  ;;  %v1577_v16 = vcombine.low %v1475_v35, %v1491_v18  ;;  %v1578_v57 = vcombine.high %v1475_v35, %v1491_v18  ;;  %v1524_v60 = vrot.slane %v1510_v50, %v5444_v26 }
 0x369   :  { %v1525_v17 = vcombine.low %v1501_v40, %v1517_v41  ;;  %v1585_v44 = vrot.slane %v1577_v16, %v5444_v26  ;;  %v1526_v53 = vcombine.high %v1501_v40, %v1517_v41  ;;  %v1592_v63 = vrot.slane %v1578_v57, %v5444_v26 }
 0x36a   :  { %v1541_v1 = vcombine.low %v1508_v59, %v1524_v60  ;;  %v1542_v10 = vcombine.high %v1508_v59, %v1524_v60 }
 0x36b   :  { %v1533_v45 = vrot.slane %v1525_v17, %v5451_v38  ;;  %v1593_v46 = vcombine.low %v1569_v42, %v1585_v44  ;;  %v1594_v55 = vcombine.high %v1569_v42, %v1585_v44  ;;  %v1540_v58 = vrot.slane %v1526_v53, %v5451_v38 }
 0x36c   :  { %v1609_v4 = vcombine.low %v1576_v62, %v1592_v63  ;;  %v1549_v5 = vrot.slane %v1541_v1, %v5451_v38  ;;  %v1610_v19 = vcombine.high %v1576_v62, %v1592_v63  ;;  %v1556_v9 = vrot.slane %v1542_v10, %v5451_v38 }
 0x36d   :  { %1629 = vxpose.xlu0.c.b16.start.end [1/1] (short) (narrow) %v1533_v45, 16  ;;  %v1601_v51 = vrot.slane %v1593_v46, %v5451_v38  ;;  %v1557_v52 = vcombine.high %v1533_v45, %v5325_v2  ;;  %v1608_v61 = vrot.slane %v1594_v55, %v5451_v38  ;;  %v1558_v0 = vcombine.high %v1540_v58, %v5325_v2 }
 0x36e   :  { %v1617_v6 = vrot.slane %v1609_v4, %v5451_v38  ;;  %v1559_v7 = vcombine.high %v1549_v5, %v5325_v2  ;;  %v1624_v11 = vrot.slane %v1610_v19, %v5451_v38  ;;  %v1560_v13 = vcombine.high %v1556_v9, %v5325_v2 }
 0x36f   :  { %1645 = vxpose.xlu1.c.b16.start.end [1/1] (short) (narrow) %v1601_v51, 16  ;;  %v1625_v54 = vcombine.high %v1601_v51, %v5325_v2  ;;  %v1626_v3 = vcombine.high %v1608_v61, %v5325_v2 }
 0x370   :  { %v1627_v14 = vcombine.high %v1617_v6, %v5325_v2  ;;  %v1628_v23 = vcombine.high %v1624_v11, %v5325_v2 }
 0x371   :  { %1661 = vxpose.xlu0.c.b16.start.end [1/1] (short) (narrow) %v1557_v52, 16 }
 0x373   :  { %1677 = vxpose.xlu1.c.b16.start.end [1/1] (short) (narrow) %v1625_v54, 16 }
 0x375   :  { %1693 = vxpose.xlu0.c.b16.start.end [1/1] (short) (narrow) %v1540_v58, 16 }
 0x377   :  { %1709 = vxpose.xlu1.c.b16.start.end [1/1] (short) (narrow) %v1608_v61, 16 }
 0x379   :  { %1725 = vxpose.xlu0.c.b16.start.end [1/1] (short) (narrow) %v1558_v0, 16 }
 0x37b   :  { %1741 = vxpose.xlu1.c.b16.start.end [1/1] (short) (narrow) %v1626_v3, 16 }
 0x37d   :  { %1757 = vxpose.xlu0.c.b16.start.end [1/1] (short) (narrow) %v1549_v5, 16 }
 0x37f   :  { %1773 = vxpose.xlu1.c.b16.start.end [1/1] (short) (narrow) %v1617_v6, 16 }
 0x381   :  { %1789 = vxpose.xlu0.c.b16.start.end [1/1] (short) (narrow) %v1559_v7, 16 }
 0x383   :  { %1805 = vxpose.xlu1.c.b16.start.end [1/1] (short) (narrow) %v1627_v14, 16 }
 0x385   :  { %1821 = vxpose.xlu0.c.b16.start.end [1/1] (short) (narrow) %v1556_v9, 16 }
 0x387   :  { %1837 = vxpose.xlu1.c.b16.start.end [1/1] (short) (narrow) %v1624_v11, 16 }
 0x389   :  { %1853 = vxpose.xlu0.c.b16.start.end [1/1] (short) (narrow) %v1560_v13, 16 }
 0x38a   :  { %v5631_v24 = vpop.f32.mrf.mxu1 }
 0x38b   :  { %1869 = vxpose.xlu1.c.b16.start.end [1/1] (short) (narrow) %v1628_v23, 16 }
 0x38c   :  { %v5109_v25 = vpop.f32.mrf.mxu1 }
 0x38e   :  { %v1148_v22 = vpop.f32.mrf.mxu1 }
 0x390   :  { %v5110_v27 = vpop.f32.mrf.mxu1 }
 0x392   :  { %v5633_v28 = vpop.f32.mrf.mxu1 }
 0x394   :  { %v5115_v29 = vpop.f32.mrf.mxu1 }
 0x396   :  { %v1191_v30 = vpop.f32.mrf.mxu1 }
 0x398   :  { %v5116_v31 = vpop.f32.mrf.mxu1 }
 0x39a   :  { %v5635_v32 = vpop.f32.mrf.mxu1 }
 0x39c   :  { %v5121_v33 = vpop.f32.mrf.mxu1 }
 0x39e   :  { %v1234_v34 = vpop.f32.mrf.mxu1 }
 0x3a0   :  { %v5122_v35 = vpop.f32.mrf.mxu1 }
 0x3a2   :  { %v5637_v36 = vpop.f32.mrf.mxu1 }
 0x3a4   :  { %v5127_v37 = vpop.f32.mrf.mxu1 }
 0x3a6   :  { %v1277_v15 = vpop.f32.mrf.mxu1 }
 0x3a8   :  { %v5128_v18 = vpop.f32.mrf.mxu1 }
 0x3b5   :  { %v2795_v39 = vpop.trf.xlu0 }
 0x3b6   :  { %v2919_v44 = vshrl.u32 %v2795_v39, 16 }
 0x3b7   :  { %v2811_v40 = vpop.trf.xlu1 }
 0x3b8   :  { %v2920_v17 = vshrl.u32 %v2811_v40, 16  ;;  %v2917_v48 = vpack.i.b16 %v2811_v40, %v2795_v39 }
 0x3b9   :  { %v2827_v41 = vpop.trf.xlu0 }
 0x3ba   :  { %v2927_v53 = vshrl.u32 %v2827_v41, 16  ;;  %v2921_v55 = vpack.i.b16 %v2920_v17, %v2919_v44 }
 0x3bb   :  { %v2843_v42 = vpop.trf.xlu1 }
 0x3bc   :  { %v2928_v52 = vshrl.u32 %v2843_v42, 16  ;;  %v2925_v61 = vpack.i.b16 %v2843_v42, %v2827_v41 }
 0x3bd   :  { %v2859_v16 = vpop.trf.xlu0 }
 0x3be   :  { %v2935_v45 = vshrl.u32 %v2859_v16, 16  ;;  %v2929_v1 = vpack.i.b16 %v2928_v52, %v2927_v53 }
 0x3bf   :  { %v2875_v46 = vpop.trf.xlu1 }
 0x3c0   :  { %v2936_v50 = vshrl.u32 %v2875_v46, 16  ;;  %v2933_v51 = vpack.i.b16 %v2875_v46, %v2859_v16 }
 0x3c1   :  { %v2891_v54 = vpop.trf.xlu0 }
 0x3c2   :  { %v2937_v56 = vpack.i.b16 %v2936_v50, %v2935_v45  ;;  %v2948_v57 = vcombine.high %v2917_v48, %v2933_v51  ;;  %v2943_v58 = vshrl.u32 %v2891_v54, 16  ;;  %v2947_v59 = vcombine.low %v2917_v48, %v2933_v51 }
 0x3c3   :  { %v2907_v60 = vpop.trf.xlu1 }
 0x3c4   :  { %v3016_v62 = vcombine.high %v2921_v55, %v2937_v56  ;;  %v2944_v63 = vshrl.u32 %v2907_v60, 16  ;;  %v2941_v0 = vpack.i.b16 %v2907_v60, %v2891_v54  ;;  %v3015_v6 = vcombine.low %v2921_v55, %v2937_v56 }
 0x3c5   :  { %v5640_v7 = vrot.slane %v2948_v57, %v5444_v26  ;;  %v2955_v10 = vrot.slane %v2947_v59, %v5444_v26  ;;  %v5677_v56 = vmul.f32 0.25, %v5631_v24 }
 0x3c6   :  { %v2945_v3 = vpack.i.b16 %v2944_v63, %v2943_v58  ;;  %v2963_v4 = vcombine.low %v2925_v61, %v2941_v0  ;;  %v2964_v5 = vcombine.high %v2925_v61, %v2941_v0  ;;  %v3023_v23 = vrot.slane %v3015_v6, %v5444_v26 }
 0x3c7   :  { %v5652_v27 = vrot.slane %v3016_v62, %v5444_v26  ;;  %v5682_v61 = vmul.f32 0.25, %v5633_v28  ;;  %v1285_v24 = vsel %vm1284_vm3, %v5677_v56, -inf  ;;  %v5693_v28 = vmul.f32 0.25, %v5637_v36 }
 0x3c8   :  { %v5644_v14 = vrot.slane %v2964_v5, %v5444_v26  ;;  %v3032_v19 = vcombine.high %v2929_v1, %v2945_v3  ;;  %v2971_v9 = vrot.slane %v2963_v4, %v5444_v26  ;;  %v3031_v11 = vcombine.low %v2929_v1, %v2945_v3 }
 0x3c9   :  { %v5686_v1 = vmul.f32 0.25, %v5635_v32  ;;  %v1288_v5 = vsel %vm1284_vm3, %v5682_v61, -inf }
 0x3ca   :  { %v2979_v13 = vcombine.low %v2955_v10, %v2971_v9  ;;  %v3039_v25 = vrot.slane %v3031_v11, %v5444_v26  ;;  %v2995_v22 = vcombine.low %v5640_v7, %v5644_v14  ;;  %v5655_v29 = vrot.slane %v3032_v19, %v5444_v26 }
 0x3cb   :  { %v2996_v30 = vcombine.high %v5640_v7, %v5644_v14  ;;  %v2980_v34 = vcombine.high %v2955_v10, %v2971_v9  ;;  %v1291_v10 = vsel %vm1284_vm3, %v5686_v1, -inf  ;;  %v1294_v11 = vsel %vm1284_vm3, %v5693_v28, -inf }
 0x3cc   :  { %v2987_v31 = vrot.slane %v2979_v13, %v5451_v38  ;;  %v3047_v33 = vcombine.low %v3023_v23, %v3039_v25  ;;  %v3063_v35 = vcombine.low %v5652_v27, %v5655_v29  ;;  %v3064_v37 = vcombine.high %v5652_v27, %v5655_v29 }
 0x3cd   :  { %v3048_v18 = vcombine.high %v3023_v23, %v3039_v25  ;;  %v5666_v40 = vrot.slane %v2980_v34, %v5451_v38 }
 0x3ce   :  { %3083 = vxpose.xlu0.c.b16.start.end [1/1] (short) (narrow) %v2987_v31, 16  ;;  %v3055_v15 = vrot.slane %v3047_v33, %v5451_v38  ;;  %v3011_v17 = vcombine.high %v2987_v31, %v5325_v2 }
 0x3cf   :  { %v1637_v39 = vpop.trf.xlu0  ;;  %v5670_v42 = vrot.slane %v3048_v18, %v5451_v38 }
 0x3d0   :  { %3099 = vxpose.xlu1.c.b16.start.end [1/1] (short) (narrow) %v3055_v15, 16  ;;  %v3079_v45 = vcombine.high %v3055_v15, %v5325_v2 }
 0x3d1   :  { %v1653_v41 = vpop.trf.xlu1 }
 0x3d2   :  { %3147 = vxpose.xlu0.c.b16.start.end [1/1] (short) (narrow) %v5666_v40, 16 }
 0x3d3   :  { %v1669_v16 = vpop.trf.xlu0 }
 0x3d4   :  { %3163 = vxpose.xlu1.c.b16.start.end [1/1] (short) (narrow) %v5670_v42, 16 }
 0x3d5   :  { %v1685_v44 = vpop.trf.xlu1 }
 0x3d6   :  { %3115 = vxpose.xlu0.c.b16.start.end [1/1] (short) (narrow) %v3011_v17, 16 }
 0x3d7   :  { %v1701_v46 = vpop.trf.xlu0 }
 0x3d8   :  { %3131 = vxpose.xlu1.c.b16.start.end [1/1] (short) (narrow) %v3079_v45, 16  ;;  %v1885_v48 = vcombine.low %v1637_v39, %v1701_v46 }
 0x3d9   :  { %v1717_v50 = vpop.trf.xlu1 }
 0x3da   :  { %v1935_v51 = vcombine.low %v1653_v41, %v1717_v50  ;;  %v1892_v53 = vrot.slane %v1885_v48, %v5444_v26 }
 0x3db   :  { %v1733_v52 = vpop.trf.xlu0 }
 0x3dc   :  { %v1893_v54 = vcombine.low %v1669_v16, %v1733_v52  ;;  %v1942_v57 = vrot.slane %v1935_v51, %v5444_v26 }
 0x3dd   :  { %v1749_v55 = vpop.trf.xlu1 }
 0x3de   :  { %v1943_v58 = vcombine.low %v1685_v44, %v1749_v55  ;;  %v1900_v59 = vrot.slane %v1893_v54, %v5444_v26 }
 0x3df   :  { %v1765_v60 = vpop.trf.xlu0 }
 0x3e0   :  { %v1950_v62 = vrot.slane %v1943_v58, %v5444_v26  ;;  %v1917_v63 = vcombine.low %v1892_v53, %v1900_v59 }
 0x3e1   :  { %v1781_v0 = vpop.trf.xlu1 }
 0x3e2   :  { %v1967_v3 = vcombine.low %v1942_v57, %v1950_v62  ;;  %v1924_v18 = vrot.slane %v1917_v63, %v5451_v38  ;;  %v3080_v62 = vcombine.high %v5670_v42, %v5325_v2  ;;  %v3012_v63 = vcombine.high %v5666_v40, %v5325_v2 }
 0x3e3   :  { %1286 = vmax.xlane.f32.xlu0 %v1285_v24  ;;  %v1797_v4 = vpop.trf.xlu0 }
 0x3e4   :  { %v1974_v16 = vrot.slane %v1967_v3, %v5451_v38 }
 0x3e5   :  { %1289 = vmax.xlane.f32.xlu1 %v1288_v5  ;;  %v1813_v6 = vpop.trf.xlu1 }
 0x3e7   :  { %1292 = vmax.xlane.f32.xlu0 %v1291_v10  ;;  %v1829_v32 = vpop.trf.xlu0 }
 0x3e8   :  { %v1901_v19 = vcombine.low %v1765_v60, %v1829_v32 }
 0x3e9   :  { %v1845_v9 = vpop.trf.xlu1 }
 0x3ea   :  { %v1951_v13 = vcombine.low %v1781_v0, %v1845_v9  ;;  %v1908_v25 = vrot.slane %v1901_v19, %v5444_v26 }
 0x3eb   :  { %1295 = vmax.xlane.f32.xlu0 %v1294_v11  ;;  %v1861_v23 = vpop.trf.xlu0 }
 0x3ec   :  { %v1909_v31 = vcombine.low %v1797_v4, %v1861_v23  ;;  %v1958_v36 = vrot.slane %v1951_v13, %v5444_v26 }
 0x3ed   :  { %v1877_v33 = vpop.trf.xlu1 }
 0x3ee   :  { %v1959_v34 = vcombine.low %v1813_v6, %v1877_v33  ;;  %v1916_v15 = vrot.slane %v1909_v31, %v5444_v26 }
 0x3f0   :  { %v1966_v39 = vrot.slane %v1959_v34, %v5444_v26  ;;  %v1925_v41 = vcombine.low %v1908_v25, %v1916_v15 }
 0x3f2   :  { %v1975_v17 = vcombine.low %v1958_v36, %v1966_v39  ;;  %v1932_v44 = vrot.slane %v1925_v41, %v5451_v38 }
 0x3f4   :  { %v1982_v45 = vrot.slane %v1975_v17, %v5451_v38  ;;  %v5707_v46 = vcombine.low %v1924_v18, %v1932_v44  ;;  %v5709_v48 = vcombine.high %v1924_v18, %v1932_v44 }
 0x3f6   :  { %v5711_v50 = vcombine.low %v1974_v16, %v1982_v45  ;;  %v5713_v51 = vcombine.high %v1974_v16, %v1982_v45  ;;  %v1988_v52 = vshrl.u32 %v5707_v46, 16  ;;  %v1994_v53 = vshrl.u32 %v5709_v48, 16 }
 0x3f8   :  { %v1989_v54 = vshrl.u32 %v5711_v50, 16  ;;  %v1995_v55 = vshrl.u32 %v5713_v51, 16  ;;  %v1987_v57 = vpack.i.b16 %v5711_v50, %v5707_v46  ;;  %v1993_v58 = vpack.i.b16 %v5713_v51, %v5709_v48 }
 0x3f9   :  { %v2475_v46 = vcombine.low %v5491_v20, %v5556_v43  ;;  %v2476_v50 = vcombine.high %v5491_v20, %v5556_v43 }
 0x3fa   :  { %v5723_v59 = vpack.i.b16 %v1989_v54, %v1988_v52  ;;  %v5725_v60 = vpack.i.b16 %v1995_v55, %v1994_v53 }
 0x412   :  { %3195 = vxpose.xlu1.c.b16.start.end [1/1] (short) (narrow) %v3080_v62, 16  ;;  %v3003_v62 = vrot.slane %v2995_v22, %v5451_v38 }
 0x414   :  { %v3013_v22 = vcombine.high %v3003_v62, %v5325_v2 }
 0x418   :  { %3179 = vxpose.xlu0.c.b16.start.end [1/1] (short) (narrow) %v3012_v63, 16  ;;  %v3071_v63 = vrot.slane %v3063_v35, %v5451_v38  ;;  %v3010_v35 = vrot.slane %v2996_v30, %v5451_v38 }
 0x430   :  { %v3091_v0 = vpop.trf.xlu0 }
 0x432   :  { %v3107_v24 = vpop.trf.xlu1 }
 0x434   :  { %v3155_v3 = vpop.trf.xlu0 }
 0x435   :  { %v3339_v4 = vcombine.low %v3091_v0, %v3155_v3  ;;  %v3081_v3 = vcombine.high %v3071_v63, %v5325_v2 }
 0x436   :  { %v3171_v5 = vpop.trf.xlu1 }
 0x437   :  { %v3389_v6 = vcombine.low %v3107_v24, %v3171_v5  ;;  %v3014_v5 = vcombine.high %v3010_v35, %v5325_v2 }
 0x438   :  { %v3123_v10 = vpop.trf.xlu0 }
 0x439   :  { %v5734_v36 = vrot.slane %v3389_v6, %v5444_v26 }
 0x43a   :  { %v3139_v32 = vpop.trf.xlu1 }
 0x46c   :  { %v1287_v19 = vpop.xlane.xlu0 %1286 }
 0x46d   :  { %v1297_v9 = vsub.f32 %v5677_v56, %v1287_v19 }
 0x46e   :  { %v1290_v11 = vpop.xlane.xlu1 %1289 }
 0x46f   :  { %v1301_v13 = vmul.f32 1.442695, %v1297_v9  ;;  %v1298_v42 = vsub.f32 %v5682_v61, %v1290_v11  ;;  %v5742_v61 = vrot.slane %v3339_v4, %v5444_v26  ;;  %v3078_v4 = vrot.slane %v3064_v37, %v5451_v38 }
 0x470   :  { %v1293_v23 = vpop.xlane.xlu0 %1292 }
 0x471   :  { %5243 = vpow2.f32 %v1301_v13  ;;  %v1303_v25 = vmul.f32 1.442695, %v1298_v42  ;;  %v1299_v52 = vsub.f32 %v5686_v1, %v1293_v23  ;;  %v3082_v6 = vcombine.high %v3078_v4, %v5325_v2 }
 0x472   :  { %v2491_v13 = vcombine.low %v5560_v47, %v5562_v49  ;;  %v2492_v42 = vcombine.high %v5560_v47, %v5562_v49 }
 0x473   :  { %5245 = vpow2.f32 %v1303_v25  ;;  %v1305_v54 = vmul.f32 1.442695, %v1299_v52 }
 0x474   :  { %v3203_v40 = vpop.trf.xlu1  ;;  %v1296_v33 = vpop.xlane.xlu0 %1295  ;;  %v2499_v25 = vrot.slane %v2491_v13, %v5444_v26 }
 0x475   :  { %v3397_v31 = vcombine.low %v3139_v32, %v3203_v40  ;;  %v1300_v53 = vsub.f32 %v5693_v28, %v1296_v33  ;;  %5247 = vpow2.f32 %v1305_v54  ;;  %v2483_v40 = vrot.slane %v2475_v46, %v5444_v26 }
 0x477   :  { %v5737_v34 = vrot.slane %v3397_v31, %v5444_v26  ;;  %v1307_v55 = vmul.f32 1.442695, %v1300_v53  ;;  %v2490_v31 = vrot.slane %v2476_v50, %v5444_v26  ;;  %v2508_v47 = vcombine.high %v2483_v40, %v2499_v25 }
 0x479   :  { %v3421_v56 = vcombine.low %v5734_v36, %v5737_v34  ;;  %5249 = vpow2.f32 %v1307_v55  ;;  %v2522_v20 = vrot.slane %v2508_v47, %v5451_v38 }
 0x47a   :  { %v3187_v15 = vpop.trf.xlu0 }
 0x47b   :  { %v3347_v18 = vcombine.low %v3123_v10, %v3187_v15  ;;  %v114_v10 = vpop.f32.mrf.mxu0  ;;  %v2507_v15 = vcombine.low %v2483_v40, %v2499_v25  ;;  %v2540_v54 = vcombine.high %v2522_v20, %v5326_v12 }
 0x47c   :  { %v5782_v32 = vadd.f32 %v114_v10, %v5496_v21 }
 0x47d   :  { %v5745_v39 = vrot.slane %v3347_v18, %v5444_v26 }
 0x47e   :  { %v5244_v41 = vpop.eup %5243 }
 0x47f   :  { %v3371_v16 = vcombine.low %v5742_v61, %v5745_v39  ;;  %v1309_v17 = vsel %vm1284_vm3, %v5244_v41, 0.0 }
 0x480   :  { %v5246_v44 = vpop.eup %5245  ;;  %1310 = vadd.xlane.f32.xlu0 %v1309_v17  ;;  %v2515_v17 = vrot.slane %v2507_v15, %v5451_v38  ;;  %v3428_v15 = vrot.slane %v3421_v56, %v5451_v38 }
 0x481   :  { %v1312_v45 = vsel %vm1284_vm3, %v5246_v44, 0.0 }
 0x482   :  { %1313 = vadd.xlane.f32.xlu1 %v1312_v45  ;;  %v5761_v0 = vpop.eup %5247  ;;  %v2539_v53 = vcombine.high %v2515_v17, %v5326_v12 }
 0x483   :  { %v1315_v28 = vsel %vm1284_vm3, %v5761_v0, 0.0 }
 0x486   :  { %v5763_v1 = vpop.eup %5249 }
 0x487   :  { %v1318_v24 = vsel %vm1284_vm3, %v5763_v1, 0.0 }
 0x4ad   :  { %3211 = vxpose.xlu0.c.b16.start.end [1/1] (short) (narrow) %v3003_v62, 16 }
 0x4af   :  { %3227 = vxpose.xlu1.c.b16.start.end [1/1] (short) (narrow) %v3071_v63, 16 }
 0x4ba   :  { %1316 = vadd.xlane.f32.xlu0 %v1315_v28 }
 0x4bc   :  { %1319 = vadd.xlane.f32.xlu1 %v1318_v24 }
 0x4e7   :  { %3243 = vxpose.xlu0.c.b16.start.end [1/1] (short) (narrow) %v3013_v22, 16 }
 0x4e9   :  { %3259 = vxpose.xlu1.c.b16.start.end [1/1] (short) (narrow) %v3081_v3, 16 }
 0x4eb   :  { %3275 = vxpose.xlu0.c.b16.start.end [1/1] (short) (narrow) %v3010_v35, 16 }
 0x4ed   :  { %3291 = vxpose.xlu1.c.b16.start.end [1/1] (short) (narrow) %v3078_v4, 16 }
 0x4ef   :  { %3307 = vxpose.xlu0.c.b16.start.end [1/1] (short) (narrow) %v3014_v5, 16 }
 0x4f1   :  { %3323 = vxpose.xlu1.c.b16.start.end [1/1] (short) (narrow) %v3082_v6, 16 }
 0x4f5   :  { %2643 = vrot.lane.b32.xlu1 %v5782_v32, %s5330_s20 }
 0x4f8   :  { %2640 = vrot.lane.b32.xlu0 %v5782_v32, %s5328_s19 }
 0x4f9   :  { %2646 = vrot.lane.b32.xlu1 %v5782_v32, %s5327_s18 }
 0x509   :  { %v1311_v7 = vpop.xlane.xlu0 %1310 }
 0x50a   :  { %5251 = vrcp.f32 %v1311_v7 }
 0x50b   :  { %v1314_v14 = vpop.xlane.xlu1 %1313 }
 0x50c   :  { %5253 = vrcp.f32 %v1314_v14 }
 0x50f   :  { %v3219_v23 = vpop.trf.xlu0 }
 0x517   :  { %v5252_v27 = vpop.eup %5251 }
 0x518   :  { %v1325_v29 = vmul.f32 %v5252_v27, %v5244_v41 }
 0x519   :  { %v5254_v30 = vpop.eup %5253 }
 0x51a   :  { %v1329_v37 = vpack.c.bf16 %v1325_v29, %v1325_v29  ;;  %v1326_v19 = vmul.f32 %v5254_v30, %v5246_v44 }
 0x51c   :  { %v2001_v21 = vsel %vm1284_vm3, %v1329_v37, 0  ;;  %v1330_v9 = vpack.c.bf16 %v1326_v19, %v1326_v19 }
 0x51d   :  { %5130 = vmatpush3.bf16.xpose.msra.mxu0 %v2001_v21 }
 0x51e   :  { %v2048_v11 = vsel %vm1284_vm3, %v1330_v9, 0  ;;  %5141 = vmatprep.subr.bf16.mxu0 %v5326_v12 }
 0x51f   :  { %5136 = vmatpush3.bf16.xpose.msra.mxu1 %v2048_v11 }
 0x520   :  { %5147 = vmatprep.subr.bf16.mxu1 %v5326_v12 }
 0x524   :  { %5132 = vmatmul.mubr.msk.bf16.vlgmr.msra.gmra.mxu0 %vm1284_vm3, %v1987_v57  ;;  %v3235_v57 = vpop.trf.xlu1 }
 0x525   :  { %5143 = vmatprep.mubr.msk.bf16.mxu0 %vm5333_vm1, %v5326_v12 }
 0x526   :  { %5138 = vmatmul.mubr.msk.bf16.vlgmr.msra.gmra.mxu1 %vm1284_vm3, %v5723_v59  ;;  %v2506_v59 = vrot.slane %v2492_v42, %v5444_v26 }
 0x527   :  { %5149 = vmatprep.mubr.msk.bf16.mxu1 %vm5333_vm1, %v5326_v12 }
 0x528   :  { %v2523_v49 = vcombine.low %v2490_v31, %v2506_v59  ;;  %v2524_v18 = vcombine.high %v2490_v31, %v2506_v59 }
 0x52a   :  { %v2531_v43 = vrot.slane %v2523_v49, %v5451_v38  ;;  %v2538_v44 = vrot.slane %v2524_v18, %v5451_v38 }
 0x52c   :  { %v2541_v55 = vcombine.high %v2531_v43, %v5326_v12  ;;  %v2542_v62 = vcombine.high %v2538_v44, %v5326_v12  ;;  %v5042_v14 = vpack.c.bf16 %v2531_v43, %v2515_v17  ;;  %v5043_v27 = vpack.c.bf16 %v2538_v44, %v2522_v20 }
 0x52e   :  { %v5044_v3 = vpack.c.bf16 %v2541_v55, %v2539_v53  ;;  %v5045_v35 = vpack.c.bf16 %v2542_v62, %v2540_v54  ;;  %v2740_v25 = vrot.slane %v5043_v27, %v5444_v26 }
 0x530   :  { %v2757_v11 = vrot.slane %v5044_v3, %v5444_v26  ;;  %v2765_v13 = vrot.slane %v5045_v35, %v5444_v26 }
 0x543   :  { %v1317_v33 = vpop.xlane.xlu0 %1316 }
 0x544   :  { %5255 = vrcp.f32 %v1317_v33  ;;  %v2766_v33 = vcombine.low %v2757_v11, %v2765_v13 }
 0x545   :  { %v1320_v41 = vpop.xlane.xlu1 %1319 }
 0x546   :  { %5257 = vrcp.f32 %v1320_v41  ;;  %v2773_v17 = vrot.slane %v2766_v33, %v5451_v38 }
 0x548   :  { %v2779_v48 = vshrl.u32 %v2773_v17, 16 }
 0x549   :  { %v3251_v45 = vpop.trf.xlu0 }
 0x54b   :  { %v3267_v52 = vpop.trf.xlu1 }
 0x54d   :  { %v3283_v63 = vpop.trf.xlu0 }
 0x54e   :  { %v3355_v28 = vcombine.low %v3219_v23, %v3283_v63 }
 0x54f   :  { %v3299_v24 = vpop.trf.xlu1 }
 0x550   :  { %v3405_v4 = vcombine.low %v3235_v57, %v3299_v24  ;;  %v3362_v29 = vrot.slane %v3355_v28, %v5444_v26  ;;  %v2732_v57 = vrot.slane %v5042_v14, %v5444_v26 }
 0x551   :  { %v5256_v22 = vpop.eup %5255  ;;  %v3315_v5 = vpop.trf.xlu0 }
 0x552   :  { %v3363_v6 = vcombine.low %v3251_v45, %v3315_v5  ;;  %v1327_v10 = vmul.f32 %v5256_v22, %v5761_v0  ;;  %v3412_v42 = vrot.slane %v3405_v4, %v5444_v26  ;;  %v2741_v61 = vcombine.low %v2732_v57, %v2740_v25 }
 0x553   :  { %v5258_v7 = vpop.eup %5257  ;;  %v3331_v30 = vpop.trf.xlu1 }
 0x554   :  { %v3370_v37 = vrot.slane %v3363_v6, %v5444_v26  ;;  %v3413_v19 = vcombine.low %v3267_v52, %v3331_v30  ;;  %v1331_v21 = vpack.c.bf16 %v1327_v10, %v1327_v10  ;;  %v1328_v9 = vmul.f32 %v5258_v7, %v5763_v1 }
 0x555   :  { %v3378_v1 = vrot.slane %v3371_v16, %v5451_v38  ;;  %v2748_v45 = vrot.slane %v2741_v61, %v5451_v38 }
 0x556   :  { %v3379_v23 = vcombine.low %v3362_v29, %v3370_v37  ;;  %v3420_v0 = vrot.slane %v3413_v19, %v5444_v26  ;;  %v2095_v46 = vsel %vm1284_vm3, %v1331_v21, 0  ;;  %v1332_v50 = vpack.c.bf16 %v1328_v9, %v1328_v9 }
 0x557   :  { %5142 = vmatpush3.bf16.xpose.msra.mxu0 %v2095_v46  ;;  %v2777_v51 = vpack.i.b16 %v2773_v17, %v2748_v45  ;;  %v2749_v55 = vcombine.high %v2748_v45, %v5325_v2 }
 0x558   :  { %v3386_v59 = vrot.slane %v3379_v23, %v5451_v38  ;;  %v3429_v40 = vcombine.low %v3412_v42, %v3420_v0  ;;  %v2142_v31 = vsel %vm1284_vm3, %v1332_v50, 0  ;;  %5153 = vmatprep.subr.bf16.mxu0 %v5326_v12 }
 0x559   :  { %5148 = vmatpush3.bf16.xpose.msra.mxu1 %v2142_v31  ;;  %v2784_v22 = vshrl.u32 %v2749_v55, 16 }
 0x55a   :  { %v3387_v47 = vcombine.low %v3378_v1, %v3386_v59  ;;  %v3388_v49 = vcombine.high %v3378_v1, %v3386_v59  ;;  %v3436_v18 = vrot.slane %v3429_v40, %v5451_v38  ;;  %5159 = vmatprep.subr.bf16.mxu1 %v5326_v12 }
 0x55c   :  { %v3437_v39 = vcombine.low %v3428_v15, %v3436_v18  ;;  %v3438_v16 = vcombine.high %v3428_v15, %v3436_v18  ;;  %v3443_v41 = vshrl.u32 %v3387_v47, 16  ;;  %v3451_v20 = vshrl.u32 %v3388_v49, 16 }
 0x55e   :  { %5144 = vmatmul.mubr.msk.bf16.vlgmr.msra.gmra.mxu0 %vm1284_vm3, %v1993_v58  ;;  %v3441_v36 = vpack.i.b16 %v3437_v39, %v3387_v47  ;;  %v3444_v34 = vshrl.u32 %v3437_v39, 16  ;;  %v3449_v56 = vpack.i.b16 %v3438_v16, %v3388_v49  ;;  %v3452_v43 = vshrl.u32 %v3438_v16, 16 }
 0x55f   :  { %5155 = vmatprep.mubr.msk.bf16.mxu0 %vm5333_vm1, %v5326_v12  ;;  %v2778_v58 = vshrl.u32 %v2748_v45, 16 }
 0x560   :  { %5150 = vmatmul.mubr.msk.bf16.vlgmr.msra.gmra.mxu1 %vm1284_vm3, %v5725_v60  ;;  %5154 = vmatpush3.bf16.msra.mxu0 %v3441_v36  ;;  %v3445_v44 = vpack.i.b16 %v3444_v34, %v3443_v41  ;;  %v3453_v52 = vpack.i.b16 %v3452_v43, %v3451_v20  ;;  %v2774_v60 = vcombine.high %v2773_v17, %v5325_v2 }
 0x561   :  { %5165 = vmatprep.subr.bf16.mxu0 %v5326_v12  ;;  %5161 = vmatprep.mubr.msk.bf16.mxu1 %vm5333_vm1, %v5326_v12  ;;  %v2780_v53 = vpack.i.b16 %v2779_v48, %v2778_v58 }
 0x562   :  { %5160 = vmatpush3.bf16.msra.mxu1 %v3445_v44  ;;  %v2785_v28 = vshrl.u32 %v2774_v60, 16  ;;  %v2783_v5 = vpack.i.b16 %v2774_v60, %v2749_v55 }
 0x563   :  { %5171 = vmatprep.subr.bf16.mxu1 %v5326_v12 }
 0x564   :  { %v2786_v14 = vpack.i.b16 %v2785_v28, %v2784_v22 }
 0x566   :  { %5156 = vmatmul.mubr.msk.bf16.vlgmr.msra.gmra.mxu0 %vm1107_vm2, %v2777_v51 }
 0x567   :  { %5166 = vmatpush3.bf16.msra.mxu0 %v3449_v56  ;;  %v2644_v54 = vpop.permute.xlu1 %2643  ;;  %5167 = vmatprep.mubr.msk.bf16.mxu0 %vm5333_vm1, %v5326_v12 }
 0x568   :  { %5162 = vmatmul.mubr.msk.bf16.vlgmr.msra.gmra.mxu1 %vm1107_vm2, %v2780_v53  ;;  %5177 = vmatprep.subr.bf16.mxu0 %v5326_v12  ;;  %v2649_v62 = vcombine.low %v5782_v32, %v2644_v54  ;;  %v2650_v3 = vcombine.high %v5782_v32, %v2644_v54 }
 0x569   :  { %5172 = vmatpush3.bf16.msra.mxu1 %v3453_v52  ;;  %5173 = vmatprep.mubr.msk.bf16.mxu1 %vm5333_vm1, %v5326_v12 }
 0x56a   :  { %v2641_v63 = vpop.permute.xlu0 %2640  ;;  %5183 = vmatprep.subr.bf16.mxu1 %v5326_v12  ;;  %v2657_v6 = vrot.slane %v2649_v62, %v5444_v26  ;;  %v2664_v27 = vrot.slane %v2650_v3, %v5444_v26 }
 0x56b   :  { %v2647_v24 = vpop.permute.xlu1 %2646 }
 0x56c   :  { %v2665_v35 = vcombine.low %v2641_v63, %v2647_v24  ;;  %v2666_v4 = vcombine.high %v2641_v63, %v2647_v24 }
 0x56e   :  { %v2673_v10 = vrot.slane %v2665_v35, %v5444_v26  ;;  %v2680_v7 = vrot.slane %v2666_v4, %v5444_v26  ;;  %5168 = vmatmul.mubr.msk.bf16.vlgmr.msra.gmra.mxu0 %vm1107_vm2, %v2783_v5 }
 0x56f   :  { %5179 = vmatprep.mubr.msk.bf16.mxu0 %vm5333_vm1, %v5326_v12 }
 0x570   :  { %v2681_v29 = vcombine.low %v2657_v6, %v2673_v10  ;;  %v2682_v30 = vcombine.high %v2657_v6, %v2673_v10  ;;  %5174 = vmatmul.mubr.msk.bf16.vlgmr.msra.gmra.mxu1 %vm1107_vm2, %v2786_v14  ;;  %v2697_v37 = vcombine.low %v2664_v27, %v2680_v7  ;;  %v2698_v11 = vcombine.high %v2664_v27, %v2680_v7 }
 0x571   :  { %5185 = vmatprep.mubr.msk.bf16.mxu1 %vm5333_vm1, %v5326_v12 }
 0x572   :  { %v2689_v32 = vrot.slane %v2681_v29, %v5451_v38  ;;  %v2696_v9 = vrot.slane %v2682_v30, %v5451_v38  ;;  %v2705_v42 = vrot.slane %v2697_v37, %v5451_v38  ;;  %v2712_v50 = vrot.slane %v2698_v11, %v5451_v38 }
 0x574   :  { %v2717_v19 = vpack.c.bf16 %v2689_v32, %v2689_v32  ;;  %v2713_v21 = vcombine.high %v2689_v32, %v5326_v12  ;;  %v2719_v23 = vpack.c.bf16 %v2696_v9, %v2696_v9  ;;  %v2714_v0 = vcombine.high %v2696_v9, %v5326_v12 }
 0x575   :  { %v2721_v46 = vpack.c.bf16 %v2705_v42, %v2705_v42  ;;  %v2715_v25 = vcombine.high %v2705_v42, %v5326_v12  ;;  %v2723_v1 = vpack.c.bf16 %v2712_v50, %v2712_v50  ;;  %v2716_v40 = vcombine.high %v2712_v50, %v5326_v12 }
 0x576   :  { %3679 = vxpose.xlu0.c.b16.start.end [1/1] (short) (narrow) %v2717_v19, 16  ;;  %v2718_v13 = vpack.c.bf16 %v2713_v21, %v2713_v21  ;;  %v2720_v57 = vpack.c.bf16 %v2714_v0, %v2714_v0 }
 0x577   :  { %v2722_v59 = vpack.c.bf16 %v2715_v25, %v2715_v25  ;;  %v2724_v31 = vpack.c.bf16 %v2716_v40, %v2716_v40 }
 0x578   :  { %3695 = vxpose.xlu1.c.b16.start.end [1/1] (short) (narrow) %v2718_v13, 16 }
 0x57a   :  { %3711 = vxpose.xlu0.c.b16.start.end [1/1] (short) (narrow) %v2719_v23, 16 }
 0x57c   :  { %3743 = vxpose.xlu1.c.b16.start.end [1/1] (short) (narrow) %v2721_v46, 16 }
 0x57e   :  { %3727 = vxpose.xlu0.c.b16.start.end [1/1] (short) (narrow) %v2720_v57, 16 }
 0x580   :  { %3775 = vxpose.xlu1.c.b16.start.end [1/1] (short) (narrow) %v2723_v1, 16 }
 0x582   :  { %3759 = vxpose.xlu0.c.b16.start.end [1/1] (short) (narrow) %v2722_v59, 16 }
 0x586   :  { %3791 = vxpose.xlu0.c.b16.start.end [1/1] (short) (narrow) %v2724_v31, 16 }
 0x5d8   :  { %v3687_v33 = vpop.trf.xlu0 }
 0x5d9   :  { %v3811_v61 = vshrl.u32 %v3687_v33, 16 }
 0x5da   :  { %v3703_v15 = vpop.trf.xlu1 }
 0x5db   :  { %v3812_v39 = vshrl.u32 %v3703_v15, 16  ;;  %v5892_v16 = vpack.i.b16 %v3703_v15, %v3687_v33 }
 0x5dc   :  { %v3719_v47 = vpop.trf.xlu0 }
 0x5dd   :  { %v5896_v36 = vpack.i.b16 %v3812_v39, %v3811_v61  ;;  %v3819_v52 = vshrl.u32 %v3719_v47, 16 }
 0x5de   :  { %v3751_v49 = vpop.trf.xlu1 }
 0x5df   :  { %v3827_v41 = vshrl.u32 %v3751_v49, 16 }
 0x5e0   :  { %v3735_v18 = vpop.trf.xlu0 }
 0x5e1   :  { %v3820_v48 = vshrl.u32 %v3735_v18, 16  ;;  %v3817_v54 = vpack.i.b16 %v3735_v18, %v3719_v47 }
 0x5e2   :  { %v3783_v43 = vpop.trf.xlu1 }
 0x5e3   :  { %v3835_v55 = vshrl.u32 %v3783_v43, 16  ;;  %v3821_v22 = vpack.i.b16 %v3820_v48, %v3819_v52 }
 0x5e4   :  { %v5894_v17 = vpop.f32.mrf.mxu0  ;;  %v3767_v20 = vpop.trf.xlu0 }
 0x5e5   :  { %v3828_v34 = vshrl.u32 %v3767_v20, 16  ;;  %v5898_v56 = vpack.i.b16 %v3767_v20, %v3751_v49 }
 0x5e6   :  { %v5133_v44 = vpop.f32.mrf.mxu0  ;;  %v5900_v45 = vpop.f32.mrf.mxu1 }
 0x5e7   :  { %v3829_v51 = vpack.i.b16 %v3828_v34, %v3827_v41  ;;  %v3840_v58 = vcombine.high %v5892_v16, %v5898_v56 }
 0x5e8   :  { %v5904_v53 = vpop.f32.mrf.mxu0  ;;  %v5139_v60 = vpop.f32.mrf.mxu1 }
 0x5e9   :  { %v3908_v62 = vcombine.high %v5896_v36, %v3829_v51  ;;  %v3799_v63 = vpop.trf.xlu0  ;;  %v5910_v10 = vrot.slane %v3840_v58, %v5444_v26  ;;  %v3907_v48 = vcombine.low %v5896_v36, %v3829_v51  ;;  %v3839_v60 = vcombine.low %v5892_v16, %v5898_v56 }
 0x5ea   :  { %v5134_v28 = vpop.f32.mrf.mxu0  ;;  %v5907_v24 = vpop.f32.mrf.mxu1  ;;  %v3836_v3 = vshrl.u32 %v3799_v63, 16  ;;  %v3833_v35 = vpack.i.b16 %v3799_v63, %v3783_v43 }
 0x5eb   :  { %v5916_v27 = vrot.slane %v3908_v62, %v5444_v26  ;;  %v3915_v62 = vrot.slane %v3907_v48, %v5444_v26  ;;  %v3847_v28 = vrot.slane %v3839_v60, %v5444_v26 }
 0x5ec   :  { %v5140_v4 = vpop.f32.mrf.mxu1  ;;  %v3837_v5 = vpack.i.b16 %v3836_v3, %v3835_v55  ;;  %v3856_v6 = vcombine.high %v3817_v54, %v3833_v35  ;;  %v3855_v55 = vcombine.low %v3817_v54, %v3833_v35 }
 0x5ee   :  { %v5913_v7 = vrot.slane %v3856_v6, %v5444_v26  ;;  %v3924_v14 = vcombine.high %v3821_v22, %v3837_v5  ;;  %v3923_v58 = vcombine.low %v3821_v22, %v3837_v5  ;;  %v3863_v3 = vrot.slane %v3855_v55, %v5444_v26 }
 0x5f0   :  { %v5919_v29 = vrot.slane %v3924_v14, %v5444_v26  ;;  %v3887_v30 = vcombine.low %v5910_v10, %v5913_v7  ;;  %v3888_v32 = vcombine.high %v5910_v10, %v5913_v7  ;;  %v3931_v63 = vrot.slane %v3923_v58, %v5444_v26 }
 0x5f1   :  { %v3871_v6 = vcombine.low %v3847_v28, %v3863_v3 }
 0x5f2   :  { %v3955_v37 = vcombine.low %v5916_v27, %v5919_v29  ;;  %v3956_v19 = vcombine.high %v5916_v27, %v5919_v29  ;;  %v3939_v4 = vcombine.low %v3915_v62, %v3931_v63  ;;  %v3940_v35 = vcombine.high %v3915_v62, %v3931_v63 }
 0x5f3   :  { %v3879_v36 = vrot.slane %v3871_v6, %v5451_v38 }
 0x5f4   :  { %v3947_v14 = vrot.slane %v3939_v4, %v5451_v38 }
 0x5f5   :  { %v3903_v5 = vcombine.high %v3879_v36, %v5325_v2 }
 0x5f6   :  { %v3971_v54 = vcombine.high %v3947_v14, %v5325_v2 }
 0x61e   :  { %v5929_v21 = vpop.f32.mrf.mxu0 }
 0x620   :  { %v5145_v9 = vpop.f32.mrf.mxu0  ;;  %v5931_v11 = vpop.f32.mrf.mxu1 }
 0x621   :  { %v3872_v9 = vcombine.high %v3847_v28, %v3863_v3 }
 0x622   :  { %v5933_v13 = vpop.f32.mrf.mxu0  ;;  %v5151_v42 = vpop.f32.mrf.mxu1 }
 0x623   :  { %v3954_v42 = vrot.slane %v3940_v35, %v5451_v38 }
 0x624   :  { %v5146_v23 = vpop.f32.mrf.mxu0  ;;  %v5935_v0 = vpop.f32.mrf.mxu1 }
 0x625   :  { %v3886_v23 = vrot.slane %v3872_v9, %v5451_v38 }
 0x626   :  { %v5152_v46 = vpop.f32.mrf.mxu1  ;;  %v3492_v50 = vpop.f32.mrf.mxu0 }
 0x627   :  { %v5937_v57 = vmul.f32 0.25, %v3492_v50  ;;  %v3972_v46 = vcombine.high %v3954_v42, %v5325_v2  ;;  %v3904_v50 = vcombine.high %v3886_v23, %v5325_v2 }
 0x628   :  { %v5157_v25 = vpop.f32.mrf.mxu0  ;;  %v3535_v1 = vpop.f32.mrf.mxu1 }
 0x629   :  { %v5939_v59 = vmul.f32 0.25, %v3535_v1  ;;  %v3631_v40 = vsel %vm1284_vm3, %v5937_v57, -inf  ;;  %v3963_v25 = vrot.slane %v3955_v37, %v5451_v38  ;;  %v3895_v1 = vrot.slane %v3887_v30, %v5451_v38 }
 0x62a   :  { %v3495_v31 = vpop.f32.mrf.mxu0  ;;  %v5163_v33 = vpop.f32.mrf.mxu1  ;;  %3632 = vmax.xlane.f32.xlu0 %v3631_v40  ;;  %v3902_v37 = vrot.slane %v3888_v32, %v5451_v38 }
 0x62b   :  { %v3634_v15 = vsel %vm1284_vm3, %v5939_v59, -inf  ;;  %v3973_v40 = vcombine.high %v3963_v25, %v5325_v2  ;;  %v3905_v31 = vcombine.high %v3895_v1, %v5325_v2  ;;  %v3970_v33 = vrot.slane %v3956_v19, %v5451_v38 }
 0x62c   :  { %v5158_v47 = vpop.f32.mrf.mxu0  ;;  %v3538_v49 = vpop.f32.mrf.mxu1  ;;  %3635 = vmax.xlane.f32.xlu1 %v3634_v15  ;;  %v3906_v35 = vcombine.high %v3902_v37, %v5325_v2 }
 0x62e   :  { %v5164_v18 = vpop.f32.mrf.mxu1  ;;  %v3578_v61 = vpop.f32.mrf.mxu0 }
 0x62f   :  { %v3629_v51 = vmul.f32 0.25, %v3578_v61 }
 0x630   :  { %v5169_v39 = vpop.f32.mrf.mxu0  ;;  %v3621_v41 = vpop.f32.mrf.mxu1 }
 0x631   :  { %v3630_v22 = vmul.f32 0.25, %v3621_v41  ;;  %v3637_v16 = vsel %vm1284_vm3, %v3629_v51, -inf }
 0x632   :  { %v3581_v20 = vpop.f32.mrf.mxu0  ;;  %v5175_v34 = vpop.f32.mrf.mxu1 }
 0x633   :  { %v3640_v56 = vsel %vm1284_vm3, %v3630_v22, -inf }
 0x634   :  { %v5170_v43 = vpop.f32.mrf.mxu0  ;;  %v3624_v44 = vpop.f32.mrf.mxu1 }
 0x636   :  { %v5176_v52 = vpop.f32.mrf.mxu1 }
 0x657   :  { %3991 = vxpose.xlu0.c.b16.start.end [1/1] (short) (narrow) %v3947_v14, 16 }
 0x659   :  { %3975 = vxpose.xlu1.c.b16.start.end [1/1] (short) (narrow) %v3879_v36, 16 }
 0x664   :  { %3638 = vmax.xlane.f32.xlu0 %v3637_v16 }
 0x666   :  { %3641 = vmax.xlane.f32.xlu1 %v3640_v56 }
 0x691   :  { %4023 = vxpose.xlu0.c.b16.start.end [1/1] (short) (narrow) %v3971_v54, 16 }
 0x693   :  { %4007 = vxpose.xlu1.c.b16.start.end [1/1] (short) (narrow) %v3903_v5, 16  ;;  %v3974_v5 = vcombine.high %v3970_v33, %v5325_v2 }
 0x695   :  { %4055 = vxpose.xlu0.c.b16.start.end [1/1] (short) (narrow) %v3954_v42, 16 }
 0x697   :  { %4039 = vxpose.xlu1.c.b16.start.end [1/1] (short) (narrow) %v3886_v23, 16 }
 0x699   :  { %4087 = vxpose.xlu0.c.b16.start.end [1/1] (short) (narrow) %v3972_v46, 16 }
 0x69b   :  { %4071 = vxpose.xlu1.c.b16.start.end [1/1] (short) (narrow) %v3904_v50, 16 }
 0x69d   :  { %4119 = vxpose.xlu0.c.b16.start.end [1/1] (short) (narrow) %v3963_v25, 16 }
 0x69f   :  { %4103 = vxpose.xlu1.c.b16.start.end [1/1] (short) (narrow) %v3895_v1, 16 }
 0x6a1   :  { %4151 = vxpose.xlu0.c.b16.start.end [1/1] (short) (narrow) %v3973_v40, 16 }
 0x6a3   :  { %4135 = vxpose.xlu1.c.b16.start.end [1/1] (short) (narrow) %v3905_v31, 16 }
 0x6a5   :  { %4183 = vxpose.xlu0.c.b16.start.end [1/1] (short) (narrow) %v3970_v33, 16 }
 0x6a7   :  { %4167 = vxpose.xlu1.c.b16.start.end [1/1] (short) (narrow) %v3902_v37, 16 }
 0x6b3   :  { %v3633_v30 = vpop.xlane.xlu0 %3632 }
 0x6b4   :  { %v3643_v15 = vsub.f32 %v5937_v57, %v3633_v30 }
 0x6b5   :  { %v3636_v47 = vpop.xlane.xlu1 %3635 }
 0x6b6   :  { %v3647_v49 = vmul.f32 1.442695, %v3643_v15  ;;  %v3644_v18 = vsub.f32 %v5939_v59, %v3636_v47 }
 0x6b8   :  { %5259 = vpow2.f32 %v3647_v49  ;;  %v3649_v61 = vmul.f32 1.442695, %v3644_v18 }
 0x6b9   :  { %v3999_v10 = vpop.trf.xlu0 }
 0x6ba   :  { %5261 = vpow2.f32 %v3649_v61 }
 0x6bb   :  { %v3983_v7 = vpop.trf.xlu1 }
 0x6c5   :  { %v5260_v39 = vpop.eup %5259 }
 0x6c6   :  { %v3655_v27 = vsel %vm1284_vm3, %v5260_v39, 0.0 }
 0x6c7   :  { %v5262_v29 = vpop.eup %5261  ;;  %3656 = vadd.xlane.f32.xlu1 %v3655_v27 }
 0x6c8   :  { %v3658_v19 = vsel %vm1284_vm3, %v5262_v29, 0.0 }
 0x6c9   :  { %3659 = vadd.xlane.f32.xlu0 %v3658_v19 }
 0x6ed   :  { %v3639_v32 = vpop.xlane.xlu0 %3638 }
 0x6ee   :  { %v3645_v41 = vsub.f32 %v3629_v51, %v3639_v32 }
 0x6ef   :  { %v3642_v57 = vpop.xlane.xlu1 %3641 }
 0x6f0   :  { %v3651_v20 = vmul.f32 1.442695, %v3645_v41  ;;  %v3646_v34 = vsub.f32 %v3630_v22, %v3642_v57 }
 0x6f2   :  { %5263 = vpow2.f32 %v3651_v20  ;;  %v3653_v59 = vmul.f32 1.442695, %v3646_v34 }
 0x6f3   :  { %v4031_v43 = vpop.trf.xlu0 }
 0x6f4   :  { %5265 = vpow2.f32 %v3653_v59 }
 0x6f5   :  { %v4015_v44 = vpop.trf.xlu1 }
 0x6f7   :  { %v4063_v52 = vpop.trf.xlu0 }
 0x6f8   :  { %v4281_v48 = vcombine.low %v3999_v10, %v4063_v52 }
 0x6f9   :  { %v4047_v58 = vpop.trf.xlu1 }
 0x6fa   :  { %v4231_v60 = vcombine.low %v3983_v7, %v4047_v58  ;;  %v5985_v28 = vrot.slane %v4281_v48, %v5444_v26 }
 0x6fb   :  { %v4095_v55 = vpop.trf.xlu0 }
 0x6fc   :  { %v4289_v62 = vcombine.low %v4031_v43, %v4095_v55  ;;  %v4238_v14 = vrot.slane %v4231_v60, %v5444_v26 }
 0x6fd   :  { %v4079_v63 = vpop.trf.xlu1 }
 0x6fe   :  { %v5988_v3 = vrot.slane %v4289_v62, %v5444_v26  ;;  %v4239_v4 = vcombine.low %v4015_v44, %v4079_v63 }
 0x6ff   :  { %v5990_v6 = vpop.eup %5263  ;;  %v4127_v42 = vpop.trf.xlu0 }
 0x700   :  { %v4313_v36 = vcombine.low %v5985_v28, %v5988_v3  ;;  %v4246_v51 = vrot.slane %v4239_v4, %v5444_v26  ;;  %v3661_v22 = vsel %vm1284_vm3, %v5990_v6, 0.0 }
 0x701   :  { %v5998_v16 = vpop.eup %5265  ;;  %3662 = vadd.xlane.f32.xlu1 %v3661_v22  ;;  %v4111_v9 = vpop.trf.xlu1 }
 0x702   :  { %v4263_v56 = vcombine.low %v4238_v14, %v4246_v51  ;;  %v3664_v54 = vsel %vm1284_vm3, %v5998_v16, 0.0  ;;  %v4320_v41 = vrot.slane %v4313_v36, %v5451_v38 }
 0x703   :  { %3665 = vadd.xlane.f32.xlu0 %v3664_v54  ;;  %v4159_v23 = vpop.trf.xlu0 }
 0x704   :  { %v4270_v19 = vrot.slane %v4263_v56, %v5451_v38 }
 0x705   :  { %v4143_v2 = vpop.trf.xlu1 }
 0x709   :  { %v4175_v46 = vpop.trf.xlu1 }
 0x70a   :  { %v4247_v33 = vcombine.low %v4111_v9, %v4175_v46 }
 0x70c   :  { %v4254_v49 = vrot.slane %v4247_v33, %v5444_v26 }
 0x72e   :  { %4199 = vxpose.xlu1.c.b16.start.end [1/1] (short) (narrow) %v3906_v35, 16 }
 0x730   :  { %4215 = vxpose.xlu0.c.b16.start.end [1/1] (short) (narrow) %v3974_v5, 16 }
 0x734   :  { %2217 = vxpose.xlu0.b32.start [1/2] (short) (narrow) %v5900_v45, 8  ;;  %v4191_v45 = vpop.trf.xlu0 }
 0x735   :  { %v4297_v30 = vcombine.low %v4127_v42, %v4191_v45 }
 0x738   :  { %2185 = vxpose.xlu1.b32.start [1/2] (short) (narrow) %v5894_v17, 8  ;;  %2218 = vxpose.xlu0.b32.end [2/2] (short) (narrow) %v5907_v24, 8 }
 0x73c   :  { %2186 = vxpose.xlu1.b32.end [2/2] (short) (narrow) %v5904_v53, 8  ;;  %2249 = vxpose.xlu0.b32.start [1/2] (short) (narrow) %v5929_v21, 8 }
 0x740   :  { %2281 = vxpose.xlu1.b32.start [1/2] (short) (narrow) %v5931_v11, 8  ;;  %2250 = vxpose.xlu0.b32.end [2/2] (short) (narrow) %v5933_v13, 8 }
 0x744   :  { %2282 = vxpose.xlu1.b32.end [2/2] (short) (narrow) %v5935_v0, 8 }
 0x750   :  { %v3657_v50 = vpop.xlane.xlu1 %3656 }
 0x751   :  { %5267 = vrcp.f32 %v3657_v50 }
 0x752   :  { %v3660_v17 = vpop.xlane.xlu0 %3659 }
 0x753   :  { %5269 = vrcp.f32 %v3660_v17 }
 0x75e   :  { %v5268_v24 = vpop.eup %5267 }
 0x75f   :  { %v3671_v53 = vmul.f32 %v5268_v24, %v5260_v39  ;;  %v4304_v39 = vrot.slane %v4297_v30, %v5444_v26 }
 0x760   :  { %v5270_v25 = vpop.eup %5269 }
 0x761   :  { %v3675_v21 = vpack.c.bf16 %v3671_v53, %v3671_v53  ;;  %v3672_v1 = vmul.f32 %v5270_v25, %v5262_v29 }
 0x763   :  { %v4347_v11 = vsel %vm1284_vm3, %v3675_v21, 0  ;;  %v3676_v40 = vpack.c.bf16 %v3672_v1, %v3672_v1 }
 0x764   :  { %5178 = vmatpush3.bf16.xpose.msra.mxu0 %v4347_v11 }
 0x765   :  { %v4394_v13 = vsel %vm1284_vm3, %v3676_v40, 0  ;;  %5189 = vmatprep.subr.bf16.mxu0 %v5326_v12 }
 0x766   :  { %5184 = vmatpush3.bf16.xpose.msra.mxu1 %v4394_v13 }
 0x767   :  { %5195 = vmatprep.subr.bf16.mxu1 %v5326_v12 }
 0x78a   :  { %v3663_v0 = vpop.xlane.xlu1 %3662 }
 0x78b   :  { %5271 = vrcp.f32 %v3663_v0 }
 0x78c   :  { %v3666_v31 = vpop.xlane.xlu0 %3665 }
 0x78d   :  { %5273 = vrcp.f32 %v3666_v31 }
 0x790   :  { %v4207_v37 = vpop.trf.xlu1 }
 0x791   :  { %v4255_v15 = vcombine.low %v4143_v2, %v4207_v37 }
 0x792   :  { %v4223_v47 = vpop.trf.xlu0 }
 0x793   :  { %v4262_v18 = vrot.slane %v4255_v15, %v5444_v26  ;;  %v4305_v61 = vcombine.low %v4159_v23, %v4223_v47 }
 0x795   :  { %v4271_v27 = vcombine.low %v4254_v49, %v4262_v18  ;;  %v4312_v29 = vrot.slane %v4305_v61, %v5444_v26 }
 0x797   :  { %v4278_v10 = vrot.slane %v4271_v27, %v5451_v38  ;;  %v4321_v7 = vcombine.low %v4304_v39, %v4312_v29 }
 0x798   :  { %v5272_v32 = vpop.eup %5271 }
 0x799   :  { %v4279_v57 = vcombine.low %v4270_v19, %v4278_v10  ;;  %v4280_v20 = vcombine.high %v4270_v19, %v4278_v10  ;;  %v4328_v34 = vrot.slane %v4321_v7, %v5451_v38  ;;  %v3673_v59 = vmul.f32 %v5272_v32, %v5990_v6 }
 0x79a   :  { %v5274_v43 = vpop.eup %5273 }
 0x79b   :  { %v4329_v44 = vcombine.low %v4320_v41, %v4328_v34  ;;  %v4330_v52 = vcombine.high %v4320_v41, %v4328_v34  ;;  %v4334_v48 = vshrl.u32 %v4279_v57, 16  ;;  %v4340_v58 = vshrl.u32 %v4280_v20, 16 }
 0x79c   :  { %v3677_v60 = vpack.c.bf16 %v3673_v59, %v3673_v59  ;;  %v3674_v55 = vmul.f32 %v5274_v43, %v5998_v16 }
 0x79d   :  { %v4333_v62 = vpack.i.b16 %v4329_v44, %v4279_v57  ;;  %v4335_v63 = vshrl.u32 %v4329_v44, 16  ;;  %v4339_v28 = vpack.i.b16 %v4330_v52, %v4280_v20  ;;  %v4341_v3 = vshrl.u32 %v4330_v52, 16 }
 0x79e   :  { %v4441_v4 = vsel %vm1284_vm3, %v3677_v60, 0  ;;  %v3678_v14 = vpack.c.bf16 %v3674_v55, %v3674_v55 }
 0x79f   :  { %5180 = vmatmul.mubr.msk.bf16.vlgmr.msra.gmra.mxu0 %vm1284_vm3, %v4333_v62  ;;  %v4336_v36 = vpack.i.b16 %v4335_v63, %v4334_v48  ;;  %v4342_v51 = vpack.i.b16 %v4341_v3, %v4340_v58 }
 0x7a0   :  { %5190 = vmatpush3.bf16.xpose.msra.mxu0 %v4441_v4  ;;  %v4488_v6 = vsel %vm1284_vm3, %v3678_v14, 0  ;;  %5191 = vmatprep.mubr.msk.bf16.mxu0 %vm5333_vm1, %v5326_v12 }
 0x7a1   :  { %5186 = vmatmul.mubr.msk.bf16.vlgmr.msra.gmra.mxu1 %vm1284_vm3, %v4336_v36  ;;  %5201 = vmatprep.subr.bf16.mxu0 %v5326_v12 }
 0x7a2   :  { %5196 = vmatpush3.bf16.xpose.msra.mxu1 %v4488_v6  ;;  %5197 = vmatprep.mubr.msk.bf16.mxu1 %vm5333_vm1, %v5326_v12 }
 0x7a7   :  { %5192 = vmatmul.mubr.msk.bf16.vlgmr.msra.gmra.mxu0 %vm1284_vm3, %v4339_v28  ;;  %v5239_v28 = vld [vmem:[%s6143_s3 + $0x18] sm:$0xff]  }
 0x7a8   :  { %5209 = vmatprep.mubr.msk.bf16.mxu0 %vm5333_vm1, %v5326_v12  ;;  %5202 = vmatpush3.bf16.msra.mxu0 %v5239_v28 }
 0x7a9   :  { %5198 = vmatmul.mubr.msk.bf16.vlgmr.msra.gmra.mxu1 %vm1284_vm3, %v4342_v51  ;;  %5203 = vmatprep.subr.bf16.mxu0 %v5326_v12 }
 0x7b0   :  { %v2233_v22 = vpop.trf.xlu0 }
 0x7b4   :  { %v2201_v16 = vpop.trf.xlu1 }
 0x7b8   :  { %v2265_v42 = vpop.trf.xlu0 }
 0x7b9   :  { %v2313_v17 = vcombine.low %v2201_v16, %v2265_v42  ;;  %v2314_v24 = vcombine.high %v2201_v16, %v2265_v42 }
 0x7bb   :  { %v2321_v13 = vrot.slane %v2313_v17, %v5444_v26  ;;  %v2328_v0 = vrot.slane %v2314_v24, %v5444_v26 }
 0x7bc   :  { %v2297_v2 = vpop.trf.xlu1 }
 0x7bd   :  { %v2329_v53 = vcombine.low %v2233_v22, %v2297_v2  ;;  %v2330_v25 = vcombine.high %v2233_v22, %v2297_v2 }
 0x7bf   :  { %v2337_v31 = vrot.slane %v2329_v53, %v5444_v26  ;;  %v2344_v33 = vrot.slane %v2330_v25, %v5444_v26 }
 0x7c1   :  { %v2345_v47 = vcombine.low %v2321_v13, %v2337_v31  ;;  %v2346_v49 = vcombine.high %v2321_v13, %v2337_v31  ;;  %v2361_v18 = vcombine.low %v2328_v0, %v2344_v33  ;;  %v2362_v61 = vcombine.high %v2328_v0, %v2344_v33  ;;  %v5241_v13 = vld [vmem:[%s6143_s3 + $0x8] sm:$0xff]  }
 0x7c3   :  { %v2353_v39 = vrot.slane %v2345_v47, %v5451_v38  ;;  %v2360_v27 = vrot.slane %v2346_v49, %v5451_v38  ;;  %v2369_v29 = vrot.slane %v2361_v18, %v5451_v38  ;;  %v2376_v19 = vrot.slane %v2362_v61, %v5451_v38 }
 0x7c5   :  { %v2381_v10 = vcombine.low %v2353_v39, %v2360_v27  ;;  %v5040_v7 = vcombine.high %v2353_v39, %v2360_v27  ;;  %v2397_v32 = vcombine.low %v2369_v29, %v2376_v19  ;;  %v5041_v41 = vcombine.high %v2369_v29, %v2376_v19 }
 0x7c7   :  { %v2388_v57 = vrot.slane %v2381_v10, %v5444_v26  ;;  %v2396_v20 = vrot.slane %v5040_v7, %v5444_v26  ;;  %v2404_v34 = vrot.slane %v2397_v32, %v5444_v26  ;;  %v2412_v59 = vrot.slane %v5041_v41, %v5444_v26 }
 0x7c9   :  { %v2414_v43 = vcombine.high %v2388_v57, %v2396_v20  ;;  %v2430_v44 = vcombine.high %v2404_v34, %v2412_v59  ;;  %v2413_v60 = vcombine.low %v2388_v57, %v2396_v20  ;;  %v2429_v55 = vcombine.low %v2404_v34, %v2412_v59 }
 0x7cb   :  { %v2428_v52 = vrot.slane %v2414_v43, %v5451_v38  ;;  %v2444_v48 = vrot.slane %v2430_v44, %v5451_v38  ;;  %v6055_v62 = vrot.slane %v2413_v60, %v5451_v38  ;;  %v6058_v63 = vrot.slane %v2429_v55, %v5451_v38 }
 0x7cd   :  { %v2447_v58 = vcombine.low %v2428_v52, %v2444_v48  ;;  %v2446_v3 = vcombine.high %v6055_v62, %v6058_v63  ;;  %v2448_v4 = vcombine.high %v2428_v52, %v2444_v48  ;;  %v2445_v57 = vcombine.low %v6055_v62, %v6058_v63  ;;  %v5056_v63 = vld [vmem:[%s6144_s4] ss:$0 sm:$0xff] }
 0x85f   :  { %v4383_v56 = vpop.f32.mrf.mxu0 }
 0x860   :  { %4531 = vxpose.xlu0.b32.start [1/2] (short) (narrow) %v4383_v56, 8 }
 0x861   :  { %v5181_v54 = vpop.f32.mrf.mxu0  ;;  %v4430_v35 = vpop.f32.mrf.mxu1 }
 0x862   :  { %4563 = vxpose.xlu1.b32.start [1/2] (short) (narrow) %v4430_v35, 8 }
 0x863   :  { %v4386_v5 = vpop.f32.mrf.mxu0  ;;  %v5187_v9 = vpop.f32.mrf.mxu1 }
 0x864   :  { %4532 = vxpose.xlu0.b32.end [2/2] (short) (narrow) %v4386_v5, 8 }
 0x865   :  { %v5182_v23 = vpop.f32.mrf.mxu0  ;;  %v4433_v46 = vpop.f32.mrf.mxu1 }
 0x866   :  { %4564 = vxpose.xlu1.b32.end [2/2] (short) (narrow) %v4433_v46, 8 }
 0x867   :  { %v5188_v45 = vpop.f32.mrf.mxu1  ;;  %v4477_v50 = vpop.f32.mrf.mxu0 }
 0x868   :  { %4595 = vxpose.xlu0.b32.start [1/2] (short) (narrow) %v4477_v50, 8  ;;  %v5240_v50 = vld [vmem:[%s6143_s3 + $0x10] sm:$0xff]  }
 0x869   :  { %v5193_v21 = vpop.f32.mrf.mxu0  ;;  %v4524_v1 = vpop.f32.mrf.mxu1  ;;  %5204 = vmatpush3.bf16.msra.mxu0 %v5240_v50 }
 0x86a   :  { %4627 = vxpose.xlu1.b32.start [1/2] (short) (narrow) %v4524_v1, 8  ;;  %5205 = vmatprep.subr.bf16.mxu0 %v5326_v12 }
 0x86b   :  { %v4480_v11 = vpop.f32.mrf.mxu0  ;;  %v5199_v40 = vpop.f32.mrf.mxu1 }
 0x86c   :  { %4596 = vxpose.xlu0.b32.end [2/2] (short) (narrow) %v4480_v11, 8 }
 0x86d   :  { %v5194_v37 = vpop.f32.mrf.mxu0  ;;  %v4527_v30 = vpop.f32.mrf.mxu1  ;;  %5206 = vmatpush3.bf16.msra.mxu0 %v5241_v13 }
 0x86e   :  { %4628 = vxpose.xlu1.b32.end [2/2] (short) (narrow) %v4527_v30, 8  ;;  %5207 = vmatprep.subr.bf16.mxu0 %v5326_v12 }
 0x86f   :  { %v5200_v15 = vpop.f32.mrf.mxu1 }
 0x88c   :  { %2454 = vrot.lane.b32.xlu1 %v2447_v58, %s5334_s21 }
 0x895   :  { %2450 = vrot.lane.b32.xlu0 %v2446_v3, %s5335_s24 }
 0x899   :  { %2458 = vrot.lane.b32.xlu0 %v2448_v4, %s5336_s25 }
 0x8dc   :  { %v4547_v14 = vpop.trf.xlu0 }
 0x8de   :  { %v4579_v36 = vpop.trf.xlu1 }
 0x8e4   :  { %v4611_v51 = vpop.trf.xlu0 }
 0x8e5   :  { %v4659_v6 = vcombine.low %v4547_v14, %v4611_v51  ;;  %v4660_v22 = vcombine.high %v4547_v14, %v4611_v51 }
 0x8e6   :  { %v4643_v16 = vpop.trf.xlu1 }
 0x8e7   :  { %v4675_v56 = vcombine.low %v4579_v36, %v4643_v16  ;;  %v4676_v54 = vcombine.high %v4579_v36, %v4643_v16  ;;  %v4667_v35 = vrot.slane %v4659_v6, %v5444_v26  ;;  %v4674_v5 = vrot.slane %v4660_v22, %v5444_v26  ;;  %v5279_v36 = vld [vmem:[%s6140_s0] sm:$0xff] }
 0x8e9   :  { %v4683_v9 = vrot.slane %v4675_v56, %v5444_v26  ;;  %v4690_v42 = vrot.slane %v4676_v54, %v5444_v26  ;;  %v5280_v54 = vld [vmem:[%s6140_s0 + $0x8] sm:$0xff] }
 0x8eb   :  { %v4691_v2 = vcombine.low %v4667_v35, %v4683_v9  ;;  %v4692_v23 = vcombine.high %v4667_v35, %v4683_v9  ;;  %v4707_v46 = vcombine.low %v4674_v5, %v4690_v42  ;;  %v4708_v45 = vcombine.high %v4674_v5, %v4690_v42 }
 0x8ed   :  { %v4699_v17 = vrot.slane %v4691_v2, %v5451_v38  ;;  %v4706_v24 = vrot.slane %v4692_v23, %v5451_v38  ;;  %v4715_v53 = vrot.slane %v4707_v46, %v5451_v38  ;;  %v4722_v25 = vrot.slane %v4708_v45, %v5451_v38 }
 0x8ef   :  { %v4727_v21 = vcombine.low %v4699_v17, %v4706_v24  ;;  %v5054_v1 = vcombine.high %v4699_v17, %v4706_v24  ;;  %v4743_v11 = vcombine.low %v4715_v53, %v4722_v25  ;;  %v5055_v40 = vcombine.high %v4715_v53, %v4722_v25 }
 0x8f1   :  { %v4734_v0 = vrot.slane %v4727_v21, %v5444_v26  ;;  %v4742_v31 = vrot.slane %v5054_v1, %v5444_v26  ;;  %v4750_v33 = vrot.slane %v4743_v11, %v5444_v26  ;;  %v4758_v37 = vrot.slane %v5055_v40, %v5444_v26  ;;  %v5242_v26 = vld [vmem:[%s6143_s3] sm:$0xff]  }
 0x8f2   :  { %5208 = vmatpush3.bf16.msra.mxu0 %v5242_v26 }
 0x8f3   :  { %v4759_v30 = vcombine.low %v4734_v0, %v4742_v31  ;;  %v4775_v15 = vcombine.low %v4750_v33, %v4758_v37  ;;  %v4760_v47 = vcombine.high %v4734_v0, %v4742_v31  ;;  %v4776_v49 = vcombine.high %v4750_v33, %v4758_v37 }
 0x8f5   :  { %v4767_v18 = vrot.slane %v4759_v30, %v5451_v38  ;;  %v4783_v61 = vrot.slane %v4775_v15, %v5451_v38  ;;  %v4774_v27 = vrot.slane %v4760_v47, %v5451_v38  ;;  %v4790_v29 = vrot.slane %v4776_v49, %v5451_v38  ;;  %v5062_v47 = vld [vmem:[%s6145_s5] ss:$0 sm:$0xff]  ;;  %s5337_s5 = smov [#allocation2]  }
 0x8f7   :  { %v4792_v39 = vcombine.high %v4767_v18, %v4783_v61  ;;  %v4791_v19 = vcombine.low %v4767_v18, %v4783_v61  ;;  %v4793_v10 = vcombine.low %v4774_v27, %v4790_v29  ;;  %v4794_v7 = vcombine.high %v4774_v27, %v4790_v29  ;;  %v5063_v18 = vld [vmem:[%s6146_s6] ss:$0 sm:$0xff]  ;;  %s4998_s6 = sshll.u32 %s5337_s5, 4  ;;  %s4999_s6 = int_to_ptr.vmem [resolvable:$true] %s4998_s6 }
 0x8f8   :  { %s5281_s1 = scalar_lea.vmem %s4999_s6, 256  ;;  %p5286_p1 = scmp.lt.s32.totalorder %s4999_s6, %s4999_s6 }
 0x8f9   :  { %4796 = vrot.lane.b32.xlu1 %v4792_v39, %s5335_s24  ;;  %p5282_p0 = scmp.ne.s32.totalorder %s4999_s6, %s5281_s1  ;;  %p5287_p2 = scmp.lt.s32.totalorder %s5281_s1, %s5281_s1 }
 0x8fb   :  { %p5288_p3 = por %p5287_p2, %p5286_p1 }
 0x8fd   :  { %4800 = vrot.lane.b32.xlu1 %v4793_v10, %s5334_s21  ;;  %p5289_p4 = pnand %p5288_p3, %p5282_p0 }
 0x8fe   :  { %v2455_v41 = vpop.permute.xlu1 %2454 }
 0x901   :  { %4804 = vrot.lane.b32.xlu1 %v4794_v7, %s5336_s25 }
 0x907   :  { %v2451_v32 = vpop.permute.xlu0 %2450 }
 0x908   :  { %v2461_v20 = vsel %vm1107_vm2, %v2445_v57, %v2451_v32 }
 0x909   :  { %v2462_v59 = vsel %vm70_vm0, %v2461_v20, %v2455_v41 }
 0x90b   :  { %v2459_v34 = vpop.permute.xlu0 %2458 }
 0x90c   :  { %v2464_v44 = vsel %vm2463_vm4, %v2462_v59, %v2459_v34 }
 0x90d   :  { %vm4810_vm5 = vcmp.ne.f32.partialorder %v2464_v44, %v2464_v44 }
 0x90e   :  { %v4812_v55 = vsel %vm4810_vm5, 0.0, %v2464_v44 }
 0x96b   :  { %v4797_v38 = vpop.permute.xlu1 %4796 }
 0x96c   :  { %v4807_v52 = vsel %vm1107_vm2, %v4791_v19, %v4797_v38 }
 0x96f   :  { %v4801_v43 = vpop.permute.xlu1 %4800 }
 0x970   :  { %v4808_v48 = vsel %vm70_vm0, %v4807_v52, %v4801_v43 }
 0x973   :  { %v4805_v58 = vpop.permute.xlu1 %4804 }
 0x974   :  { %v4809_v60 = vsel %vm2463_vm4, %v4808_v48, %v4805_v58 }
 0x975   :  { %vm4811_vm6 = vcmp.ne.f32.partialorder %v4809_v60, %v4809_v60 }
 0x976   :  { %v4813_v28 = vsel %vm4811_vm6, 0.0, %v4809_v60 }
 0x977   :  { %v4814_v62 = vpack.c.bf16 %v4813_v28, %v4812_v55 }
 0x979   :  { %5210 = vmatmul.mubr.msk.bf16.vlgmr.msra.gmra.mxu0 %vm4854_vm7, %v4814_v62 }
 0xa39   :  { %v4892_v3 = vpop.f32.mrf.mxu0 }
 0xa3a   :  { %v4893_v4 = vadd.f32 %v5056_v63, %v4892_v3 }
 0xa3b   :  { %v5211_v14 = vpop.f32.mrf.mxu0 }
 0xa3c   :  { %v4899_v51 = vadd.f32 %v5279_v36, %v4893_v4 }
 0xa3d   :  { %v4895_v6 = vpop.f32.mrf.mxu0 }
 0xa3e   :  { %4946 = vst.msk [vmem:[#allocation2] sm:$0xff] %vm70_vm0, %v4899_v51  ;;  %v4896_v22 = vadd.f32 %v5056_v63, %v4895_v6  ;;  %v4901_v16 = vsel %vm70_vm0, %v4899_v51, 0.0  ;;  %vm4966_vm9 = vcmp.ne.f32.partialorder %v4899_v51, %v4899_v51 }
 0xa3f   :  { %4902 = vadd.xlane.f32.xlu0 %v4901_v16  ;;  %v5212_v56 = vpop.f32.mrf.mxu0  ;;  %v5066_v25 = vsel %vm4966_vm9, 1.0, %v5326_v12 }
 0xa40   :  { %v4900_v35 = vadd.f32 %v5280_v54, %v4896_v22  ;;  %v4972_v11 = vsel %vm70_vm0, %v5066_v25, -inf }
 0xa42   :  { %4947 = vst.msk [vmem:[#allocation2 + $0x8] sm:$0xff] %vm70_vm0, %v4900_v35  ;;  %v4904_v5 = vsel %vm70_vm0, %v4900_v35, 0.0  ;;  %vm4967_vm8 = vcmp.ne.f32.partialorder %v4900_v35, %v4900_v35 }
 0xa43   :  { %4905 = vadd.xlane.f32.xlu1 %v4904_v5  ;;  %v5067_v24 = vsel %vm4967_vm8, 1.0, %v5326_v12 }
 0xa44   :  { %v4973_v1 = vsel %vm70_vm0, %v5067_v24, -inf }
 0xa45   :  { %v4974_v40 = vmax.f32 %v4972_v11, %v4973_v1 }
 0xac8   :  { %v4903_v9 = vpop.xlane.xlu0 %4902 }
 0xac9   :  { %v4908_v42 = vmul.f32 0.03125, %v4903_v9 }
 0xacb   :  { %v4910_v2 = vsub.f32 %v4899_v51, %v4908_v42 }
 0xacc   :  { %v4906_v23 = vpop.xlane.xlu1 %4905 }
 0xacd   :  { %v4909_v46 = vmul.f32 0.03125, %v4906_v23  ;;  %v4912_v45 = vmul.f32 %v4910_v2, %v4910_v2 }
 0xacf   :  { %v4911_v50 = vsub.f32 %v4900_v35, %v4909_v46  ;;  %v4914_v17 = vsel %vm70_vm0, %v4912_v45, 0.0 }
 0xad0   :  { %4915 = vadd.xlane.f32.xlu0 %v4914_v17 }
 0xad1   :  { %v4913_v53 = vmul.f32 %v4911_v50, %v4911_v50 }
 0xad3   :  { %v4917_v21 = vsel %vm70_vm0, %v4913_v53, 0.0 }
 0xad4   :  { %4918 = vadd.xlane.f32.xlu0 %v4917_v21 }
 0xad8   :  { %4975 = vmax.xlane.f32.xlu0 %v4974_v40 }
 0xb59   :  { %v4916_v13 = vpop.xlane.xlu0 %4915 }
 0xb5a   :  { %v4920_v0 = vmul.f32 0.03125, %v4916_v13 }
 0xb5c   :  { %v4922_v31 = vadd.f32 1e-05, %v4920_v0 }
 0xb5d   :  { %v4919_v33 = vpop.xlane.xlu0 %4918 }
 0xb5e   :  { %5275 = vrsqrt.f32 %v4922_v31  ;;  %v4921_v37 = vmul.f32 0.03125, %v4919_v33 }
 0xb60   :  { %v4923_v30 = vadd.f32 1e-05, %v4921_v37 }
 0xb62   :  { %5277 = vrsqrt.f32 %v4923_v30 }
 0xb6b   :  { %v5276_v15 = vpop.eup %5275 }
 0xb6c   :  { %v4926_v49 = vmul.f32 %v5276_v15, %v4910_v2 }
 0xb6e   :  { %v4935_v61 = vmul.f32 %v5062_v47, %v4926_v49 }
 0xb6f   :  { %v5278_v39 = vpop.eup %5277 }
 0xb70   :  { %v4927_v27 = vmul.f32 %v5278_v39, %v4911_v50  ;;  %v4944_v29 = vadd.f32 %v5063_v18, %v4935_v61 }
 0xb72   :  { %v4936_v19 = vmul.f32 %v5062_v47, %v4927_v27  ;;  %vm4948_vm10 = vcmp.ne.f32.partialorder %v4944_v29, %v4944_v29 }
 0xb73   :  { %v5064_v10 = vsel %vm4948_vm10, 1.0, %v5326_v12 }
 0xb74   :  { %v4945_v26 = vadd.f32 %v5063_v18, %v4936_v19  ;;  %v4954_v32 = vsel %vm70_vm0, %v5064_v10, -inf }
 0xb76   :  { %vm4949_vm11 = vcmp.ne.f32.partialorder %v4945_v26, %v4945_v26 }
 0xb77   :  { %v5065_v7 = vsel %vm4949_vm11, 1.0, %v5326_v12 }
 0xb78   :  { %v4955_v41 = vsel %vm70_vm0, %v5065_v7, -inf }
 0xb79   :  { %v4956_v57 = vmax.f32 %v4954_v32, %v4955_v41 }
 0xb7b   :  { %4957 = vmax.xlane.f32.xlu1 %v4956_v57 }
 0xb7c   :  { %5292 = shalt.err (!%p5289_p4)
}
 0xb7d   :  { %s5338_s17 = smov 128   ;;  %s5339_s18 = smov 8   ;;  %v4976_v12 = vpop.xlane.xlu0 %4975  ;;  %v4985_v63 = vand.u32 127, %v40_v8 }
 0xb7e   :  { %5004 = dma.vmem_to_hbm [thread:$0]  %s4999_s6, 256, %s6147_s7, [#allocation3], %s5338_s17, %s5338_s17, %s5339_s18   ;;  %v4977_v38 = vrot.slane %v4976_v12, 4 }
 0xb7f   :  { %vm4987_vm12 = vcmp.eq.s32.totalorder %v4985_v63, 1  ;;  %s5340_s7 = smov [#allocation4]   ;;  %vm4986_vm13 = vcmp.eq.s32.totalorder %v4985_v63, 0 }
 0xb80   :  { %v4978_v20 = vmax.f32 %v4976_v12, %v4977_v38  ;;  %s5011_s21 = sshll.u32 %s5340_s7, 4  ;;  %s5012_s21 = int_to_ptr.vmem [resolvable:$true] %s5011_s21 }
 0xb81   :  { %s5301_s23 = scalar_lea.vmem %s5012_s21, 16  ;;  %s5305_s24 = scalar_lea.vmem %s5012_s21, 32 }
 0xb82   :  { %v4979_v34 = vrot.slane %v4978_v20, 2  ;;  %p5302_p5 = scmp.ne.s32.totalorder %s5012_s21, %s5301_s23  ;;  %p5306_p6 = scmp.lt.s32.totalorder %s5012_s21, %s5012_s21 }
 0xb83   :  { %p5307_p7 = scmp.lt.s32.totalorder %s5305_s24, %s5301_s23 }
 0xb84   :  { %v4980_v52 = vmax.f32 %v4978_v20, %v4979_v34 }
 0xb85   :  { %p5308_p8 = por %p5307_p7, %p5306_p6 }
 0xb86   :  { %v4981_v60 = vrot.slane %v4980_v52, 1 }
 0xb87   :  { %p5309_p9 = pnand %p5308_p8, %p5302_p5 }
 0xb88   :  { %v4982_v62 = vmax.f32 %v4980_v52, %v4981_v60 }
 0xc04   :  { %v4958_v59 = vpop.xlane.xlu1 %4957 }
 0xc05   :  { %v4959_v43 = vrot.slane %v4958_v59, 4 }
 0xc07   :  { %v4960_v44 = vmax.f32 %v4958_v59, %v4959_v43 }
 0xc09   :  { %v4961_v48 = vrot.slane %v4960_v44, 2 }
 0xc0b   :  { %v4962_v58 = vmax.f32 %v4960_v44, %v4961_v48 }
 0xc0d   :  { %v4963_v55 = vrot.slane %v4962_v58, 1 }
 0xc0f   :  { %v4964_v28 = vmax.f32 %v4962_v58, %v4963_v55 }
 0xc11   :  { %5213 = vpush %v4964_v28 }
 0xc12   :  { %5215 = vpush %v4982_v62 }
 0xc42   :  { %s5214_s20 = spop %5213 }
 0xc43   :  { %v4990_v3 = vstv %s5214_s20  ;;  %s5216_s22 = spop %5215 }
 0xc44   :  { %v4988_v4 = vstv %s5216_s22 }
 0xc45   :  { %v4989_v14 = vsel %vm4987_vm12, %v4988_v4, 0.0 }
 0xc46   :  { %v4991_v36 = vsel %vm4986_vm13, %v4990_v3, %v4989_v14 }
 0xc47   :  { %4992 = vst [vmem:[#allocation4] sm:$0x1] %v4991_v36 }
 0xc48   :  { %5312 = shalt.err (!%p5309_p9)
}
 0xc49   :  { %5014 = dma.vmem_to_hbm [thread:$0]  %s5012_s21, 16, %s6148_s8, [#allocation5]  }
 0xc4a   :  { %5321 = dma.done.wait [#allocation3], 256  }
 0xc4b   :  { %5322 = vsyncadd [#allocation3], 4294967040 }
 0xc4c   :  { %5323 = dma.done.wait [#allocation5], 16  }
 0xc4d   :  { %5324 = vsyncadd [#allocation5], 4294967280 }
 0xc4e   :  { %5021 = vsyncpa [#allocation3], 1 }
 0xc4f   :  { %5022 = vsyncpa [#allocation5], 1 }

</bundles_post_ra>
